<compile_context>
chip_gen: v6e
topology: v6e:2x2x1
jax: 0.10.0
libtpu: 0.0.40
codegen_flags: <defaults>
</compile_context>

<pallas_src>
import functools

import jax
import jax.numpy as jnp
from jax import lax
from jax.experimental import pallas as pl
from jax.experimental.pallas import tpu as pltpu


def _layernorm(x, gamma, beta, eps=1e-5):
    # PyTorch LayerNorm: biased variance over last dim, elementwise affine.
    mean = jnp.mean(x, axis=-1, keepdims=True)
    var = jnp.mean((x - mean) ** 2, axis=-1, keepdims=True)
    return (x - mean) * lax.rsqrt(var + eps) * gamma + beta


def _transformer_block_kernel(*refs, heads, head_dim, embed_size, causal, compute_dtype):
    if causal:
        (v_ref, k_ref, q_ref,
         wv_ref, bv_ref, wk_ref, bk_ref, wq_ref, bq_ref, wo_ref, bo_ref,
         g1_ref, be1_ref, g2_ref, be2_ref,
         w1_ref, b1_ref, w2_ref, b2_ref,
         out_ref) = refs
        mask_ref = None
    else:
        (v_ref, k_ref, q_ref, mask_ref,
         wv_ref, bv_ref, wk_ref, bk_ref, wq_ref, bq_ref, wo_ref, bo_ref,
         g1_ref, be1_ref, g2_ref, be2_ref,
         w1_ref, b1_ref, w2_ref, b2_ref,
         out_ref) = refs

    f32 = jnp.float32
    cdt = compute_dtype

    v_in = v_ref[...]            # (Lk, E) f32
    k_in = k_ref[...]            # (Lk, E) f32
    q_in = q_ref[...]            # (tq, E) f32
    tq = q_in.shape[0]
    Lk = k_in.shape[0]

    # --- projections (MXU, f32 accumulation; operands in compute dtype) ---
    V = jnp.dot(v_in.astype(cdt), wv_ref[...], preferred_element_type=f32) + bv_ref[...]
    K = jnp.dot(k_in.astype(cdt), wk_ref[...], preferred_element_type=f32) + bk_ref[...]
    Q = jnp.dot(q_in.astype(cdt), wq_ref[...], preferred_element_type=f32) + bq_ref[...]

    # Fold the softmax scale into Q once: one (tq,E) mul instead of a
    # (tq,Lk) mul per head.  (Module scales by 1/sqrt(embed_size).)
    Q = Q * (1.0 / (embed_size ** 0.5))

    Qc = Q.astype(cdt)
    Kc = K.astype(cdt)
    Vc = V.astype(cdt)
    wo = wo_ref[...]             # (E, E) in compute dtype

    # --- additive mask bias, computed once per grid step (hoisted out of head loop) ---
    if causal:
        # Generate the causal mask in-kernel: no dense f32 mask from HBM.
        q_pos = pl.program_id(1) * tq + lax.broadcasted_iota(jnp.int32, (tq, Lk), 0)
        k_pos = lax.broadcasted_iota(jnp.int32, (tq, Lk), 1)
        bias = jnp.where(q_pos >= k_pos, f32(0.0), f32(-1e20))
    else:
        bias = jnp.where(mask_ref[...] == 0.0, f32(-1e20), f32(0.0))

    # --- per-head attention; head outputs stay in registers and are folded
    #     straight into the fc_out projection (no VMEM scratch round trip,
    #     no narrow masked stores, no concat relayout) ---
    dn = (((1,), (1,)), ((), ()))        # contract last dims (no explicit transpose)
    att = jnp.zeros((tq, embed_size), dtype=f32)
    for h in range(heads):
        lo = h * head_dim
        hi = lo + head_dim
        qh = Qc[:, lo:hi]                # (tq, D)
        kh = Kc[:, lo:hi]                # (Lk, D)
        vh = Vc[:, lo:hi]                # (Lk, D)

        energy = lax.dot_general(qh, kh, dn, preferred_element_type=f32)  # (tq, Lk)
        logits = energy + bias
        m = jnp.max(logits, axis=-1, keepdims=True)
        p = jnp.exp(logits - m)
        denom = jnp.sum(p, axis=-1, keepdims=True)
        attn = p * pl.reciprocal(denom, approx=True)   # EUP; keeps VALU free

        out_h = jnp.dot(attn.astype(cdt), vh, preferred_element_type=f32)        # (tq, D)
        att = att + jnp.dot(out_h.astype(cdt), wo[lo:hi, :],
                            preferred_element_type=f32)                          # (tq, E)
    att = att + bo_ref[...]

    # --- residual + norm1 (dropout = identity) ---
    x = _layernorm(att + q_in, g1_ref[...], be1_ref[...])

    # --- feed forward: Linear -> ReLU -> Linear ---
    # NOTE: for v7x (64 MiB VMEM) with large E / hidden, tile the hidden dim
    # here (emit_pipeline over w1 columns / w2 rows) instead of keeping both
    # FFN weights fully resident.
    h1 = jnp.dot(x.astype(cdt), w1_ref[...], preferred_element_type=f32) + b1_ref[...]
    h1 = jnp.maximum(h1, 0.0)
    ff = jnp.dot(h1.astype(cdt), w2_ref[...], preferred_element_type=f32) + b2_ref[...]

    # --- residual + norm2 (dropout = identity) ---
    out_ref[...] = _layernorm(ff + x, g2_ref[...], be2_ref[...]).astype(out_ref.dtype)


def transformer_block(value, key, query, mask, params, *, heads,
                      causal=False, compute_dtype=jnp.float32,
                      block_q=512, vmem_limit_bytes=None,
                      single_buffer_weights=True):
    N, Lq, E = query.shape
    Lk = key.shape[1]
    Lv = value.shape[1]
    assert E % heads == 0
    head_dim = E // heads
    hidden = params["w1"].shape[1]

    # q-row tiling: second (parallel) grid axis so long sequences pipeline and
    # spread across TensorCores; full Lq when it is small or doesn't divide.
    if Lq > block_q and block_q % 8 == 0 and Lq % block_q == 0:
        tq = block_q
    else:
        tq = Lq
    n_q = Lq // tq

    # Matmul weights in the compute dtype (bf16 halves weight HBM/VMEM traffic
    # and feeds the MXU at native rate); biases / LN params stay f32.
    wdt = compute_dtype
    wv = params["wv"].astype(wdt); wk = params["wk"].astype(wdt)
    wq = params["wq"].astype(wdt); wo = params["wo"].astype(wdt)
    w1 = params["w1"].astype(wdt); w2 = params["w2"].astype(wdt)

    kernel = functools.partial(
        _transformer_block_kernel,
        heads=heads, head_dim=head_dim, embed_size=E,
        causal=causal, compute_dtype=compute_dtype)

    v_spec = pl.BlockSpec((pl.Squeezed(), Lv, E), lambda n, q: (n, 0, 0))
    k_spec = pl.BlockSpec((pl.Squeezed(), Lk, E), lambda n, q: (n, 0, 0))
    q_spec = pl.BlockSpec((pl.Squeezed(), tq, E), lambda n, q: (n, q, 0))
    m_spec = pl.BlockSpec((pl.Squeezed(), tq, Lk), lambda n, q: (n, q, 0))
    o_spec = pl.BlockSpec((pl.Squeezed(), tq, E), lambda n, q: (n, q, 0))

    def build(weight_mode):
        def wspec(shape):
            if weight_mode is None:
                return pl.BlockSpec(shape, lambda n, q: (0, 0))
            return pl.BlockSpec(shape, lambda n, q: (0, 0), pipeline_mode=weight_mode)

        in_specs = [v_spec, k_spec, q_spec]
        if not causal:
            in_specs.append(m_spec)
        in_specs += [
            wspec((E, E)), wspec((1, E)),            # wv, bv
            wspec((E, E)), wspec((1, E)),            # wk, bk
            wspec((E, E)), wspec((1, E)),            # wq, bq
            wspec((E, E)), wspec((1, E)),            # wo, bo
            wspec((1, E)), wspec((1, E)),            # gamma1, beta1
            wspec((1, E)), wspec((1, E)),            # gamma2, beta2
            wspec((E, hidden)), wspec((1, hidden)),  # w1, b1
            wspec((hidden, E)), wspec((1, E)),       # w2, b2
        ]
        return pl.pallas_call(
            kernel,
            out_shape=jax.ShapeDtypeStruct((N, Lq, E), jnp.float32),
            grid_spec=pltpu.PrefetchScalarGridSpec(
                num_scalar_prefetch=0,
                grid=(N, n_q),
                in_specs=in_specs,
                out_specs=o_spec,
            ),
            compiler_params=pltpu.CompilerParams(
                dimension_semantics=("parallel", "parallel"),
                vmem_limit_bytes=vmem_limit_bytes),
        )

    args = [value, key, query]
    if not causal:
        args.append(mask)
    args += [wv, params["bv"], wk, params["bk"], wq, params["bq"], wo, params["bo"],
             params["g1"], params["beta1"], params["g2"], params["beta2"],
             w1, params["b1"], w2, params["b2"]]

    if single_buffer_weights:
        try:
            # Weight/bias/LN blocks have a constant index_map -> single buffer
            # (double-buffering them is pure VMEM waste).
            return build(pl.Buffered(1))(*args)
        except Exception:
            pass  # this JAX build rejects buffer_count=1 -> default buffering
    return build(None)(*args)


def reference_block(value, key, query, mask, params, *, heads):
    """Pure-JAX reference mirroring the PyTorch forward."""
    N, Lq, E = query.shape
    D = E // heads
    V = value @ params["wv"] + params["bv"]
    K = key @ params["wk"] + params["bk"]
    Q = query @ params["wq"] + params["bq"]
    V = V.reshape(N, -1, heads, D)
    K = K.reshape(N, -1, heads, D)
    Q = Q.reshape(N, Lq, heads, D)
    energy = jnp.einsum("nqhd,nkhd->nhqk", Q, K)
    energy = jnp.where(mask[:, None, :, :] == 0.0, -1e20, energy)
    attn = jax.nn.softmax(energy / (E ** 0.5), axis=3)
    out = jnp.einsum("nhql,nlhd->nqhd", attn, V).reshape(N, Lq, E)
    out = out @ params["wo"] + params["bo"]

    def ln(x, g, b):
        m = jnp.mean(x, axis=-1, keepdims=True)
        v = jnp.mean((x - m) ** 2, axis=-1, keepdims=True)
        return (x - m) / jnp.sqrt(v + 1e-5) * g + b

    x = ln(out + query, params["g1"], params["beta1"])
    h1 = jnp.maximum(x @ params["w1"] + params["b1"], 0.0)
    ff = h1 @ params["w2"] + params["b2"]
    return ln(ff + x, params["g2"], params["beta2"])


def init_params(rng, embed_size, hidden):
    keys = jax.random.split(rng, 10)
    s_e = 1.0 / (embed_size ** 0.5)
    s_h = 1.0 / (hidden ** 0.5)
    return {
        # weights stored as [in, out] (i.e. PyTorch weight transposed)
        "wv": jax.random.uniform(keys[0], (embed_size, embed_size), jnp.float32, -s_e, s_e),
        "wk": jax.random.uniform(keys[1], (embed_size, embed_size), jnp.float32, -s_e, s_e),
        "wq": jax.random.uniform(keys[2], (embed_size, embed_size), jnp.float32, -s_e, s_e),
        "wo": jax.random.uniform(keys[3], (embed_size, embed_size), jnp.float32, -s_e, s_e),
        "bv": jax.random.uniform(keys[4], (1, embed_size), jnp.float32, -s_e, s_e),
        "bk": jax.random.uniform(keys[5], (1, embed_size), jnp.float32, -s_e, s_e),
        "bq": jax.random.uniform(keys[6], (1, embed_size), jnp.float32, -s_e, s_e),
        "bo": jax.random.uniform(keys[7], (1, embed_size), jnp.float32, -s_e, s_e),
        "g1": jnp.ones((1, embed_size), jnp.float32),
        "beta1": jnp.zeros((1, embed_size), jnp.float32),
        "g2": jnp.ones((1, embed_size), jnp.float32),
        "beta2": jnp.zeros((1, embed_size), jnp.float32),
        "w1": jax.random.uniform(keys[8], (embed_size, hidden), jnp.float32, -s_e, s_e),
        "b1": jnp.zeros((1, hidden), jnp.float32),
        "w2": jax.random.uniform(keys[9], (hidden, embed_size), jnp.float32, -s_h, s_h),
        "b2": jnp.zeros((1, embed_size), jnp.float32),
    }


if __name__ == "__main__":
    N, L, E, heads, expansion = 2, 8, 32, 4, 4
    hidden = expansion * E

    root = jax.random.PRNGKey(0)
    k_v, k_k, k_q, k_p = jax.random.split(root, 4)

    value = jax.random.normal(k_v, (N, L, E), jnp.float32)
    key = jax.random.normal(k_k, (N, L, E), jnp.float32)
    query = jax.random.normal(k_q, (N, L, E), jnp.float32)
    # causal mask, broadcast over heads (PyTorch: energy.masked_fill(mask == 0, -1e20))
    mask = jnp.tril(jnp.ones((L, L), jnp.float32))[None].repeat(N, axis=0)

    params = init_params(k_p, E, hidden)
    ref = reference_block(value, key, query, mask, params, heads=heads)

    # 1) f32 compute, dense mask streamed in.
    out = transformer_block(value, key, query, mask, params, heads=heads)
    out = jax.block_until_ready(out)
    assert out.shape == (N, L, E)
    assert jnp.allclose(out, ref, atol=5e-3, rtol=5e-3), "mismatch vs reference (f32/mask)"

    # 2) f32 compute, causal mask generated in-kernel (no HBM mask read).
    out_c = transformer_block(value, key, query, None, params, heads=heads, causal=True)
    out_c = jax.block_until_ready(out_c)
    assert jnp.allclose(out_c, ref, atol=5e-3, rtol=5e-3), "mismatch vs reference (causal)"

    # 3) bf16 MXU matmuls with f32 accumulation — loose sanity tolerance vs f32 ref.
    out_bf16 = transformer_block(value, key, query, mask, params, heads=heads,
                                 compute_dtype=jnp.bfloat16)
    out_bf16 = jax.block_until_ready(out_bf16)
    assert jnp.max(jnp.abs(out_bf16 - ref)) < 0.15, "bf16 path diverged from reference"

    print("KERNEL_OK")
</pallas_src>

<mosaic_0001>
module attributes {stable_mosaic.version = 11 : i64} {
  func.func @_transformer_block_kernel(%arg0: i32, %arg1: i32, %arg2: memref<1x8x32xf32, #tpu.memory_space<vmem>>, %arg3: memref<1x8x32xf32, #tpu.memory_space<vmem>>, %arg4: memref<1x8x32xf32, #tpu.memory_space<vmem>>, %arg5: memref<1x8x8xf32, #tpu.memory_space<vmem>>, %arg6: memref<32x32xf32, #tpu.memory_space<vmem>>, %arg7: memref<1x32xf32, #tpu.memory_space<vmem>>, %arg8: memref<32x32xf32, #tpu.memory_space<vmem>>, %arg9: memref<1x32xf32, #tpu.memory_space<vmem>>, %arg10: memref<32x32xf32, #tpu.memory_space<vmem>>, %arg11: memref<1x32xf32, #tpu.memory_space<vmem>>, %arg12: memref<32x32xf32, #tpu.memory_space<vmem>>, %arg13: memref<1x32xf32, #tpu.memory_space<vmem>>, %arg14: memref<1x32xf32, #tpu.memory_space<vmem>>, %arg15: memref<1x32xf32, #tpu.memory_space<vmem>>, %arg16: memref<1x32xf32, #tpu.memory_space<vmem>>, %arg17: memref<1x32xf32, #tpu.memory_space<vmem>>, %arg18: memref<32x128xf32, #tpu.memory_space<vmem>>, %arg19: memref<1x128xf32, #tpu.memory_space<vmem>>, %arg20: memref<128x32xf32, #tpu.memory_space<vmem>>, %arg21: memref<1x32xf32, #tpu.memory_space<vmem>>, %arg22: memref<1x8x32xf32, #tpu.memory_space<vmem>>) attributes {dimension_semantics = [#tpu.dimension_semantics<parallel>, #tpu.dimension_semantics<parallel>], iteration_bounds = array<i64: 2, 1>, scalar_prefetch = 0 : i64, scratch_operands = 0 : i64, tpu.core_type = #tpu.core_type<tc>, window_params = [{transform_indices = @transform_0, window_bounds = array<i64: 1, 8, 32>}, {transform_indices = @transform_1, window_bounds = array<i64: 1, 8, 32>}, {transform_indices = @transform_2, window_bounds = array<i64: 1, 8, 32>}, {transform_indices = @transform_3, window_bounds = array<i64: 1, 8, 8>}, {pipeline_mode = #tpu.pipeline_mode<synchronous>, transform_indices = @transform_4, window_bounds = array<i64: 32, 32>}, {pipeline_mode = #tpu.pipeline_mode<synchronous>, transform_indices = @transform_5, window_bounds = array<i64: 1, 32>}, {pipeline_mode = #tpu.pipeline_mode<synchronous>, transform_indices = @transform_6, window_bounds = array<i64: 32, 32>}, {pipeline_mode = #tpu.pipeline_mode<synchronous>, transform_indices = @transform_7, window_bounds = array<i64: 1, 32>}, {pipeline_mode = #tpu.pipeline_mode<synchronous>, transform_indices = @transform_8, window_bounds = array<i64: 32, 32>}, {pipeline_mode = #tpu.pipeline_mode<synchronous>, transform_indices = @transform_9, window_bounds = array<i64: 1, 32>}, {pipeline_mode = #tpu.pipeline_mode<synchronous>, transform_indices = @transform_10, window_bounds = array<i64: 32, 32>}, {pipeline_mode = #tpu.pipeline_mode<synchronous>, transform_indices = @transform_11, window_bounds = array<i64: 1, 32>}, {pipeline_mode = #tpu.pipeline_mode<synchronous>, transform_indices = @transform_12, window_bounds = array<i64: 1, 32>}, {pipeline_mode = #tpu.pipeline_mode<synchronous>, transform_indices = @transform_13, window_bounds = array<i64: 1, 32>}, {pipeline_mode = #tpu.pipeline_mode<synchronous>, transform_indices = @transform_14, window_bounds = array<i64: 1, 32>}, {pipeline_mode = #tpu.pipeline_mode<synchronous>, transform_indices = @transform_15, window_bounds = array<i64: 1, 32>}, {pipeline_mode = #tpu.pipeline_mode<synchronous>, transform_indices = @transform_16, window_bounds = array<i64: 32, 128>}, {pipeline_mode = #tpu.pipeline_mode<synchronous>, transform_indices = @transform_17, window_bounds = array<i64: 1, 128>}, {pipeline_mode = #tpu.pipeline_mode<synchronous>, transform_indices = @transform_18, window_bounds = array<i64: 128, 32>}, {pipeline_mode = #tpu.pipeline_mode<synchronous>, transform_indices = @transform_19, window_bounds = array<i64: 1, 32>}, {transform_indices = @transform_20, window_bounds = array<i64: 1, 8, 32>}]} {
    %c0 = arith.constant 0 : index
    %c0_0 = arith.constant 0 : index
    %c0_1 = arith.constant 0 : index
    %0 = vector.load %arg2[%c0, %c0_0, %c0_1] : memref<1x8x32xf32, #tpu.memory_space<vmem>>, vector<1x8x32xf32>
    %1 = vector.shape_cast %0 : vector<1x8x32xf32> to vector<8x32xf32>
    %c0_2 = arith.constant 0 : index
    %c0_3 = arith.constant 0 : index
    %c0_4 = arith.constant 0 : index
    %2 = vector.load %arg3[%c0_2, %c0_3, %c0_4] : memref<1x8x32xf32, #tpu.memory_space<vmem>>, vector<1x8x32xf32>
    %3 = vector.shape_cast %2 : vector<1x8x32xf32> to vector<8x32xf32>
    %c0_5 = arith.constant 0 : index
    %c0_6 = arith.constant 0 : index
    %c0_7 = arith.constant 0 : index
    %4 = vector.load %arg4[%c0_5, %c0_6, %c0_7] : memref<1x8x32xf32, #tpu.memory_space<vmem>>, vector<1x8x32xf32>
    %5 = vector.shape_cast %4 : vector<1x8x32xf32> to vector<8x32xf32>
    %c0_8 = arith.constant 0 : index
    %c0_9 = arith.constant 0 : index
    %6 = vector.load %arg6[%c0_8, %c0_9] : memref<32x32xf32, #tpu.memory_space<vmem>>, vector<32x32xf32>
    %cst = arith.constant dense<0.000000e+00> : vector<8x32xf32>
    %7 = tpu.matmul %1, %6, %cst {dimension_numbers = #tpu.dot_dimension_numbers<[1], [0], [0], [1], [0, 0, 1, 1], [], []>} : vector<8x32xf32>, vector<32x32xf32>, vector<8x32xf32> -> vector<8x32xf32>
    %c0_10 = arith.constant 0 : index
    %c0_11 = arith.constant 0 : index
    %8 = vector.load %arg7[%c0_10, %c0_11] : memref<1x32xf32, #tpu.memory_space<vmem>>, vector<1x32xf32>
    %9 = vector.broadcast %8 : vector<1x32xf32> to vector<8x32xf32>
    %10 = arith.addf %7, %9 : vector<8x32xf32>
    %c0_12 = arith.constant 0 : index
    %c0_13 = arith.constant 0 : index
    %11 = vector.load %arg8[%c0_12, %c0_13] : memref<32x32xf32, #tpu.memory_space<vmem>>, vector<32x32xf32>
    %cst_14 = arith.constant dense<0.000000e+00> : vector<8x32xf32>
    %12 = tpu.matmul %3, %11, %cst_14 {dimension_numbers = #tpu.dot_dimension_numbers<[1], [0], [0], [1], [0, 0, 1, 1], [], []>} : vector<8x32xf32>, vector<32x32xf32>, vector<8x32xf32> -> vector<8x32xf32>
    %c0_15 = arith.constant 0 : index
    %c0_16 = arith.constant 0 : index
    %13 = vector.load %arg9[%c0_15, %c0_16] : memref<1x32xf32, #tpu.memory_space<vmem>>, vector<1x32xf32>
    %14 = vector.broadcast %13 : vector<1x32xf32> to vector<8x32xf32>
    %15 = arith.addf %12, %14 : vector<8x32xf32>
    %c0_17 = arith.constant 0 : index
    %c0_18 = arith.constant 0 : index
    %16 = vector.load %arg10[%c0_17, %c0_18] : memref<32x32xf32, #tpu.memory_space<vmem>>, vector<32x32xf32>
    %cst_19 = arith.constant dense<0.000000e+00> : vector<8x32xf32>
    %17 = tpu.matmul %5, %16, %cst_19 {dimension_numbers = #tpu.dot_dimension_numbers<[1], [0], [0], [1], [0, 0, 1, 1], [], []>} : vector<8x32xf32>, vector<32x32xf32>, vector<8x32xf32> -> vector<8x32xf32>
    %c0_20 = arith.constant 0 : index
    %c0_21 = arith.constant 0 : index
    %18 = vector.load %arg11[%c0_20, %c0_21] : memref<1x32xf32, #tpu.memory_space<vmem>>, vector<1x32xf32>
    %19 = vector.broadcast %18 : vector<1x32xf32> to vector<8x32xf32>
    %20 = arith.addf %17, %19 : vector<8x32xf32>
    %cst_22 = arith.constant 0.176776692 : f32
    %21 = vector.broadcast %cst_22 : f32 to vector<8x32xf32>
    %22 = arith.mulf %20, %21 : vector<8x32xf32>
    %c0_23 = arith.constant 0 : index
    %c0_24 = arith.constant 0 : index
    %23 = vector.load %arg12[%c0_23, %c0_24] : memref<32x32xf32, #tpu.memory_space<vmem>>, vector<32x32xf32>
    %c0_25 = arith.constant 0 : index
    %c0_26 = arith.constant 0 : index
    %c0_27 = arith.constant 0 : index
    %24 = vector.load %arg5[%c0_25, %c0_26, %c0_27] : memref<1x8x8xf32, #tpu.memory_space<vmem>>, vector<1x8x8xf32>
    %25 = vector.shape_cast %24 : vector<1x8x8xf32> to vector<8x8xf32>
    %cst_28 = arith.constant 0.000000e+00 : f32
    %26 = vector.broadcast %cst_28 : f32 to vector<8x8xf32>
    %27 = arith.cmpf oeq, %25, %26 : vector<8x8xf32>
    %cst_29 = arith.constant -1.000000e+20 : f32
    %cst_30 = arith.constant 0.000000e+00 : f32
    %28 = vector.broadcast %cst_29 : f32 to vector<8x8xf32>
    %29 = vector.broadcast %cst_30 : f32 to vector<8x8xf32>
    %30 = arith.select %27, %28, %29 : vector<8x8xi1>, vector<8x8xf32>
    %cst_31 = arith.constant 0.000000e+00 : f32
    %31 = vector.broadcast %cst_31 : f32 to vector<8x32xf32>
    %32 = vector.extract_strided_slice %22 {offsets = [0, 0], sizes = [8, 8], strides = [1, 1]} : vector<8x32xf32> to vector<8x8xf32>
    %33 = vector.extract_strided_slice %15 {offsets = [0, 0], sizes = [8, 8], strides = [1, 1]} : vector<8x32xf32> to vector<8x8xf32>
    %34 = vector.extract_strided_slice %10 {offsets = [0, 0], sizes = [8, 8], strides = [1, 1]} : vector<8x32xf32> to vector<8x8xf32>
    %cst_32 = arith.constant dense<0.000000e+00> : vector<8x8xf32>
    %35 = tpu.matmul %32, %33, %cst_32 {dimension_numbers = #tpu.dot_dimension_numbers<[1], [1], [0], [0], [0, 0, 1, 0], [], []>} : vector<8x8xf32>, vector<8x8xf32>, vector<8x8xf32> -> vector<8x8xf32>
    %36 = arith.addf %35, %30 : vector<8x8xf32>
    %cst_33 = arith.constant dense<0xFF800000> : vector<8xf32>
    %37 = vector.multi_reduction <maximumf>, %36, %cst_33 [1] : vector<8x8xf32> to vector<8xf32>
    %38 = vector.shape_cast %37 : vector<8xf32> to vector<8x1xf32>
    %39 = vector.broadcast %38 : vector<8x1xf32> to vector<8x8xf32>
    %40 = arith.subf %36, %39 : vector<8x8xf32>
    %41 = math.exp %40 : vector<8x8xf32>
    %cst_34 = arith.constant dense<0.000000e+00> : vector<8xf32>
    %42 = vector.multi_reduction <add>, %41, %cst_34 [1] : vector<8x8xf32> to vector<8xf32>
    %43 = vector.shape_cast %42 : vector<8xf32> to vector<8x1xf32>
    %44 = tpu.reciprocal %43 {approx = true} : vector<8x1xf32> -> vector<8x1xf32>
    %45 = vector.broadcast %44 : vector<8x1xf32> to vector<8x8xf32>
    %46 = arith.mulf %41, %45 : vector<8x8xf32>
    %cst_35 = arith.constant dense<0.000000e+00> : vector<8x8xf32>
    %47 = tpu.matmul %46, %34, %cst_35 {dimension_numbers = #tpu.dot_dimension_numbers<[1], [0], [0], [1], [0, 0, 1, 1], [], []>} : vector<8x8xf32>, vector<8x8xf32>, vector<8x8xf32> -> vector<8x8xf32>
    %48 = vector.extract_strided_slice %23 {offsets = [0, 0], sizes = [8, 32], strides = [1, 1]} : vector<32x32xf32> to vector<8x32xf32>
    %cst_36 = arith.constant dense<0.000000e+00> : vector<8x32xf32>
    %49 = tpu.matmul %47, %48, %cst_36 {dimension_numbers = #tpu.dot_dimension_numbers<[1], [0], [0], [1], [0, 0, 1, 1], [], []>} : vector<8x8xf32>, vector<8x32xf32>, vector<8x32xf32> -> vector<8x32xf32>
    %50 = arith.addf %31, %49 : vector<8x32xf32>
    %51 = vector.extract_strided_slice %22 {offsets = [0, 8], sizes = [8, 8], strides = [1, 1]} : vector<8x32xf32> to vector<8x8xf32>
    %52 = vector.extract_strided_slice %15 {offsets = [0, 8], sizes = [8, 8], strides = [1, 1]} : vector<8x32xf32> to vector<8x8xf32>
    %53 = vector.extract_strided_slice %10 {offsets = [0, 8], sizes = [8, 8], strides = [1, 1]} : vector<8x32xf32> to vector<8x8xf32>
    %cst_37 = arith.constant dense<0.000000e+00> : vector<8x8xf32>
    %54 = tpu.matmul %51, %52, %cst_37 {dimension_numbers = #tpu.dot_dimension_numbers<[1], [1], [0], [0], [0, 0, 1, 0], [], []>} : vector<8x8xf32>, vector<8x8xf32>, vector<8x8xf32> -> vector<8x8xf32>
    %55 = arith.addf %54, %30 : vector<8x8xf32>
    %cst_38 = arith.constant dense<0xFF800000> : vector<8xf32>
    %56 = vector.multi_reduction <maximumf>, %55, %cst_38 [1] : vector<8x8xf32> to vector<8xf32>
    %57 = vector.shape_cast %56 : vector<8xf32> to vector<8x1xf32>
    %58 = vector.broadcast %57 : vector<8x1xf32> to vector<8x8xf32>
    %59 = arith.subf %55, %58 : vector<8x8xf32>
    %60 = math.exp %59 : vector<8x8xf32>
    %cst_39 = arith.constant dense<0.000000e+00> : vector<8xf32>
    %61 = vector.multi_reduction <add>, %60, %cst_39 [1] : vector<8x8xf32> to vector<8xf32>
    %62 = vector.shape_cast %61 : vector<8xf32> to vector<8x1xf32>
    %63 = tpu.reciprocal %62 {approx = true} : vector<8x1xf32> -> vector<8x1xf32>
    %64 = vector.broadcast %63 : vector<8x1xf32> to vector<8x8xf32>
    %65 = arith.mulf %60, %64 : vector<8x8xf32>
    %cst_40 = arith.constant dense<0.000000e+00> : vector<8x8xf32>
    %66 = tpu.matmul %65, %53, %cst_40 {dimension_numbers = #tpu.dot_dimension_numbers<[1], [0], [0], [1], [0, 0, 1, 1], [], []>} : vector<8x8xf32>, vector<8x8xf32>, vector<8x8xf32> -> vector<8x8xf32>
    %67 = vector.extract_strided_slice %23 {offsets = [8, 0], sizes = [8, 32], strides = [1, 1]} : vector<32x32xf32> to vector<8x32xf32>
    %cst_41 = arith.constant dense<0.000000e+00> : vector<8x32xf32>
    %68 = tpu.matmul %66, %67, %cst_41 {dimension_numbers = #tpu.dot_dimension_numbers<[1], [0], [0], [1], [0, 0, 1, 1], [], []>} : vector<8x8xf32>, vector<8x32xf32>, vector<8x32xf32> -> vector<8x32xf32>
    %69 = arith.addf %50, %68 : vector<8x32xf32>
    %70 = vector.extract_strided_slice %22 {offsets = [0, 16], sizes = [8, 8], strides = [1, 1]} : vector<8x32xf32> to vector<8x8xf32>
    %71 = vector.extract_strided_slice %15 {offsets = [0, 16], sizes = [8, 8], strides = [1, 1]} : vector<8x32xf32> to vector<8x8xf32>
    %72 = vector.extract_strided_slice %10 {offsets = [0, 16], sizes = [8, 8], strides = [1, 1]} : vector<8x32xf32> to vector<8x8xf32>
    %cst_42 = arith.constant dense<0.000000e+00> : vector<8x8xf32>
    %73 = tpu.matmul %70, %71, %cst_42 {dimension_numbers = #tpu.dot_dimension_numbers<[1], [1], [0], [0], [0, 0, 1, 0], [], []>} : vector<8x8xf32>, vector<8x8xf32>, vector<8x8xf32> -> vector<8x8xf32>
    %74 = arith.addf %73, %30 : vector<8x8xf32>
    %cst_43 = arith.constant dense<0xFF800000> : vector<8xf32>
    %75 = vector.multi_reduction <maximumf>, %74, %cst_43 [1] : vector<8x8xf32> to vector<8xf32>
    %76 = vector.shape_cast %75 : vector<8xf32> to vector<8x1xf32>
    %77 = vector.broadcast %76 : vector<8x1xf32> to vector<8x8xf32>
    %78 = arith.subf %74, %77 : vector<8x8xf32>
    %79 = math.exp %78 : vector<8x8xf32>
    %cst_44 = arith.constant dense<0.000000e+00> : vector<8xf32>
    %80 = vector.multi_reduction <add>, %79, %cst_44 [1] : vector<8x8xf32> to vector<8xf32>
    %81 = vector.shape_cast %80 : vector<8xf32> to vector<8x1xf32>
    %82 = tpu.reciprocal %81 {approx = true} : vector<8x1xf32> -> vector<8x1xf32>
    %83 = vector.broadcast %82 : vector<8x1xf32> to vector<8x8xf32>
    %84 = arith.mulf %79, %83 : vector<8x8xf32>
    %cst_45 = arith.constant dense<0.000000e+00> : vector<8x8xf32>
    %85 = tpu.matmul %84, %72, %cst_45 {dimension_numbers = #tpu.dot_dimension_numbers<[1], [0], [0], [1], [0, 0, 1, 1], [], []>} : vector<8x8xf32>, vector<8x8xf32>, vector<8x8xf32> -> vector<8x8xf32>
    %86 = vector.extract_strided_slice %23 {offsets = [16, 0], sizes = [8, 32], strides = [1, 1]} : vector<32x32xf32> to vector<8x32xf32>
    %cst_46 = arith.constant dense<0.000000e+00> : vector<8x32xf32>
    %87 = tpu.matmul %85, %86, %cst_46 {dimension_numbers = #tpu.dot_dimension_numbers<[1], [0], [0], [1], [0, 0, 1, 1], [], []>} : vector<8x8xf32>, vector<8x32xf32>, vector<8x32xf32> -> vector<8x32xf32>
    %88 = arith.addf %69, %87 : vector<8x32xf32>
    %89 = vector.extract_strided_slice %22 {offsets = [0, 24], sizes = [8, 8], strides = [1, 1]} : vector<8x32xf32> to vector<8x8xf32>
    %90 = vector.extract_strided_slice %15 {offsets = [0, 24], sizes = [8, 8], strides = [1, 1]} : vector<8x32xf32> to vector<8x8xf32>
    %91 = vector.extract_strided_slice %10 {offsets = [0, 24], sizes = [8, 8], strides = [1, 1]} : vector<8x32xf32> to vector<8x8xf32>
    %cst_47 = arith.constant dense<0.000000e+00> : vector<8x8xf32>
    %92 = tpu.matmul %89, %90, %cst_47 {dimension_numbers = #tpu.dot_dimension_numbers<[1], [1], [0], [0], [0, 0, 1, 0], [], []>} : vector<8x8xf32>, vector<8x8xf32>, vector<8x8xf32> -> vector<8x8xf32>
    %93 = arith.addf %92, %30 : vector<8x8xf32>
    %cst_48 = arith.constant dense<0xFF800000> : vector<8xf32>
    %94 = vector.multi_reduction <maximumf>, %93, %cst_48 [1] : vector<8x8xf32> to vector<8xf32>
    %95 = vector.shape_cast %94 : vector<8xf32> to vector<8x1xf32>
    %96 = vector.broadcast %95 : vector<8x1xf32> to vector<8x8xf32>
    %97 = arith.subf %93, %96 : vector<8x8xf32>
    %98 = math.exp %97 : vector<8x8xf32>
    %cst_49 = arith.constant dense<0.000000e+00> : vector<8xf32>
    %99 = vector.multi_reduction <add>, %98, %cst_49 [1] : vector<8x8xf32> to vector<8xf32>
    %100 = vector.shape_cast %99 : vector<8xf32> to vector<8x1xf32>
    %101 = tpu.reciprocal %100 {approx = true} : vector<8x1xf32> -> vector<8x1xf32>
    %102 = vector.broadcast %101 : vector<8x1xf32> to vector<8x8xf32>
    %103 = arith.mulf %98, %102 : vector<8x8xf32>
    %cst_50 = arith.constant dense<0.000000e+00> : vector<8x8xf32>
    %104 = tpu.matmul %103, %91, %cst_50 {dimension_numbers = #tpu.dot_dimension_numbers<[1], [0], [0], [1], [0, 0, 1, 1], [], []>} : vector<8x8xf32>, vector<8x8xf32>, vector<8x8xf32> -> vector<8x8xf32>
    %105 = vector.extract_strided_slice %23 {offsets = [24, 0], sizes = [8, 32], strides = [1, 1]} : vector<32x32xf32> to vector<8x32xf32>
    %cst_51 = arith.constant dense<0.000000e+00> : vector<8x32xf32>
    %106 = tpu.matmul %104, %105, %cst_51 {dimension_numbers = #tpu.dot_dimension_numbers<[1], [0], [0], [1], [0, 0, 1, 1], [], []>} : vector<8x8xf32>, vector<8x32xf32>, vector<8x32xf32> -> vector<8x32xf32>
    %107 = arith.addf %88, %106 : vector<8x32xf32>
    %c0_52 = arith.constant 0 : index
    %c0_53 = arith.constant 0 : index
    %108 = vector.load %arg13[%c0_52, %c0_53] : memref<1x32xf32, #tpu.memory_space<vmem>>, vector<1x32xf32>
    %109 = vector.broadcast %108 : vector<1x32xf32> to vector<8x32xf32>
    %110 = arith.addf %107, %109 : vector<8x32xf32>
    %111 = arith.addf %110, %5 : vector<8x32xf32>
    %c0_54 = arith.constant 0 : index
    %c0_55 = arith.constant 0 : index
    %112 = vector.load %arg14[%c0_54, %c0_55] : memref<1x32xf32, #tpu.memory_space<vmem>>, vector<1x32xf32>
    %c0_56 = arith.constant 0 : index
    %c0_57 = arith.constant 0 : index
    %113 = vector.load %arg15[%c0_56, %c0_57] : memref<1x32xf32, #tpu.memory_space<vmem>>, vector<1x32xf32>
    %cst_58 = arith.constant dense<0.000000e+00> : vector<8xf32>
    %114 = vector.multi_reduction <add>, %111, %cst_58 [1] : vector<8x32xf32> to vector<8xf32>
    %115 = vector.shape_cast %114 : vector<8xf32> to vector<8x1xf32>
    %cst_59 = arith.constant 3.200000e+01 : f32
    %116 = vector.broadcast %cst_59 : f32 to vector<8x1xf32>
    %117 = arith.divf %115, %116 : vector<8x1xf32>
    %118 = vector.broadcast %117 : vector<8x1xf32> to vector<8x32xf32>
    %119 = arith.subf %111, %118 : vector<8x32xf32>
    %120 = arith.mulf %119, %119 : vector<8x32xf32>
    %cst_60 = arith.constant dense<0.000000e+00> : vector<8xf32>
    %121 = vector.multi_reduction <add>, %120, %cst_60 [1] : vector<8x32xf32> to vector<8xf32>
    %122 = vector.shape_cast %121 : vector<8xf32> to vector<8x1xf32>
    %cst_61 = arith.constant 3.200000e+01 : f32
    %123 = vector.broadcast %cst_61 : f32 to vector<8x1xf32>
    %124 = arith.divf %122, %123 : vector<8x1xf32>
    %125 = vector.broadcast %117 : vector<8x1xf32> to vector<8x32xf32>
    %126 = arith.subf %111, %125 : vector<8x32xf32>
    %cst_62 = arith.constant 9.99999974E-6 : f32
    %127 = vector.broadcast %cst_62 : f32 to vector<8x1xf32>
    %128 = arith.addf %124, %127 : vector<8x1xf32>
    %129 = math.rsqrt %128 : vector<8x1xf32>
    %130 = vector.broadcast %129 : vector<8x1xf32> to vector<8x32xf32>
    %131 = arith.mulf %126, %130 : vector<8x32xf32>
    %132 = vector.broadcast %112 : vector<1x32xf32> to vector<8x32xf32>
    %133 = arith.mulf %131, %132 : vector<8x32xf32>
    %134 = vector.broadcast %113 : vector<1x32xf32> to vector<8x32xf32>
    %135 = arith.addf %133, %134 : vector<8x32xf32>
    %c0_63 = arith.constant 0 : index
    %c0_64 = arith.constant 0 : index
    %136 = vector.load %arg18[%c0_63, %c0_64] : memref<32x128xf32, #tpu.memory_space<vmem>>, vector<32x128xf32>
    %cst_65 = arith.constant dense<0.000000e+00> : vector<8x128xf32>
    %137 = tpu.matmul %135, %136, %cst_65 {dimension_numbers = #tpu.dot_dimension_numbers<[1], [0], [0], [1], [0, 0, 1, 1], [], []>} : vector<8x32xf32>, vector<32x128xf32>, vector<8x128xf32> -> vector<8x128xf32>
    %c0_66 = arith.constant 0 : index
    %c0_67 = arith.constant 0 : index
    %138 = vector.load %arg19[%c0_66, %c0_67] : memref<1x128xf32, #tpu.memory_space<vmem>>, vector<1x128xf32>
    %139 = vector.broadcast %138 : vector<1x128xf32> to vector<8x128xf32>
    %140 = arith.addf %137, %139 : vector<8x128xf32>
    %cst_68 = arith.constant 0.000000e+00 : f32
    %141 = vector.broadcast %cst_68 : f32 to vector<8x128xf32>
    %142 = arith.maximumf %140, %141 : vector<8x128xf32>
    %c0_69 = arith.constant 0 : index
    %c0_70 = arith.constant 0 : index
    %143 = vector.load %arg20[%c0_69, %c0_70] : memref<128x32xf32, #tpu.memory_space<vmem>>, vector<128x32xf32>
    %cst_71 = arith.constant dense<0.000000e+00> : vector<8x32xf32>
    %144 = tpu.matmul %142, %143, %cst_71 {dimension_numbers = #tpu.dot_dimension_numbers<[1], [0], [0], [1], [0, 0, 1, 1], [], []>} : vector<8x128xf32>, vector<128x32xf32>, vector<8x32xf32> -> vector<8x32xf32>
    %c0_72 = arith.constant 0 : index
    %c0_73 = arith.constant 0 : index
    %145 = vector.load %arg21[%c0_72, %c0_73] : memref<1x32xf32, #tpu.memory_space<vmem>>, vector<1x32xf32>
    %146 = vector.broadcast %145 : vector<1x32xf32> to vector<8x32xf32>
    %147 = arith.addf %144, %146 : vector<8x32xf32>
    %148 = arith.addf %147, %135 : vector<8x32xf32>
    %c0_74 = arith.constant 0 : index
    %c0_75 = arith.constant 0 : index
    %149 = vector.load %arg16[%c0_74, %c0_75] : memref<1x32xf32, #tpu.memory_space<vmem>>, vector<1x32xf32>
    %c0_76 = arith.constant 0 : index
    %c0_77 = arith.constant 0 : index
    %150 = vector.load %arg17[%c0_76, %c0_77] : memref<1x32xf32, #tpu.memory_space<vmem>>, vector<1x32xf32>
    %cst_78 = arith.constant dense<0.000000e+00> : vector<8xf32>
    %151 = vector.multi_reduction <add>, %148, %cst_78 [1] : vector<8x32xf32> to vector<8xf32>
    %152 = vector.shape_cast %151 : vector<8xf32> to vector<8x1xf32>
    %cst_79 = arith.constant 3.200000e+01 : f32
    %153 = vector.broadcast %cst_79 : f32 to vector<8x1xf32>
    %154 = arith.divf %152, %153 : vector<8x1xf32>
    %155 = vector.broadcast %154 : vector<8x1xf32> to vector<8x32xf32>
    %156 = arith.subf %148, %155 : vector<8x32xf32>
    %157 = arith.mulf %156, %156 : vector<8x32xf32>
    %cst_80 = arith.constant dense<0.000000e+00> : vector<8xf32>
    %158 = vector.multi_reduction <add>, %157, %cst_80 [1] : vector<8x32xf32> to vector<8xf32>
    %159 = vector.shape_cast %158 : vector<8xf32> to vector<8x1xf32>
    %cst_81 = arith.constant 3.200000e+01 : f32
    %160 = vector.broadcast %cst_81 : f32 to vector<8x1xf32>
    %161 = arith.divf %159, %160 : vector<8x1xf32>
    %162 = vector.broadcast %154 : vector<8x1xf32> to vector<8x32xf32>
    %163 = arith.subf %148, %162 : vector<8x32xf32>
    %cst_82 = arith.constant 9.99999974E-6 : f32
    %164 = vector.broadcast %cst_82 : f32 to vector<8x1xf32>
    %165 = arith.addf %161, %164 : vector<8x1xf32>
    %166 = math.rsqrt %165 : vector<8x1xf32>
    %167 = vector.broadcast %166 : vector<8x1xf32> to vector<8x32xf32>
    %168 = arith.mulf %163, %167 : vector<8x32xf32>
    %169 = vector.broadcast %149 : vector<1x32xf32> to vector<8x32xf32>
    %170 = arith.mulf %168, %169 : vector<8x32xf32>
    %171 = vector.broadcast %150 : vector<1x32xf32> to vector<8x32xf32>
    %172 = arith.addf %170, %171 : vector<8x32xf32>
    %c0_83 = arith.constant 0 : index
    %c0_84 = arith.constant 0 : index
    %c0_85 = arith.constant 0 : index
    %173 = vector.load %arg22[%c0_83, %c0_84, %c0_85] : memref<1x8x32xf32, #tpu.memory_space<vmem>>, vector<1x8x32xf32>
    %174 = vector.shape_cast %173 : vector<1x8x32xf32> to vector<8x32xf32>
    %175 = vector.shape_cast %172 : vector<8x32xf32> to vector<1x8x32xf32>
    tpu.vector_store %arg22[%c0_83, %c0_84, %c0_85], %175 {strides = array<i32>} : memref<1x8x32xf32, #tpu.memory_space<vmem>>, vector<1x8x32xf32>,
    return
  }
  func.func @transform_0(%arg0: i32, %arg1: i32) -> (i32, i32, i32) {
    %c0_i32 = arith.constant 0 : i32
    %c0_i32_0 = arith.constant 0 : i32
    %c0_i32_1 = arith.constant 0 : i32
    return %arg0, %c0_i32, %c0_i32_0 : i32, i32, i32
  }
  func.func @transform_1(%arg0: i32, %arg1: i32) -> (i32, i32, i32) {
    %c0_i32 = arith.constant 0 : i32
    %c0_i32_0 = arith.constant 0 : i32
    %c0_i32_1 = arith.constant 0 : i32
    return %arg0, %c0_i32, %c0_i32_0 : i32, i32, i32
  }
  func.func @transform_2(%arg0: i32, %arg1: i32) -> (i32, i32, i32) {
    %c0_i32 = arith.constant 0 : i32
    %c0_i32_0 = arith.constant 0 : i32
    return %arg0, %arg1, %c0_i32 : i32, i32, i32
  }
  func.func @transform_3(%arg0: i32, %arg1: i32) -> (i32, i32, i32) {
    %c0_i32 = arith.constant 0 : i32
    %c0_i32_0 = arith.constant 0 : i32
    return %arg0, %arg1, %c0_i32 : i32, i32, i32
  }
  func.func @transform_4(%arg0: i32, %arg1: i32) -> (i32, i32) {
    %c0_i32 = arith.constant 0 : i32
    %c0_i32_0 = arith.constant 0 : i32
    %c0_i32_1 = arith.constant 0 : i32
    return %c0_i32, %c0_i32_0 : i32, i32
  }
  func.func @transform_5(%arg0: i32, %arg1: i32) -> (i32, i32) {
    %c0_i32 = arith.constant 0 : i32
    %c0_i32_0 = arith.constant 0 : i32
    %c0_i32_1 = arith.constant 0 : i32
    return %c0_i32, %c0_i32_0 : i32, i32
  }
  func.func @transform_6(%arg0: i32, %arg1: i32) -> (i32, i32) {
    %c0_i32 = arith.constant 0 : i32
    %c0_i32_0 = arith.constant 0 : i32
    %c0_i32_1 = arith.constant 0 : i32
    return %c0_i32, %c0_i32_0 : i32, i32
  }
  func.func @transform_7(%arg0: i32, %arg1: i32) -> (i32, i32) {
    %c0_i32 = arith.constant 0 : i32
    %c0_i32_0 = arith.constant 0 : i32
    %c0_i32_1 = arith.constant 0 : i32
    return %c0_i32, %c0_i32_0 : i32, i32
  }
  func.func @transform_8(%arg0: i32, %arg1: i32) -> (i32, i32) {
    %c0_i32 = arith.constant 0 : i32
    %c0_i32_0 = arith.constant 0 : i32
    %c0_i32_1 = arith.constant 0 : i32
    return %c0_i32, %c0_i32_0 : i32, i32
  }
  func.func @transform_9(%arg0: i32, %arg1: i32) -> (i32, i32) {
    %c0_i32 = arith.constant 0 : i32
    %c0_i32_0 = arith.constant 0 : i32
    %c0_i32_1 = arith.constant 0 : i32
    return %c0_i32, %c0_i32_0 : i32, i32
  }
  func.func @transform_10(%arg0: i32, %arg1: i32) -> (i32, i32) {
    %c0_i32 = arith.constant 0 : i32
    %c0_i32_0 = arith.constant 0 : i32
    %c0_i32_1 = arith.constant 0 : i32
    return %c0_i32, %c0_i32_0 : i32, i32
  }
  func.func @transform_11(%arg0: i32, %arg1: i32) -> (i32, i32) {
    %c0_i32 = arith.constant 0 : i32
    %c0_i32_0 = arith.constant 0 : i32
    %c0_i32_1 = arith.constant 0 : i32
    return %c0_i32, %c0_i32_0 : i32, i32
  }
  func.func @transform_12(%arg0: i32, %arg1: i32) -> (i32, i32) {
    %c0_i32 = arith.constant 0 : i32
    %c0_i32_0 = arith.constant 0 : i32
    %c0_i32_1 = arith.constant 0 : i32
    return %c0_i32, %c0_i32_0 : i32, i32
  }
  func.func @transform_13(%arg0: i32, %arg1: i32) -> (i32, i32) {
    %c0_i32 = arith.constant 0 : i32
    %c0_i32_0 = arith.constant 0 : i32
    %c0_i32_1 = arith.constant 0 : i32
    return %c0_i32, %c0_i32_0 : i32, i32
  }
  func.func @transform_14(%arg0: i32, %arg1: i32) -> (i32, i32) {
    %c0_i32 = arith.constant 0 : i32
    %c0_i32_0 = arith.constant 0 : i32
    %c0_i32_1 = arith.constant 0 : i32
    return %c0_i32, %c0_i32_0 : i32, i32
  }
  func.func @transform_15(%arg0: i32, %arg1: i32) -> (i32, i32) {
    %c0_i32 = arith.constant 0 : i32
    %c0_i32_0 = arith.constant 0 : i32
    %c0_i32_1 = arith.constant 0 : i32
    return %c0_i32, %c0_i32_0 : i32, i32
  }
  func.func @transform_16(%arg0: i32, %arg1: i32) -> (i32, i32) {
    %c0_i32 = arith.constant 0 : i32
    %c0_i32_0 = arith.constant 0 : i32
    %c0_i32_1 = arith.constant 0 : i32
    return %c0_i32, %c0_i32_0 : i32, i32
  }
  func.func @transform_17(%arg0: i32, %arg1: i32) -> (i32, i32) {
    %c0_i32 = arith.constant 0 : i32
    %c0_i32_0 = arith.constant 0 : i32
    %c0_i32_1 = arith.constant 0 : i32
    return %c0_i32, %c0_i32_0 : i32, i32
  }
  func.func @transform_18(%arg0: i32, %arg1: i32) -> (i32, i32) {
    %c0_i32 = arith.constant 0 : i32
    %c0_i32_0 = arith.constant 0 : i32
    %c0_i32_1 = arith.constant 0 : i32
    return %c0_i32, %c0_i32_0 : i32, i32
  }
  func.func @transform_19(%arg0: i32, %arg1: i32) -> (i32, i32) {
    %c0_i32 = arith.constant 0 : i32
    %c0_i32_0 = arith.constant 0 : i32
    %c0_i32_1 = arith.constant 0 : i32
    return %c0_i32, %c0_i32_0 : i32, i32
  }
  func.func @transform_20(%arg0: i32, %arg1: i32) -> (i32, i32, i32) {
    %c0_i32 = arith.constant 0 : i32
    %c0_i32_0 = arith.constant 0 : i32
    return %arg0, %arg1, %c0_i32 : i32, i32, i32
  }
}

module attributes {stable_mosaic.version = 11 : i64} {
  func.func @_transformer_block_kernel(%arg0: i32, %arg1: i32, %arg2: memref<1x8x32xf32, #tpu.memory_space<vmem>>, %arg3: memref<1x8x32xf32, #tpu.memory_space<vmem>>, %arg4: memref<1x8x32xf32, #tpu.memory_space<vmem>>, %arg5: memref<1x8x8xf32, #tpu.memory_space<vmem>>, %arg6: memref<32x32xf32, #tpu.memory_space<vmem>>, %arg7: memref<1x32xf32, #tpu.memory_space<vmem>>, %arg8: memref<32x32xf32, #tpu.memory_space<vmem>>, %arg9: memref<1x32xf32, #tpu.memory_space<vmem>>, %arg10: memref<32x32xf32, #tpu.memory_space<vmem>>, %arg11: memref<1x32xf32, #tpu.memory_space<vmem>>, %arg12: memref<32x32xf32, #tpu.memory_space<vmem>>, %arg13: memref<1x32xf32, #tpu.memory_space<vmem>>, %arg14: memref<1x32xf32, #tpu.memory_space<vmem>>, %arg15: memref<1x32xf32, #tpu.memory_space<vmem>>, %arg16: memref<1x32xf32, #tpu.memory_space<vmem>>, %arg17: memref<1x32xf32, #tpu.memory_space<vmem>>, %arg18: memref<32x128xf32, #tpu.memory_space<vmem>>, %arg19: memref<1x128xf32, #tpu.memory_space<vmem>>, %arg20: memref<128x32xf32, #tpu.memory_space<vmem>>, %arg21: memref<1x32xf32, #tpu.memory_space<vmem>>, %arg22: memref<1x8x32xf32, #tpu.memory_space<vmem>>) attributes {dimension_semantics = [#tpu.dimension_semantics<parallel>, #tpu.dimension_semantics<parallel>], iteration_bounds = array<i64: 2, 1>, scalar_prefetch = 0 : i64, scratch_operands = 0 : i64, tpu.core_type = #tpu.core_type<tc>, window_params = [{transform_indices = @transform_0, window_bounds = array<i64: 1, 8, 32>}, {transform_indices = @transform_1, window_bounds = array<i64: 1, 8, 32>}, {transform_indices = @transform_2, window_bounds = array<i64: 1, 8, 32>}, {transform_indices = @transform_3, window_bounds = array<i64: 1, 8, 8>}, {pipeline_mode = #tpu.pipeline_mode<synchronous>, transform_indices = @transform_4, window_bounds = array<i64: 32, 32>}, {pipeline_mode = #tpu.pipeline_mode<synchronous>, transform_indices = @transform_5, window_bounds = array<i64: 1, 32>}, {pipeline_mode = #tpu.pipeline_mode<synchronous>, transform_indices = @transform_6, window_bounds = array<i64: 32, 32>}, {pipeline_mode = #tpu.pipeline_mode<synchronous>, transform_indices = @transform_7, window_bounds = array<i64: 1, 32>}, {pipeline_mode = #tpu.pipeline_mode<synchronous>, transform_indices = @transform_8, window_bounds = array<i64: 32, 32>}, {pipeline_mode = #tpu.pipeline_mode<synchronous>, transform_indices = @transform_9, window_bounds = array<i64: 1, 32>}, {pipeline_mode = #tpu.pipeline_mode<synchronous>, transform_indices = @transform_10, window_bounds = array<i64: 32, 32>}, {pipeline_mode = #tpu.pipeline_mode<synchronous>, transform_indices = @transform_11, window_bounds = array<i64: 1, 32>}, {pipeline_mode = #tpu.pipeline_mode<synchronous>, transform_indices = @transform_12, window_bounds = array<i64: 1, 32>}, {pipeline_mode = #tpu.pipeline_mode<synchronous>, transform_indices = @transform_13, window_bounds = array<i64: 1, 32>}, {pipeline_mode = #tpu.pipeline_mode<synchronous>, transform_indices = @transform_14, window_bounds = array<i64: 1, 32>}, {pipeline_mode = #tpu.pipeline_mode<synchronous>, transform_indices = @transform_15, window_bounds = array<i64: 1, 32>}, {pipeline_mode = #tpu.pipeline_mode<synchronous>, transform_indices = @transform_16, window_bounds = array<i64: 32, 128>}, {pipeline_mode = #tpu.pipeline_mode<synchronous>, transform_indices = @transform_17, window_bounds = array<i64: 1, 128>}, {pipeline_mode = #tpu.pipeline_mode<synchronous>, transform_indices = @transform_18, window_bounds = array<i64: 128, 32>}, {pipeline_mode = #tpu.pipeline_mode<synchronous>, transform_indices = @transform_19, window_bounds = array<i64: 1, 32>}, {transform_indices = @transform_20, window_bounds = array<i64: 1, 8, 32>}]} {
    %c0 = arith.constant 0 : index
    %c0_0 = arith.constant 0 : index
    %c0_1 = arith.constant 0 : index
    %0 = vector.load %arg2[%c0, %c0_0, %c0_1] : memref<1x8x32xf32, #tpu.memory_space<vmem>>, vector<1x8x32xf32>
    %1 = vector.shape_cast %0 : vector<1x8x32xf32> to vector<8x32xf32>
    %c0_2 = arith.constant 0 : index
    %c0_3 = arith.constant 0 : index
    %c0_4 = arith.constant 0 : index
    %2 = vector.load %arg3[%c0_2, %c0_3, %c0_4] : memref<1x8x32xf32, #tpu.memory_space<vmem>>, vector<1x8x32xf32>
    %3 = vector.shape_cast %2 : vector<1x8x32xf32> to vector<8x32xf32>
    %c0_5 = arith.constant 0 : index
    %c0_6 = arith.constant 0 : index
    %c0_7 = arith.constant 0 : index
    %4 = vector.load %arg4[%c0_5, %c0_6, %c0_7] : memref<1x8x32xf32, #tpu.memory_space<vmem>>, vector<1x8x32xf32>
    %5 = vector.shape_cast %4 : vector<1x8x32xf32> to vector<8x32xf32>
    %c0_8 = arith.constant 0 : index
    %c0_9 = arith.constant 0 : index
    %6 = vector.load %arg6[%c0_8, %c0_9] : memref<32x32xf32, #tpu.memory_space<vmem>>, vector<32x32xf32>
    %cst = arith.constant dense<0.000000e+00> : vector<8x32xf32>
    %7 = tpu.matmul %1, %6, %cst {dimension_numbers = #tpu.dot_dimension_numbers<[1], [0], [0], [1], [0, 0, 1, 1], [], []>} : vector<8x32xf32>, vector<32x32xf32>, vector<8x32xf32> -> vector<8x32xf32>
    %c0_10 = arith.constant 0 : index
    %c0_11 = arith.constant 0 : index
    %8 = vector.load %arg7[%c0_10, %c0_11] : memref<1x32xf32, #tpu.memory_space<vmem>>, vector<1x32xf32>
    %9 = vector.broadcast %8 : vector<1x32xf32> to vector<8x32xf32>
    %10 = arith.addf %7, %9 : vector<8x32xf32>
    %c0_12 = arith.constant 0 : index
    %c0_13 = arith.constant 0 : index
    %11 = vector.load %arg8[%c0_12, %c0_13] : memref<32x32xf32, #tpu.memory_space<vmem>>, vector<32x32xf32>
    %cst_14 = arith.constant dense<0.000000e+00> : vector<8x32xf32>
    %12 = tpu.matmul %3, %11, %cst_14 {dimension_numbers = #tpu.dot_dimension_numbers<[1], [0], [0], [1], [0, 0, 1, 1], [], []>} : vector<8x32xf32>, vector<32x32xf32>, vector<8x32xf32> -> vector<8x32xf32>
    %c0_15 = arith.constant 0 : index
    %c0_16 = arith.constant 0 : index
    %13 = vector.load %arg9[%c0_15, %c0_16] : memref<1x32xf32, #tpu.memory_space<vmem>>, vector<1x32xf32>
    %14 = vector.broadcast %13 : vector<1x32xf32> to vector<8x32xf32>
    %15 = arith.addf %12, %14 : vector<8x32xf32>
    %c0_17 = arith.constant 0 : index
    %c0_18 = arith.constant 0 : index
    %16 = vector.load %arg10[%c0_17, %c0_18] : memref<32x32xf32, #tpu.memory_space<vmem>>, vector<32x32xf32>
    %cst_19 = arith.constant dense<0.000000e+00> : vector<8x32xf32>
    %17 = tpu.matmul %5, %16, %cst_19 {dimension_numbers = #tpu.dot_dimension_numbers<[1], [0], [0], [1], [0, 0, 1, 1], [], []>} : vector<8x32xf32>, vector<32x32xf32>, vector<8x32xf32> -> vector<8x32xf32>
    %c0_20 = arith.constant 0 : index
    %c0_21 = arith.constant 0 : index
    %18 = vector.load %arg11[%c0_20, %c0_21] : memref<1x32xf32, #tpu.memory_space<vmem>>, vector<1x32xf32>
    %19 = vector.broadcast %18 : vector<1x32xf32> to vector<8x32xf32>
    %20 = arith.addf %17, %19 : vector<8x32xf32>
    %cst_22 = arith.constant 0.176776692 : f32
    %21 = vector.broadcast %cst_22 : f32 to vector<8x32xf32>
    %22 = arith.mulf %20, %21 : vector<8x32xf32>
    %c0_23 = arith.constant 0 : index
    %c0_24 = arith.constant 0 : index
    %23 = vector.load %arg12[%c0_23, %c0_24] : memref<32x32xf32, #tpu.memory_space<vmem>>, vector<32x32xf32>
    %c0_25 = arith.constant 0 : index
    %c0_26 = arith.constant 0 : index
    %c0_27 = arith.constant 0 : index
    %24 = vector.load %arg5[%c0_25, %c0_26, %c0_27] : memref<1x8x8xf32, #tpu.memory_space<vmem>>, vector<1x8x8xf32>
    %25 = vector.shape_cast %24 : vector<1x8x8xf32> to vector<8x8xf32>
    %cst_28 = arith.constant 0.000000e+00 : f32
    %26 = vector.broadcast %cst_28 : f32 to vector<8x8xf32>
    %27 = arith.cmpf oeq, %25, %26 : vector<8x8xf32>
    %cst_29 = arith.constant -1.000000e+20 : f32
    %cst_30 = arith.constant 0.000000e+00 : f32
    %28 = vector.broadcast %cst_29 : f32 to vector<8x8xf32>
    %29 = vector.broadcast %cst_30 : f32 to vector<8x8xf32>
    %30 = arith.select %27, %28, %29 : vector<8x8xi1>, vector<8x8xf32>
    %cst_31 = arith.constant 0.000000e+00 : f32
    %31 = vector.broadcast %cst_31 : f32 to vector<8x32xf32>
    %32 = vector.extract_strided_slice %22 {offsets = [0, 0], sizes = [8, 8], strides = [1, 1]} : vector<8x32xf32> to vector<8x8xf32>
    %33 = vector.extract_strided_slice %15 {offsets = [0, 0], sizes = [8, 8], strides = [1, 1]} : vector<8x32xf32> to vector<8x8xf32>
    %34 = vector.extract_strided_slice %10 {offsets = [0, 0], sizes = [8, 8], strides = [1, 1]} : vector<8x32xf32> to vector<8x8xf32>
    %cst_32 = arith.constant dense<0.000000e+00> : vector<8x8xf32>
    %35 = tpu.matmul %32, %33, %cst_32 {dimension_numbers = #tpu.dot_dimension_numbers<[1], [1], [0], [0], [0, 0, 1, 0], [], []>} : vector<8x8xf32>, vector<8x8xf32>, vector<8x8xf32> -> vector<8x8xf32>
    %36 = arith.addf %35, %30 : vector<8x8xf32>
    %cst_33 = arith.constant dense<0xFF800000> : vector<8xf32>
    %37 = vector.multi_reduction <maximumf>, %36, %cst_33 [1] : vector<8x8xf32> to vector<8xf32>
    %38 = vector.shape_cast %37 : vector<8xf32> to vector<8x1xf32>
    %39 = vector.broadcast %38 : vector<8x1xf32> to vector<8x8xf32>
    %40 = arith.subf %36, %39 : vector<8x8xf32>
    %41 = math.exp %40 : vector<8x8xf32>
    %cst_34 = arith.constant dense<0.000000e+00> : vector<8xf32>
    %42 = vector.multi_reduction <add>, %41, %cst_34 [1] : vector<8x8xf32> to vector<8xf32>
    %43 = vector.shape_cast %42 : vector<8xf32> to vector<8x1xf32>
    %44 = tpu.reciprocal %43 {approx = true} : vector<8x1xf32> -> vector<8x1xf32>
    %45 = vector.broadcast %44 : vector<8x1xf32> to vector<8x8xf32>
    %46 = arith.mulf %41, %45 : vector<8x8xf32>
    %cst_35 = arith.constant dense<0.000000e+00> : vector<8x8xf32>
    %47 = tpu.matmul %46, %34, %cst_35 {dimension_numbers = #tpu.dot_dimension_numbers<[1], [0], [0], [1], [0, 0, 1, 1], [], []>} : vector<8x8xf32>, vector<8x8xf32>, vector<8x8xf32> -> vector<8x8xf32>
    %48 = vector.extract_strided_slice %23 {offsets = [0, 0], sizes = [8, 32], strides = [1, 1]} : vector<32x32xf32> to vector<8x32xf32>
    %cst_36 = arith.constant dense<0.000000e+00> : vector<8x32xf32>
    %49 = tpu.matmul %47, %48, %cst_36 {dimension_numbers = #tpu.dot_dimension_numbers<[1], [0], [0], [1], [0, 0, 1, 1], [], []>} : vector<8x8xf32>, vector<8x32xf32>, vector<8x32xf32> -> vector<8x32xf32>
    %50 = arith.addf %31, %49 : vector<8x32xf32>
    %51 = vector.extract_strided_slice %22 {offsets = [0, 8], sizes = [8, 8], strides = [1, 1]} : vector<8x32xf32> to vector<8x8xf32>
    %52 = vector.extract_strided_slice %15 {offsets = [0, 8], sizes = [8, 8], strides = [1, 1]} : vector<8x32xf32> to vector<8x8xf32>
    %53 = vector.extract_strided_slice %10 {offsets = [0, 8], sizes = [8, 8], strides = [1, 1]} : vector<8x32xf32> to vector<8x8xf32>
    %cst_37 = arith.constant dense<0.000000e+00> : vector<8x8xf32>
    %54 = tpu.matmul %51, %52, %cst_37 {dimension_numbers = #tpu.dot_dimension_numbers<[1], [1], [0], [0], [0, 0, 1, 0], [], []>} : vector<8x8xf32>, vector<8x8xf32>, vector<8x8xf32> -> vector<8x8xf32>
    %55 = arith.addf %54, %30 : vector<8x8xf32>
    %cst_38 = arith.constant dense<0xFF800000> : vector<8xf32>
    %56 = vector.multi_reduction <maximumf>, %55, %cst_38 [1] : vector<8x8xf32> to vector<8xf32>
    %57 = vector.shape_cast %56 : vector<8xf32> to vector<8x1xf32>
    %58 = vector.broadcast %57 : vector<8x1xf32> to vector<8x8xf32>
    %59 = arith.subf %55, %58 : vector<8x8xf32>
    %60 = math.exp %59 : vector<8x8xf32>
    %cst_39 = arith.constant dense<0.000000e+00> : vector<8xf32>
    %61 = vector.multi_reduction <add>, %60, %cst_39 [1] : vector<8x8xf32> to vector<8xf32>
    %62 = vector.shape_cast %61 : vector<8xf32> to vector<8x1xf32>
    %63 = tpu.reciprocal %62 {approx = true} : vector<8x1xf32> -> vector<8x1xf32>
    %64 = vector.broadcast %63 : vector<8x1xf32> to vector<8x8xf32>
    %65 = arith.mulf %60, %64 : vector<8x8xf32>
    %cst_40 = arith.constant dense<0.000000e+00> : vector<8x8xf32>
    %66 = tpu.matmul %65, %53, %cst_40 {dimension_numbers = #tpu.dot_dimension_numbers<[1], [0], [0], [1], [0, 0, 1, 1], [], []>} : vector<8x8xf32>, vector<8x8xf32>, vector<8x8xf32> -> vector<8x8xf32>
    %67 = vector.extract_strided_slice %23 {offsets = [8, 0], sizes = [8, 32], strides = [1, 1]} : vector<32x32xf32> to vector<8x32xf32>
    %cst_41 = arith.constant dense<0.000000e+00> : vector<8x32xf32>
    %68 = tpu.matmul %66, %67, %cst_41 {dimension_numbers = #tpu.dot_dimension_numbers<[1], [0], [0], [1], [0, 0, 1, 1], [], []>} : vector<8x8xf32>, vector<8x32xf32>, vector<8x32xf32> -> vector<8x32xf32>
    %69 = arith.addf %50, %68 : vector<8x32xf32>
    %70 = vector.extract_strided_slice %22 {offsets = [0, 16], sizes = [8, 8], strides = [1, 1]} : vector<8x32xf32> to vector<8x8xf32>
    %71 = vector.extract_strided_slice %15 {offsets = [0, 16], sizes = [8, 8], strides = [1, 1]} : vector<8x32xf32> to vector<8x8xf32>
    %72 = vector.extract_strided_slice %10 {offsets = [0, 16], sizes = [8, 8], strides = [1, 1]} : vector<8x32xf32> to vector<8x8xf32>
    %cst_42 = arith.constant dense<0.000000e+00> : vector<8x8xf32>
    %73 = tpu.matmul %70, %71, %cst_42 {dimension_numbers = #tpu.dot_dimension_numbers<[1], [1], [0], [0], [0, 0, 1, 0], [], []>} : vector<8x8xf32>, vector<8x8xf32>, vector<8x8xf32> -> vector<8x8xf32>
    %74 = arith.addf %73, %30 : vector<8x8xf32>
    %cst_43 = arith.constant dense<0xFF800000> : vector<8xf32>
    %75 = vector.multi_reduction <maximumf>, %74, %cst_43 [1] : vector<8x8xf32> to vector<8xf32>
    %76 = vector.shape_cast %75 : vector<8xf32> to vector<8x1xf32>
    %77 = vector.broadcast %76 : vector<8x1xf32> to vector<8x8xf32>
    %78 = arith.subf %74, %77 : vector<8x8xf32>
    %79 = math.exp %78 : vector<8x8xf32>
    %cst_44 = arith.constant dense<0.000000e+00> : vector<8xf32>
    %80 = vector.multi_reduction <add>, %79, %cst_44 [1] : vector<8x8xf32> to vector<8xf32>
    %81 = vector.shape_cast %80 : vector<8xf32> to vector<8x1xf32>
    %82 = tpu.reciprocal %81 {approx = true} : vector<8x1xf32> -> vector<8x1xf32>
    %83 = vector.broadcast %82 : vector<8x1xf32> to vector<8x8xf32>
    %84 = arith.mulf %79, %83 : vector<8x8xf32>
    %cst_45 = arith.constant dense<0.000000e+00> : vector<8x8xf32>
    %85 = tpu.matmul %84, %72, %cst_45 {dimension_numbers = #tpu.dot_dimension_numbers<[1], [0], [0], [1], [0, 0, 1, 1], [], []>} : vector<8x8xf32>, vector<8x8xf32>, vector<8x8xf32> -> vector<8x8xf32>
    %86 = vector.extract_strided_slice %23 {offsets = [16, 0], sizes = [8, 32], strides = [1, 1]} : vector<32x32xf32> to vector<8x32xf32>
    %cst_46 = arith.constant dense<0.000000e+00> : vector<8x32xf32>
    %87 = tpu.matmul %85, %86, %cst_46 {dimension_numbers = #tpu.dot_dimension_numbers<[1], [0], [0], [1], [0, 0, 1, 1], [], []>} : vector<8x8xf32>, vector<8x32xf32>, vector<8x32xf32> -> vector<8x32xf32>
    %88 = arith.addf %69, %87 : vector<8x32xf32>
    %89 = vector.extract_strided_slice %22 {offsets = [0, 24], sizes = [8, 8], strides = [1, 1]} : vector<8x32xf32> to vector<8x8xf32>
    %90 = vector.extract_strided_slice %15 {offsets = [0, 24], sizes = [8, 8], strides = [1, 1]} : vector<8x32xf32> to vector<8x8xf32>
    %91 = vector.extract_strided_slice %10 {offsets = [0, 24], sizes = [8, 8], strides = [1, 1]} : vector<8x32xf32> to vector<8x8xf32>
    %cst_47 = arith.constant dense<0.000000e+00> : vector<8x8xf32>
    %92 = tpu.matmul %89, %90, %cst_47 {dimension_numbers = #tpu.dot_dimension_numbers<[1], [1], [0], [0], [0, 0, 1, 0], [], []>} : vector<8x8xf32>, vector<8x8xf32>, vector<8x8xf32> -> vector<8x8xf32>
    %93 = arith.addf %92, %30 : vector<8x8xf32>
    %cst_48 = arith.constant dense<0xFF800000> : vector<8xf32>
    %94 = vector.multi_reduction <maximumf>, %93, %cst_48 [1] : vector<8x8xf32> to vector<8xf32>
    %95 = vector.shape_cast %94 : vector<8xf32> to vector<8x1xf32>
    %96 = vector.broadcast %95 : vector<8x1xf32> to vector<8x8xf32>
    %97 = arith.subf %93, %96 : vector<8x8xf32>
    %98 = math.exp %97 : vector<8x8xf32>
    %cst_49 = arith.constant dense<0.000000e+00> : vector<8xf32>
    %99 = vector.multi_reduction <add>, %98, %cst_49 [1] : vector<8x8xf32> to vector<8xf32>
    %100 = vector.shape_cast %99 : vector<8xf32> to vector<8x1xf32>
    %101 = tpu.reciprocal %100 {approx = true} : vector<8x1xf32> -> vector<8x1xf32>
    %102 = vector.broadcast %101 : vector<8x1xf32> to vector<8x8xf32>
    %103 = arith.mulf %98, %102 : vector<8x8xf32>
    %cst_50 = arith.constant dense<0.000000e+00> : vector<8x8xf32>
    %104 = tpu.matmul %103, %91, %cst_50 {dimension_numbers = #tpu.dot_dimension_numbers<[1], [0], [0], [1], [0, 0, 1, 1], [], []>} : vector<8x8xf32>, vector<8x8xf32>, vector<8x8xf32> -> vector<8x8xf32>
    %105 = vector.extract_strided_slice %23 {offsets = [24, 0], sizes = [8, 32], strides = [1, 1]} : vector<32x32xf32> to vector<8x32xf32>
    %cst_51 = arith.constant dense<0.000000e+00> : vector<8x32xf32>
    %106 = tpu.matmul %104, %105, %cst_51 {dimension_numbers = #tpu.dot_dimension_numbers<[1], [0], [0], [1], [0, 0, 1, 1], [], []>} : vector<8x8xf32>, vector<8x32xf32>, vector<8x32xf32> -> vector<8x32xf32>
    %107 = arith.addf %88, %106 : vector<8x32xf32>
    %c0_52 = arith.constant 0 : index
    %c0_53 = arith.constant 0 : index
    %108 = vector.load %arg13[%c0_52, %c0_53] : memref<1x32xf32, #tpu.memory_space<vmem>>, vector<1x32xf32>
    %109 = vector.broadcast %108 : vector<1x32xf32> to vector<8x32xf32>
    %110 = arith.addf %107, %109 : vector<8x32xf32>
    %111 = arith.addf %110, %5 : vector<8x32xf32>
    %c0_54 = arith.constant 0 : index
    %c0_55 = arith.constant 0 : index
    %112 = vector.load %arg14[%c0_54, %c0_55] : memref<1x32xf32, #tpu.memory_space<vmem>>, vector<1x32xf32>
    %c0_56 = arith.constant 0 : index
    %c0_57 = arith.constant 0 : index
    %113 = vector.load %arg15[%c0_56, %c0_57] : memref<1x32xf32, #tpu.memory_space<vmem>>, vector<1x32xf32>
    %cst_58 = arith.constant dense<0.000000e+00> : vector<8xf32>
    %114 = vector.multi_reduction <add>, %111, %cst_58 [1] : vector<8x32xf32> to vector<8xf32>
    %115 = vector.shape_cast %114 : vector<8xf32> to vector<8x1xf32>
    %cst_59 = arith.constant 3.200000e+01 : f32
    %116 = vector.broadcast %cst_59 : f32 to vector<8x1xf32>
    %117 = arith.divf %115, %116 : vector<8x1xf32>
    %118 = vector.broadcast %117 : vector<8x1xf32> to vector<8x32xf32>
    %119 = arith.subf %111, %118 : vector<8x32xf32>
    %120 = arith.mulf %119, %119 : vector<8x32xf32>
    %cst_60 = arith.constant dense<0.000000e+00> : vector<8xf32>
    %121 = vector.multi_reduction <add>, %120, %cst_60 [1] : vector<8x32xf32> to vector<8xf32>
    %122 = vector.shape_cast %121 : vector<8xf32> to vector<8x1xf32>
    %cst_61 = arith.constant 3.200000e+01 : f32
    %123 = vector.broadcast %cst_61 : f32 to vector<8x1xf32>
    %124 = arith.divf %122, %123 : vector<8x1xf32>
    %125 = vector.broadcast %117 : vector<8x1xf32> to vector<8x32xf32>
    %126 = arith.subf %111, %125 : vector<8x32xf32>
    %cst_62 = arith.constant 9.99999974E-6 : f32
    %127 = vector.broadcast %cst_62 : f32 to vector<8x1xf32>
    %128 = arith.addf %124, %127 : vector<8x1xf32>
    %129 = math.rsqrt %128 : vector<8x1xf32>
    %130 = vector.broadcast %129 : vector<8x1xf32> to vector<8x32xf32>
    %131 = arith.mulf %126, %130 : vector<8x32xf32>
    %132 = vector.broadcast %112 : vector<1x32xf32> to vector<8x32xf32>
    %133 = arith.mulf %131, %132 : vector<8x32xf32>
    %134 = vector.broadcast %113 : vector<1x32xf32> to vector<8x32xf32>
    %135 = arith.addf %133, %134 : vector<8x32xf32>
    %c0_63 = arith.constant 0 : index
    %c0_64 = arith.constant 0 : index
    %136 = vector.load %arg18[%c0_63, %c0_64] : memref<32x128xf32, #tpu.memory_space<vmem>>, vector<32x128xf32>
    %cst_65 = arith.constant dense<0.000000e+00> : vector<8x128xf32>
    %137 = tpu.matmul %135, %136, %cst_65 {dimension_numbers = #tpu.dot_dimension_numbers<[1], [0], [0], [1], [0, 0, 1, 1], [], []>} : vector<8x32xf32>, vector<32x128xf32>, vector<8x128xf32> -> vector<8x128xf32>
    %c0_66 = arith.constant 0 : index
    %c0_67 = arith.constant 0 : index
    %138 = vector.load %arg19[%c0_66, %c0_67] : memref<1x128xf32, #tpu.memory_space<vmem>>, vector<1x128xf32>
    %139 = vector.broadcast %138 : vector<1x128xf32> to vector<8x128xf32>
    %140 = arith.addf %137, %139 : vector<8x128xf32>
    %cst_68 = arith.constant 0.000000e+00 : f32
    %141 = vector.broadcast %cst_68 : f32 to vector<8x128xf32>
    %142 = arith.maximumf %140, %141 : vector<8x128xf32>
    %c0_69 = arith.constant 0 : index
    %c0_70 = arith.constant 0 : index
    %143 = vector.load %arg20[%c0_69, %c0_70] : memref<128x32xf32, #tpu.memory_space<vmem>>, vector<128x32xf32>
    %cst_71 = arith.constant dense<0.000000e+00> : vector<8x32xf32>
    %144 = tpu.matmul %142, %143, %cst_71 {dimension_numbers = #tpu.dot_dimension_numbers<[1], [0], [0], [1], [0, 0, 1, 1], [], []>} : vector<8x128xf32>, vector<128x32xf32>, vector<8x32xf32> -> vector<8x32xf32>
    %c0_72 = arith.constant 0 : index
    %c0_73 = arith.constant 0 : index
    %145 = vector.load %arg21[%c0_72, %c0_73] : memref<1x32xf32, #tpu.memory_space<vmem>>, vector<1x32xf32>
    %146 = vector.broadcast %145 : vector<1x32xf32> to vector<8x32xf32>
    %147 = arith.addf %144, %146 : vector<8x32xf32>
    %148 = arith.addf %147, %135 : vector<8x32xf32>
    %c0_74 = arith.constant 0 : index
    %c0_75 = arith.constant 0 : index
    %149 = vector.load %arg16[%c0_74, %c0_75] : memref<1x32xf32, #tpu.memory_space<vmem>>, vector<1x32xf32>
    %c0_76 = arith.constant 0 : index
    %c0_77 = arith.constant 0 : index
    %150 = vector.load %arg17[%c0_76, %c0_77] : memref<1x32xf32, #tpu.memory_space<vmem>>, vector<1x32xf32>
    %cst_78 = arith.constant dense<0.000000e+00> : vector<8xf32>
    %151 = vector.multi_reduction <add>, %148, %cst_78 [1] : vector<8x32xf32> to vector<8xf32>
    %152 = vector.shape_cast %151 : vector<8xf32> to vector<8x1xf32>
    %cst_79 = arith.constant 3.200000e+01 : f32
    %153 = vector.broadcast %cst_79 : f32 to vector<8x1xf32>
    %154 = arith.divf %152, %153 : vector<8x1xf32>
    %155 = vector.broadcast %154 : vector<8x1xf32> to vector<8x32xf32>
    %156 = arith.subf %148, %155 : vector<8x32xf32>
    %157 = arith.mulf %156, %156 : vector<8x32xf32>
    %cst_80 = arith.constant dense<0.000000e+00> : vector<8xf32>
    %158 = vector.multi_reduction <add>, %157, %cst_80 [1] : vector<8x32xf32> to vector<8xf32>
    %159 = vector.shape_cast %158 : vector<8xf32> to vector<8x1xf32>
    %cst_81 = arith.constant 3.200000e+01 : f32
    %160 = vector.broadcast %cst_81 : f32 to vector<8x1xf32>
    %161 = arith.divf %159, %160 : vector<8x1xf32>
    %162 = vector.broadcast %154 : vector<8x1xf32> to vector<8x32xf32>
    %163 = arith.subf %148, %162 : vector<8x32xf32>
    %cst_82 = arith.constant 9.99999974E-6 : f32
    %164 = vector.broadcast %cst_82 : f32 to vector<8x1xf32>
    %165 = arith.addf %161, %164 : vector<8x1xf32>
    %166 = math.rsqrt %165 : vector<8x1xf32>
    %167 = vector.broadcast %166 : vector<8x1xf32> to vector<8x32xf32>
    %168 = arith.mulf %163, %167 : vector<8x32xf32>
    %169 = vector.broadcast %149 : vector<1x32xf32> to vector<8x32xf32>
    %170 = arith.mulf %168, %169 : vector<8x32xf32>
    %171 = vector.broadcast %150 : vector<1x32xf32> to vector<8x32xf32>
    %172 = arith.addf %170, %171 : vector<8x32xf32>
    %c0_83 = arith.constant 0 : index
    %c0_84 = arith.constant 0 : index
    %c0_85 = arith.constant 0 : index
    %173 = vector.load %arg22[%c0_83, %c0_84, %c0_85] : memref<1x8x32xf32, #tpu.memory_space<vmem>>, vector<1x8x32xf32>
    %174 = vector.shape_cast %173 : vector<1x8x32xf32> to vector<8x32xf32>
    %175 = vector.shape_cast %172 : vector<8x32xf32> to vector<1x8x32xf32>
    tpu.vector_store %arg22[%c0_83, %c0_84, %c0_85], %175 {strides = array<i32>} : memref<1x8x32xf32, #tpu.memory_space<vmem>>, vector<1x8x32xf32>,
    return
  }
  func.func @transform_0(%arg0: i32, %arg1: i32) -> (i32, i32, i32) {
    %c0_i32 = arith.constant 0 : i32
    %c0_i32_0 = arith.constant 0 : i32
    %c0_i32_1 = arith.constant 0 : i32
    return %arg0, %c0_i32, %c0_i32_0 : i32, i32, i32
  }
  func.func @transform_1(%arg0: i32, %arg1: i32) -> (i32, i32, i32) {
    %c0_i32 = arith.constant 0 : i32
    %c0_i32_0 = arith.constant 0 : i32
    %c0_i32_1 = arith.constant 0 : i32
    return %arg0, %c0_i32, %c0_i32_0 : i32, i32, i32
  }
  func.func @transform_2(%arg0: i32, %arg1: i32) -> (i32, i32, i32) {
    %c0_i32 = arith.constant 0 : i32
    %c0_i32_0 = arith.constant 0 : i32
    return %arg0, %arg1, %c0_i32 : i32, i32, i32
  }
  func.func @transform_3(%arg0: i32, %arg1: i32) -> (i32, i32, i32) {
    %c0_i32 = arith.constant 0 : i32
    %c0_i32_0 = arith.constant 0 : i32
    return %arg0, %arg1, %c0_i32 : i32, i32, i32
  }
  func.func @transform_4(%arg0: i32, %arg1: i32) -> (i32, i32) {
    %c0_i32 = arith.constant 0 : i32
    %c0_i32_0 = arith.constant 0 : i32
    %c0_i32_1 = arith.constant 0 : i32
    return %c0_i32, %c0_i32_0 : i32, i32
  }
  func.func @transform_5(%arg0: i32, %arg1: i32) -> (i32, i32) {
    %c0_i32 = arith.constant 0 : i32
    %c0_i32_0 = arith.constant 0 : i32
    %c0_i32_1 = arith.constant 0 : i32
    return %c0_i32, %c0_i32_0 : i32, i32
  }
  func.func @transform_6(%arg0: i32, %arg1: i32) -> (i32, i32) {
    %c0_i32 = arith.constant 0 : i32
    %c0_i32_0 = arith.constant 0 : i32
    %c0_i32_1 = arith.constant 0 : i32
    return %c0_i32, %c0_i32_0 : i32, i32
  }
  func.func @transform_7(%arg0: i32, %arg1: i32) -> (i32, i32) {
    %c0_i32 = arith.constant 0 : i32
    %c0_i32_0 = arith.constant 0 : i32
    %c0_i32_1 = arith.constant 0 : i32
    return %c0_i32, %c0_i32_0 : i32, i32
  }
  func.func @transform_8(%arg0: i32, %arg1: i32) -> (i32, i32) {
    %c0_i32 = arith.constant 0 : i32
    %c0_i32_0 = arith.constant 0 : i32
    %c0_i32_1 = arith.constant 0 : i32
    return %c0_i32, %c0_i32_0 : i32, i32
  }
  func.func @transform_9(%arg0: i32, %arg1: i32) -> (i32, i32) {
    %c0_i32 = arith.constant 0 : i32
    %c0_i32_0 = arith.constant 0 : i32
    %c0_i32_1 = arith.constant 0 : i32
    return %c0_i32, %c0_i32_0 : i32, i32
  }
  func.func @transform_10(%arg0: i32, %arg1: i32) -> (i32, i32) {
    %c0_i32 = arith.constant 0 : i32
    %c0_i32_0 = arith.constant 0 : i32
    %c0_i32_1 = arith.constant 0 : i32
    return %c0_i32, %c0_i32_0 : i32, i32
  }
  func.func @transform_11(%arg0: i32, %arg1: i32) -> (i32, i32) {
    %c0_i32 = arith.constant 0 : i32
    %c0_i32_0 = arith.constant 0 : i32
    %c0_i32_1 = arith.constant 0 : i32
    return %c0_i32, %c0_i32_0 : i32, i32
  }
  func.func @transform_12(%arg0: i32, %arg1: i32) -> (i32, i32) {
    %c0_i32 = arith.constant 0 : i32
    %c0_i32_0 = arith.constant 0 : i32
    %c0_i32_1 = arith.constant 0 : i32
    return %c0_i32, %c0_i32_0 : i32, i32
  }
  func.func @transform_13(%arg0: i32, %arg1: i32) -> (i32, i32) {
    %c0_i32 = arith.constant 0 : i32
    %c0_i32_0 = arith.constant 0 : i32
    %c0_i32_1 = arith.constant 0 : i32
    return %c0_i32, %c0_i32_0 : i32, i32
  }
  func.func @transform_14(%arg0: i32, %arg1: i32) -> (i32, i32) {
    %c0_i32 = arith.constant 0 : i32
    %c0_i32_0 = arith.constant 0 : i32
    %c0_i32_1 = arith.constant 0 : i32
    return %c0_i32, %c0_i32_0 : i32, i32
  }
  func.func @transform_15(%arg0: i32, %arg1: i32) -> (i32, i32) {
    %c0_i32 = arith.constant 0 : i32
    %c0_i32_0 = arith.constant 0 : i32
    %c0_i32_1 = arith.constant 0 : i32
    return %c0_i32, %c0_i32_0 : i32, i32
  }
  func.func @transform_16(%arg0: i32, %arg1: i32) -> (i32, i32) {
    %c0_i32 = arith.constant 0 : i32
    %c0_i32_0 = arith.constant 0 : i32
    %c0_i32_1 = arith.constant 0 : i32
    return %c0_i32, %c0_i32_0 : i32, i32
  }
  func.func @transform_17(%arg0: i32, %arg1: i32) -> (i32, i32) {
    %c0_i32 = arith.constant 0 : i32
    %c0_i32_0 = arith.constant 0 : i32
    %c0_i32_1 = arith.constant 0 : i32
    return %c0_i32, %c0_i32_0 : i32, i32
  }
  func.func @transform_18(%arg0: i32, %arg1: i32) -> (i32, i32) {
    %c0_i32 = arith.constant 0 : i32
    %c0_i32_0 = arith.constant 0 : i32
    %c0_i32_1 = arith.constant 0 : i32
    return %c0_i32, %c0_i32_0 : i32, i32
  }
  func.func @transform_19(%arg0: i32, %arg1: i32) -> (i32, i32) {
    %c0_i32 = arith.constant 0 : i32
    %c0_i32_0 = arith.constant 0 : i32
    %c0_i32_1 = arith.constant 0 : i32
    return %c0_i32, %c0_i32_0 : i32, i32
  }
  func.func @transform_20(%arg0: i32, %arg1: i32) -> (i32, i32, i32) {
    %c0_i32 = arith.constant 0 : i32
    %c0_i32_0 = arith.constant 0 : i32
    return %arg0, %arg1, %c0_i32 : i32, i32, i32
  }
}

</mosaic_0001>

<bundles_post_ra>
// kernel: tpu_custom_call.1
= control target key start
LH: loop header
LB: loop body
LE: loop exit
PB: predicated region body
PF: predicated region fallthrough
CT: control target
= control target key end

     0   :  { %s4292_s0 = inlined_call_operand.hbm [shape: f32[2,8,32], index: 0, kind: input, shape index: {}]   ;;  %s4293_s1 = inlined_call_operand.hbm [shape: f32[2,8,32], index: 1, kind: input, shape index: {}]   ;;  %s4294_s2 = inlined_call_operand.hbm [shape: f32[2,8,32], index: 2, kind: input, shape index: {}]   ;;  %s4295_s3 = inlined_call_operand.hbm [shape: f32[2,8,8], index: 3, kind: input, shape index: {}]   ;;  %s4296_s4 = inlined_call_operand.vmem [shape: f32[32,32], index: 4, kind: input, shape index: {}]   ;;  %s4297_s5 = inlined_call_operand.hbm [shape: f32[1,32], index: 5, kind: input, shape index: {}]   ;;  %s4298_s6 = inlined_call_operand.vmem [shape: f32[32,32], index: 6, kind: input, shape index: {}]   ;;  %s4299_s7 = inlined_call_operand.hbm [shape: f32[1,32], index: 7, kind: input, shape index: {}]   ;;  %s4300_s8 = inlined_call_operand.vmem [shape: f32[32,32], index: 8, kind: input, shape index: {}]   ;;  %s4301_s9 = inlined_call_operand.hbm [shape: f32[1,32], index: 9, kind: input, shape index: {}]   ;;  %s4302_s10 = inlined_call_operand.vmem [shape: f32[32,32], index: 10, kind: input, shape index: {}]   ;;  %s4303_s11 = inlined_call_operand.hbm [shape: f32[1,32], index: 11, kind: input, shape index: {}]   ;;  %s4304_s12 = inlined_call_operand.hbm [shape: f32[1,32], index: 12, kind: input, shape index: {}]   ;;  %s4305_s13 = inlined_call_operand.hbm [shape: f32[1,32], index: 13, kind: input, shape index: {}]   ;;  %s4306_s14 = inlined_call_operand.hbm [shape: f32[1,32], index: 14, kind: input, shape index: {}]   ;;  %s4307_s15 = inlined_call_operand.hbm [shape: f32[1,32], index: 15, kind: input, shape index: {}]   ;;  %s4308_s16 = inlined_call_operand.vmem [shape: f32[32,128], index: 16, kind: input, shape index: {}]   ;;  %s4309_s17 = inlined_call_operand.hbm [shape: f32[1,128], index: 17, kind: input, shape index: {}]   ;;  %s4310_s18 = inlined_call_operand.vmem [shape: f32[128,32], index: 18, kind: input, shape index: {}]   ;;  %s4311_s19 = inlined_call_operand.hbm [shape: f32[1,32], index: 19, kind: input, shape index: {}]   ;;  %s4312_s20 = inlined_call_operand.hbm [shape: f32[2,8,32], index: 20, kind: output, shape index: {}]  }
   0x1   :  { %4330 = sst [smem:[#allocation43_spill]] %s4292_s0 }
   0x2   :  { %4331 = sst [smem:[#allocation44_spill]] %s4293_s1 }
   0x3   :  { %4332 = sst [smem:[#allocation45_spill]] %s4294_s2 }
   0x4   :  { %4333 = sst [smem:[#allocation46_spill]] %s4295_s3 }
   0x5   :  { %4334 = sst [smem:[#allocation47_spill]] %s4296_s4 }
   0x6   :  { %4335 = sst [smem:[#allocation48_spill]] %s4297_s5 }
   0x7   :  { %4336 = sst [smem:[#allocation49_spill]] %s4299_s7 }
   0x8   :  { %4337 = sst [smem:[#allocation50_spill]] %s4301_s9 }
   0x9   :  { %4338 = sst [smem:[#allocation51_spill]] %s4303_s11 }
   0xa   :  { %4339 = sst [smem:[#allocation52_spill]] %s4305_s13 }
   0xb   :  { %4340 = sst [smem:[#allocation53_spill]] %s4307_s15 }
   0xc   :  { %4341 = sst [smem:[#allocation54_spill]] %s4308_s16 }
   0xd   :  { %4342 = sst [smem:[#allocation55_spill]] %s4310_s18 }
   0xe   :  { %4343 = sst [smem:[#allocation56_spill]] %s4312_s20 }
   0xf   :  { %25 = vsyncpa [#allocation3], 0 }
  0x10   :  { %27 = vsyncpa [#allocation3 + $0x1], 0 }
  0x11   :  { %28 = vsyncpa [#allocation6], 0 }
  0x12   :  { %30 = vsyncpa [#allocation6 + $0x1], 0 }
  0x13   :  { %31 = vsyncpa [#allocation9], 0 }
  0x14   :  { %33 = vsyncpa [#allocation9 + $0x1], 0 }
  0x15   :  { %34 = vsyncpa [#allocation12], 0 }
  0x16   :  { %35 = vsyncpa [#allocation15], 0 }
  0x17   :  { %36 = vsyncpa [#allocation18], 0 }
  0x18   :  { %37 = vsyncpa [#allocation21], 0 }
  0x19   :  { %38 = vsyncpa [#allocation24], 0 }
  0x1a   :  { %39 = vsyncpa [#allocation4], 0 }
  0x1b   :  { %41 = vsyncpa [#allocation4 + $0x1], 0  ;;  %s3704_s1 = smov 0   ;;  %s3706_s22 = smov 0  }
  0x1c   :  { %s3708_s23 = smov 0   ;;  %s3710_s24 = smov 0  }
  0x1d   :  { %s3712_s2 = smov 0   ;;  %s3714_s25 = smov 0  }
  0x1e LB: > { %4344 = sst [smem:[#allocation36_spill]] %s3557_s1  ;;  %s3735_s3 = sadd.s32 4294967295, %s3577_s25   ;;  %s3577_s25 = sphi %s3714_s25, %s47_s25   ;;  %s3573_s2 = sphi %s3712_s2, %s4403_s2   ;;  %s3569_s24 = sphi %s3710_s24, %s4402_s24   ;;  %s3565_s23 = sphi %s3708_s23, %s4406_s23   ;;  %s3561_s22 = sphi %s3706_s22, %s4405_s22   ;;  %s3557_s1 = sphi %s3704_s1, %s4404_s1  }
  0x1f   : > { %4345 = sst [smem:[#allocation37_spill]] %s3569_s24  ;;  %p2620_p0 = scmp.ge.s32.totalorder %s3577_s25, 1 }
  0x20   : > { %4346 = sst [smem:[#allocation38_spill]] %s3573_s2  ;;  %p4317_p1 = scmp.eq.s32.totalorder %s3735_s3, 0 }
  0x21   : > { %p536_p2 = scmp.lt.s32.totalorder %s3577_s25, 3  ;;  %s3579_s27 = smov [#allocation10]  }
  0x22   : > { %s552_s28 = sshll.u32 %s3579_s27, 4  ;;  %s3580_s4 = smov [#allocation11]   ;;  %s553_s28 = int_to_ptr.vmem [resolvable:$true] %s552_s28 }
  0x23   : > { %p3740_p3 = pnand %p2620_p0, %p536_p2  ;;  %s566_s29 = sshll.u32 %s3580_s4, 4  ;;  %s567_s29 = int_to_ptr.vmem [resolvable:$true] %s566_s29 }
  0x24   : > { %s3581_s0 = smov [#allocation14]   ;;  %s3104_s20 = scalar_lea.vmem %s553_s28, 16 }
  0x25   : > { %s4347_s26 = scalar_select %p3740_p3, 1, 0 }
  0x26   : > { %p2940_p5 = pneg %p3740_p3  ;;  %s594_s21 = sshll.u32 %s3581_s0, 4  ;;  %s3753_s21 = int_to_ptr.vmem [resolvable:$true] %s594_s21 }
  0x27   : > { %p3105_p8 = scmp.ne.s32.totalorder %s553_s28, %s3104_s20  ;;  %s3111_s4 = scalar_lea.vmem %s553_s28, 32 }
  0x28   : > { %p3749_p6 = pnand %p2940_p5, %p4317_p1  ;;  %p3112_p11 = scmp.lt.s32.totalorder %s553_s28, %s553_s28 }
  0x29   : > { %p3113_p12 = scmp.lt.s32.totalorder %s3111_s4, %s3104_s20 }
  0x2a   : > { %p3757_p7 = pneg %p3749_p6 }
  0x2b   : > { %p3114_p13 = por %p3113_p12, %p3112_p11 }
  0x2c   : > { %p3107_p9 = pnand %p3105_p8, %p3757_p7 }
  0x2e   : > { %p3108_p10 = pneg %p3107_p9 }
  0x30   : > { %p3115_p0 = pnand %p3114_p13, %p3108_p10 }
  0x32   : > { %3118 = shalt.err (!%p3115_p0)
}
  0x33   : > { %s4350_s5 = sld [smem:[#allocation48_spill]]  ;;  %s3130_s18 = scalar_lea.vmem %s567_s29, 16 }
  0x34   : > { %p3131_p2 = scmp.ne.s32.totalorder %s567_s29, %s3130_s18  ;;  %s3137_s16 = scalar_lea.vmem %s567_s29, 32 }
  0x35   : > { %p3138_p8 = scmp.lt.s32.totalorder %s567_s29, %s567_s29  ;;  %p3139_p9 = scmp.lt.s32.totalorder %s3137_s16, %s3130_s18 }
  0x36   : > { %p3133_p5 = pnand %p3131_p2, %p3757_p7 }
  0x37   : > { %p3140_p1 = por %p3139_p9, %p3138_p8 }
  0x38   : > { %p3134_p4 = pneg %p3133_p5 }
  0x39   : > { %2943 = dma.hbm_to_vmem [thread:$0]  (!%p3749_p6), %s4350_s5, 16, %s553_s28, [#allocation9]  }
  0x3a   : > { %p3141_p3 = pnand %p3140_p1, %p3134_p4 }
  0x3c   : > { %3144 = shalt.err (!%p3141_p3)
}
  0x3d   : > { %s4351_s7 = sld [smem:[#allocation49_spill]]  ;;  %s3156_s24 = scalar_lea.vmem %s3753_s21, 16 }
  0x3e   : > { %p3157_p10 = scmp.ne.s32.totalorder %s3753_s21, %s3156_s24  ;;  %s3163_s16 = scalar_lea.vmem %s3753_s21, 32 }
  0x3f   : > { %p3164_p1 = scmp.lt.s32.totalorder %s3753_s21, %s3753_s21  ;;  %p3165_p3 = scmp.lt.s32.totalorder %s3163_s16, %s3156_s24 }
  0x40   : > { %p3159_p11 = pnand %p3157_p10, %p3757_p7 }
  0x41   : > { %p3166_p4 = por %p3165_p3, %p3164_p1 }
  0x42   : > { %p3160_p12 = pneg %p3159_p11 }
  0x43   : > { %2946 = dma.hbm_to_vmem [thread:$0]  (!%p3749_p6), %s4351_s7, 16, %s567_s29, [#allocation12]  }
  0x44   : > { %p3167_p13 = pnand %p3166_p4, %p3160_p12 }
  0x46   : > { %3170 = shalt.err (!%p3167_p13)
}
  0x47   : > { %s4352_s11 = sld [smem:[#allocation51_spill]]  ;;  %s3582_s29 = smov [#allocation17]  }
  0x48   : > { %s616_s0 = sshll.u32 %s3582_s29, 4  ;;  %s3583_s20 = smov [#allocation20]   ;;  %s617_s0 = int_to_ptr.vmem [resolvable:$true] %s616_s0 }
  0x49   : > { %s638_s4 = sshll.u32 %s3583_s20, 4  ;;  %s3182_s5 = scalar_lea.vmem %s617_s0, 16  ;;  %s639_s4 = int_to_ptr.vmem [resolvable:$true] %s638_s4 }
  0x4a   : > { %p3183_p0 = scmp.ne.s32.totalorder %s617_s0, %s3182_s5  ;;  %s3189_s24 = scalar_lea.vmem %s617_s0, 32 }
  0x4b   : > { %p3190_p8 = scmp.lt.s32.totalorder %s617_s0, %s617_s0  ;;  %p3191_p9 = scmp.lt.s32.totalorder %s3189_s24, %s3182_s5 }
  0x4c   : > { %p3185_p2 = pnand %p3183_p0, %p3757_p7 }
  0x4d   : > { %2952 = dma.hbm_to_vmem [thread:$0]  (!%p3749_p6), %s4352_s11, 16, %s3753_s21, [#allocation15]  }
  0x4e   : > { %p3186_p5 = pneg %p3185_p2  ;;  %p3192_p10 = por %p3191_p9, %p3190_p8 }
  0x50   : > { %p3193_p11 = pnand %p3192_p10, %p3186_p5 }
  0x52   : > { %3196 = shalt.err (!%p3193_p11)
}
  0x53   : > { %s4353_s13 = sld [smem:[#allocation52_spill]]  ;;  %s3208_s18 = scalar_lea.vmem %s639_s4, 16 }
  0x54   : > { %p3209_p12 = scmp.ne.s32.totalorder %s639_s4, %s3208_s18  ;;  %s3215_s28 = scalar_lea.vmem %s639_s4, 32 }
  0x55   : > { %p3216_p4 = scmp.lt.s32.totalorder %s639_s4, %s639_s4  ;;  %p3217_p13 = scmp.lt.s32.totalorder %s3215_s28, %s3208_s18 }
  0x56   : > { %p3211_p1 = pnand %p3209_p12, %p3757_p7 }
  0x57   : > { %p3218_p0 = por %p3217_p13, %p3216_p4 }
  0x58   : > { %p3212_p3 = pneg %p3211_p1 }
  0x59   : > { %2958 = dma.hbm_to_vmem [thread:$0]  (!%p3749_p6), %s4353_s13, 16, %s617_s0, [#allocation18]  }
  0x5a   : > { %p3219_p2 = pnand %p3218_p0, %p3212_p3 }
  0x5c   : > { %3222 = shalt.err (!%p3219_p2)
}
  0x5d   : > { %s4354_s15 = sld [smem:[#allocation53_spill]]  ;;  %s2619_s0 = sadd.s32 4294967294, %s3577_s25  }
  0x5e   : > { %s59_s20 = sadd.s32 1, %s3573_s2  ;;  %s66_s24 = sadd.s32 1, %s3565_s23 }
  0x5f   : > { %p61_p5 = scmp.ge.s32.totalorder %s59_s20, 2  ;;  %p73_p8 = scmp.ne.s32.totalorder %s3565_s23, %s3561_s22 }
  0x60   : > { %p74_p9 = scmp.eq.s32.totalorder %s3577_s25, 0  ;;  %p79_p10 = scmp.ne.s32.totalorder %s3561_s22, %s3557_s1 }
  0x61   : > { %s4408_s20 = smov (%p61_p5, %s59_s20), 0  ;;  %p4357_p12 = scmp.eq.s32.totalorder %s3735_s3, 0 }
  0x62   : > { %4355 = sst [smem:[#allocation39_spill]] %s4408_s20  ;;  %p3812_p11 = por %p74_p9, %p73_p8 }
  0x63   : > { %2964 = dma.hbm_to_vmem [thread:$0]  (!%p3749_p6), %s4354_s15, 16, %s639_s4, [#allocation21]  }
  0x64   : > { %p3818_p1 = por %p4357_p12, %p79_p10  ;;  %s63_s21 = ssub.s32 %s3573_s2, %s4408_s20 }
  0x65   : > { %p523_p3 = scmp.eq.s32.totalorder %s3735_s3, 1  ;;  %p64_p4 = scmp.eq.s32.totalorder %s63_s21, 0 }
  0x66   : > { %s4358_s4 = scalar_select %p3818_p1, 1, 0 }
  0x67   : > { %p529_p13 = scmp.eq.s32.totalorder %s2619_s0, 1  ;;  %p3825_p0 = por %p523_p3, %p73_p8 }
  0x68   : > { %p2998_p2 = scmp.lt.s32.totalorder %s3577_s25, 2  ;;  %s4321_s29 = sand.u32 1, %s3565_s23  }
  0x69   : > { %s4359_s18 = scalar_select %p3825_p0, 1, 0 }
  0x6a   : > { %s3831_s28 = scalar_select %p64_p4, %s3565_s23, %s66_s24  }
  0x6b   : > { %4360 = sst [smem:[#allocation40_spill]] %s4359_s18  ;;  %p3833_p5 = por %p529_p13, %p79_p10 }
  0x6c   : > { %4361 = sst [smem:[#allocation41_spill]] %s3831_s28  ;;  %s3840_s7 = sshll.u32 %s4321_s29, 3 }
  0x6d   : > { %s4362_s5 = scalar_select %p3833_p5, 1, 0 }
  0x6e   : > { %s3843_s11 = sshll.u32 %s3573_s2, 7  ;;  %p3847_p8 = pnand %p2998_p2, %p3812_p11 }
  0x6f   : > { %4363 = sst [smem:[#allocation42_spill]] %s4362_s5  ;;  %s4326_s24 = sand.u32 1, %s3577_s25  }
  0x70   : > { %s4365_s15 = sld [smem:[#allocation44_spill]]  ;;  %s699_s28 = scalar_lea.vmem [#allocation5], %s3840_s7 }
  0x71   : > { %s706_s5 = sshll.u32 %s699_s28, 4  ;;  %s3859_s29 = scalar_lea.sflag [#allocation6], %s4326_s24  ;;  %s707_s5 = int_to_ptr.vmem [resolvable:$true] %s706_s5 }
  0x72   : > { %p4327_p9 = pneg %p3847_p8  ;;  %s3236_s16 = scalar_lea.vmem %s707_s5, 128 }
  0x73   : > { %p3237_p10 = scmp.ne.s32.totalorder %s707_s5, %s3236_s16  ;;  %s3584_s2 = smov [#allocation5]  }
  0x74   : > { %s3241_s1 = sshll.u32 %s3584_s2, 4  ;;  %s3242_s1 = int_to_ptr.vmem [resolvable:$false] %s3241_s1 }
  0x75   : > { %p3239_p11 = pnand %p3237_p10, %p4327_p9  ;;  %s3243_s18 = scalar_lea.vmem %s3242_s1, 256 }
  0x76   : > { %s704_s20 = scalar_lea.hbm %s4365_s15, %s3843_s11  ;;  %p3244_p3 = scmp.lt.s32.totalorder %s707_s5, %s3242_s1 }
  0x77   : > { %p3240_p12 = pneg %p3239_p11  ;;  %p3245_p4 = scmp.lt.s32.totalorder %s3243_s18, %s3236_s16 }
  0x79   : > { %p3246_p13 = por %p3245_p4, %p3244_p3 }
  0x7b   : > { %p3247_p2 = pnand %p3246_p13, %p3240_p12 }
  0x7d   : > { %3250 = shalt.err (!%p3247_p2)
}
  0x7e   : > { %2977 = dma.hbm_to_vmem [thread:$0]  (!%p3847_p8), %s704_s20, 128, %s707_s5, %s3859_s29  }
  0x7f   : > { %s3585_s13 = smov [#allocation13]   ;;  %s3586_s28 = smov [#allocation16]  }
  0x80   : > { %s580_s15 = sshll.u32 %s3585_s13, 4  ;;  %s605_s21 = sshll.u32 %s3586_s28, 4  ;;  %s581_s15 = int_to_ptr.vmem [resolvable:$true] %s580_s15  ;;  %s606_s21 = int_to_ptr.vmem [resolvable:$true] %s605_s21 }
  0x81   : > { %s3262_s24 = scalar_lea.vmem %s581_s15, 16  ;;  %s3269_s1 = scalar_lea.vmem %s581_s15, 32 }
  0x82   : > { %p3263_p10 = scmp.ne.s32.totalorder %s581_s15, %s3262_s24  ;;  %p3270_p5 = scmp.lt.s32.totalorder %s581_s15, %s581_s15 }
  0x83   : > { %p3271_p3 = scmp.lt.s32.totalorder %s3269_s1, %s3262_s24 }
  0x84   : > { %p3265_p11 = pnand %p3263_p10, %p3757_p7 }
  0x85   : > { %p3272_p12 = por %p3271_p3, %p3270_p5 }
  0x86   : > { %p3266_p9 = pneg %p3265_p11 }
  0x88   : > { %p3273_p4 = pnand %p3272_p12, %p3266_p9 }
  0x8a   : > { %3276 = shalt.err (!%p3273_p4)
}
  0x8b   : > { %s4366_s9 = sld [smem:[#allocation50_spill]]  ;;  %s3288_s18 = scalar_lea.vmem %s606_s21, 16 }
  0x8c   : > { %p3289_p13 = scmp.ne.s32.totalorder %s606_s21, %s3288_s18  ;;  %s3295_s5 = scalar_lea.vmem %s606_s21, 32 }
  0x8d   : > { %p3296_p11 = scmp.lt.s32.totalorder %s606_s21, %s606_s21  ;;  %p3297_p0 = scmp.lt.s32.totalorder %s3295_s5, %s3288_s18 }
  0x8e   : > { %p3291_p2 = pnand %p3289_p13, %p3757_p7 }
  0x8f   : > { %p3298_p1 = por %p3297_p0, %p3296_p11 }
  0x90   : > { %p3292_p10 = pneg %p3291_p2 }
  0x91   : > { %2949 = dma.hbm_to_vmem [thread:$0]  (!%p3749_p6), %s4366_s9, 16, %s581_s15, [#allocation12]  }
  0x92   : > { %p3299_p5 = pnand %p3298_p1, %p3292_p10 }
  0x94   : > { %3302 = shalt.err (!%p3299_p5)
}
  0x95   : > { %2955 = dma.hbm_to_vmem [thread:$0]  (!%p3749_p6), %s4304_s12, 16, %s606_s21, [#allocation15]  }
  0x96   : > { %s3587_s13 = smov [#allocation19]   ;;  %s3588_s28 = smov [#allocation22]  }
  0x97   : > { %s627_s15 = sshll.u32 %s3587_s13, 4  ;;  %s652_s1 = sshll.u32 %s3588_s28, 4  ;;  %s628_s15 = int_to_ptr.vmem [resolvable:$true] %s627_s15  ;;  %s653_s1 = int_to_ptr.vmem [resolvable:$true] %s652_s1 }
  0x98   : > { %s3314_s2 = scalar_lea.vmem %s628_s15, 16  ;;  %s3321_s20 = scalar_lea.vmem %s628_s15, 32 }
  0x99   : > { %p3315_p9 = scmp.ne.s32.totalorder %s628_s15, %s3314_s2  ;;  %p3322_p1 = scmp.lt.s32.totalorder %s628_s15, %s628_s15 }
  0x9a   : > { %p3323_p0 = scmp.lt.s32.totalorder %s3321_s20, %s3314_s2 }
  0x9b   : > { %p3317_p3 = pnand %p3315_p9, %p3757_p7 }
  0x9c   : > { %p3324_p4 = por %p3323_p0, %p3322_p1 }
  0x9d   : > { %p3318_p12 = pneg %p3317_p3 }
  0x9f   : > { %p3325_p13 = pnand %p3324_p4, %p3318_p12 }
  0xa1   : > { %3328 = shalt.err (!%p3325_p13)
}
  0xa2   : > { %2961 = dma.hbm_to_vmem [thread:$0]  (!%p3749_p6), %s4306_s14, 16, %s628_s15, [#allocation18]  }
  0xa3   : > { %s3340_s5 = scalar_lea.vmem %s653_s1, 16  ;;  %s3347_s24 = scalar_lea.vmem %s653_s1, 32 }
  0xa4   : > { %p3341_p2 = scmp.ne.s32.totalorder %s653_s1, %s3340_s5  ;;  %p3348_p5 = scmp.lt.s32.totalorder %s653_s1, %s653_s1 }
  0xa5   : > { %p3349_p9 = scmp.lt.s32.totalorder %s3347_s24, %s3340_s5 }
  0xa6   : > { %p3343_p10 = pnand %p3341_p2, %p3757_p7 }
  0xa7   : > { %p3350_p3 = por %p3349_p9, %p3348_p5 }
  0xa8   : > { %p3344_p11 = pneg %p3343_p10 }
  0xaa   : > { %p3351_p1 = pnand %p3350_p3, %p3344_p11 }
  0xac   : > { %3354 = shalt.err (!%p3351_p1)
}
  0xad   : > { %2967 = dma.hbm_to_vmem [thread:$0]  (!%p3749_p6), %s4309_s17, 16, %s653_s1, [#allocation21]  }
  0xae   : > { %s3589_s15 = smov [#allocation23]  }
  0xaf   : > { %s666_s28 = sshll.u32 %s3589_s15, 4  ;;  %s667_s28 = int_to_ptr.vmem [resolvable:$true] %s666_s28 }
  0xb0   : > { %s3366_s2 = scalar_lea.vmem %s667_s28, 16  ;;  %s3373_s20 = scalar_lea.vmem %s667_s28, 32 }
  0xb1   : > { %p3367_p12 = scmp.ne.s32.totalorder %s667_s28, %s3366_s2  ;;  %p3374_p13 = scmp.lt.s32.totalorder %s667_s28, %s667_s28 }
  0xb2   : > { %p3375_p2 = scmp.lt.s32.totalorder %s3373_s20, %s3366_s2 }
  0xb3   : > { %p3369_p0 = pnand %p3367_p12, %p3757_p7 }
  0xb4   : > { %p3376_p10 = por %p3375_p2, %p3374_p13 }
  0xb5   : > { %p3370_p4 = pneg %p3369_p0 }
  0xb7   : > { %p3377_p11 = pnand %p3376_p10, %p3370_p4 }
  0xb9   : > { %3380 = shalt.err (!%p3377_p11)
}
  0xba   : > { %2970 = dma.hbm_to_vmem [thread:$0]  (!%p3749_p6), %s4311_s19, 16, %s667_s28, [#allocation24]  }
  0xbb   : > { %s4367_s5 = sld [smem:[#allocation43_spill]]  ;;  %s681_s16 = scalar_lea.vmem [#allocation2], %s3840_s7 }
  0xbc   : > { %s688_s13 = sshll.u32 %s681_s16, 4  ;;  %s4368_s15 = sand.u32 1, %s3565_s23   ;;  %s689_s13 = int_to_ptr.vmem [resolvable:$true] %s688_s13 }
  0xbd   : > { %s678_s2 = scalar_lea.sflag [#allocation3], %s4368_s15  ;;  %s3394_s20 = scalar_lea.vmem %s689_s13, 128 }
  0xbe   : > { %p3395_p7 = scmp.ne.s32.totalorder %s689_s13, %s3394_s20  ;;  %p4369_p5 = pneg %p3847_p8 }
  0xbf   : > { %s3590_s30 = smov [#allocation2]  }
  0xc0   : > { %p3397_p9 = pnand %p3395_p7, %p4369_p5  ;;  %s3399_s18 = sshll.u32 %s3590_s30, 4  ;;  %s3400_s18 = int_to_ptr.vmem [resolvable:$false] %s3399_s18 }
  0xc1   : > { %s686_s24 = scalar_lea.hbm %s4367_s5, %s3843_s11  ;;  %s3401_s21 = scalar_lea.vmem %s3400_s18, 256 }
  0xc2   : > { %p3398_p3 = pneg %p3397_p9  ;;  %p3402_p6 = scmp.lt.s32.totalorder %s689_s13, %s3400_s18 }
  0xc3   : > { %p3403_p1 = scmp.lt.s32.totalorder %s3401_s21, %s3394_s20 }
  0xc5   : > { %p3404_p12 = por %p3403_p1, %p3402_p6 }
  0xc7   : > { %p3405_p0 = pnand %p3404_p12, %p3398_p3 }
  0xc9   : > { %3408 = shalt.err (!%p3405_p0)
}
  0xca   : > { %2974 = dma.hbm_to_vmem [thread:$0]  (!%p3847_p8), %s686_s24, 128, %s689_s13, %s678_s2  }
  0xcb   : > { %s4370_s27 = sld [smem:[#allocation45_spill]]  ;;  %s717_s16 = scalar_lea.vmem [#allocation7], %s3840_s7 }
  0xcc   : > { %s725_s15 = sshll.u32 %s717_s16, 4  ;;  %p4371_p13 = pmov %p4369_p5  ;;  %s726_s15 = int_to_ptr.vmem [resolvable:$true] %s725_s15 }
  0xcd   : > { %s3422_s30 = scalar_lea.vmem %s726_s15, 128  ;;  %s3591_s20 = smov [#allocation7]  }
  0xce   : > { %p3423_p4 = scmp.ne.s32.totalorder %s726_s15, %s3422_s30  ;;  %s3427_s18 = sshll.u32 %s3591_s20, 4  ;;  %s3428_s18 = int_to_ptr.vmem [resolvable:$false] %s3427_s18 }
  0xcf   : > { %s3429_s21 = scalar_lea.vmem %s3428_s18, 256  ;;  %p3430_p11 = scmp.lt.s32.totalorder %s726_s15, %s3428_s18 }
  0xd0   : > { %p3425_p2 = pnand %p3423_p4, %p4371_p13  ;;  %p3431_p7 = scmp.lt.s32.totalorder %s3429_s21, %s3422_s30 }
  0xd1   : > { %s723_s5 = scalar_lea.hbm %s4370_s27, %s3843_s11 }
  0xd2   : > { %p3426_p10 = pneg %p3425_p2  ;;  %p3432_p5 = por %p3431_p7, %p3430_p11 }
  0xd4   : > { %p3433_p9 = pnand %p3432_p5, %p3426_p10 }
  0xd6   : > { %3436 = shalt.err (!%p3433_p9)
}
  0xd7   : > { %2980 = dma.hbm_to_vmem [thread:$0]  (!%p3847_p8), %s723_s5, 128, %s726_s15, %s3859_s29  }
  0xd8   : > { %s4372_s2 = sld [smem:[#allocation46_spill]]  ;;  %s736_s1 = scalar_lea.vmem [#allocation8], %s3840_s7 }
  0xd9   : > { %s744_s27 = sshll.u32 %s736_s1, 4  ;;  %s4373_s16 = sand.u32 1, %s3577_s25   ;;  %s745_s27 = int_to_ptr.vmem [resolvable:$true] %s744_s27 }
  0xda   : > { %s733_s30 = scalar_lea.sflag [#allocation9], %s4373_s16  ;;  %s3450_s20 = scalar_lea.vmem %s745_s27, 128 }
  0xdb   : > { %p3451_p3 = scmp.ne.s32.totalorder %s745_s27, %s3450_s20  ;;  %p4374_p6 = pmov %p4371_p13 }
  0xdc   : > { %s3592_s18 = smov [#allocation8]  }
  0xdd   : > { %p3453_p1 = pnand %p3451_p3, %p4374_p6  ;;  %s3455_s21 = sshll.u32 %s3592_s18, 4  ;;  %s3456_s21 = int_to_ptr.vmem [resolvable:$false] %s3455_s21 }
  0xde   : > { %s742_s28 = scalar_lea.hbm %s4372_s2, %s3843_s11  ;;  %s3457_s9 = scalar_lea.vmem %s3456_s21, 256 }
  0xdf   : > { %p3454_p12 = pneg %p3453_p1  ;;  %p3458_p0 = scmp.lt.s32.totalorder %s745_s27, %s3456_s21 }
  0xe0   : > { %p3459_p4 = scmp.lt.s32.totalorder %s3457_s9, %s3450_s20 }
  0xe2   : > { %p3460_p13 = por %p3459_p4, %p3458_p0 }
  0xe4   : > { %p3461_p2 = pnand %p3460_p13, %p3454_p12 }
  0xe6   : > { %3464 = shalt.err (!%p3461_p2)
}
  0xe7   : > { %2983 = dma.hbm_to_vmem [thread:$0]  (!%p3847_p8), %s742_s28, 128, %s745_s27, %s733_s30  }
  0xe8   : > { %p4375_p10 = scmp.ne.s32.totalorder %s4347_s26, 0 }
  0xe9   : > { %s3942_s7 = sand.u32 (!%p4375_p10), 1, %s3561_s22   ;;  %p4376_p11 = scmp.ne.s32.totalorder (!%p4375_p10), %s4358_s4, 0 }
  0xea   : > { %753 = sbr.rel (%p4375_p10) target bundleno = 3744 (0xea0), region = 100  ;;  %s3945_s11 = sshll.u32 (!%p4375_p10), %s3942_s7, 3 }
  0xeb   : > { %s756_s29 = scalar_lea.sflag (!%p4375_p10), [#allocation3], %s3942_s7  ;;  %s759_s9 = scalar_lea.vmem (!%p4375_p10), [#allocation2], %s3945_s11 }
  0xef   : > { %3516 = dma.done.wait (%p4376_p11), %s756_s29, 128  }
  0xf0   : > { %3518 = vsyncadd (%p4376_p11), %s756_s29, 4294967168  ;;  %s764_s26 = sand.u32 1, %s3735_s3   ;;  %s768_s5 = scalar_lea.vmem [#allocation5], %s3945_s11 }
  0xf1   : > { %s765_s0 = scalar_lea.sflag [#allocation6], %s764_s26 }
  0xf2   : > { %3520 = dma.done.wait (%p4376_p11), %s765_s0, 256  }
  0xf3   : > { %3522 = vsyncadd (%p4376_p11), %s765_s0, 4294967040  ;;  %s777_s15 = scalar_lea.vmem [#allocation7], %s3945_s11  ;;  %s783_s24 = scalar_lea.sflag [#allocation9], %s764_s26 }
  0xf4   : > { %s786_s13 = scalar_lea.vmem [#allocation8], %s3945_s11 }
  0xf5   : > { %3524 = dma.done.wait (%p4376_p11), %s783_s24, 128  }
  0xf6   : > { %3526 = vsyncadd (%p4376_p11), %s783_s24, 4294967168  ;;  %p4377_p8 = scmp.eq.s32.totalorder %s3735_s3, 0 }
  0xf8   : > { %3528 = dma.done.wait (%p4377_p8), [#allocation9], 16   ;;  %p4378_p7 = pmov %p4377_p8 }
  0xfa   : > { %3530 = vsyncadd (%p4378_p7), [#allocation9], 4294967280  ;;  %p4379_p5 = pmov %p4378_p7 }
  0xfc   : > { %3532 = dma.done.wait (%p4379_p5), [#allocation12], 32   ;;  %p4380_p9 = pmov %p4379_p5 }
  0xfd   : > { %p4381_p3 = pmov %p4379_p5 }
  0xfe   : > { %3534 = vsyncadd (%p4380_p9), [#allocation12], 4294967264 }
  0xff   : > { %3536 = dma.done.wait (%p4381_p3), [#allocation15], 32   ;;  %p4382_p6 = pmov %p4381_p3 }
 0x100   : > { %p4383_p1 = pmov %p4381_p3 }
 0x101   : > { %3538 = vsyncadd (%p4382_p6), [#allocation15], 4294967264 }
 0x102   : > { %3540 = dma.done.wait (%p4383_p1), [#allocation18], 32   ;;  %p4384_p12 = pmov %p4383_p1 }
 0x103   : > { %p4385_p0 = pmov %p4383_p1 }
 0x104   : > { %3542 = vsyncadd (%p4384_p12), [#allocation18], 4294967264 }
 0x105   : > { %3544 = dma.done.wait (%p4385_p0), [#allocation21], 32   ;;  %p4386_p4 = pmov %p4385_p0 }
 0x106   : > { %p4387_p13 = pmov %p4385_p0 }
 0x107   : > { %3546 = vsyncadd (%p4386_p4), [#allocation21], 4294967264 }
 0x108   : > { %3548 = dma.done.wait (%p4387_p13), [#allocation24], 16   ;;  %p4388_p2 = pmov %p4385_p0 }
 0x109   : > { %v3593_v0 = vmov 0.0   ;;  %vm3594_vm0 = vmmov 0   ;;  %s4389_s28 = sld [smem:[#allocation47_spill]]  ;;  %v898_v5 = vld [vmem:[%s759_s9] sm:$0xff]  ;;  %vm912_vm1 = vcmask 261120   ;;  %v989_v6 = vld [vmem:[%s4298_s6 + $0x18] sm:$0xff] }
 0x10a   : > { %3550 = vsyncadd (%p4388_p2), [#allocation24], 4294967280  ;;  %2751 = vmatprep.subr.mxu0 %v3593_v0  ;;  %2759 = vmatprep.mubr.msk.f32.mxu0 %vm3594_vm0, %v3593_v0  ;;  %v988_v7 = vld [vmem:[%s4298_s6 + $0x10] sm:$0xff]  ;;  %v987_v8 = vld [vmem:[%s4298_s6 + $0x8] sm:$0xff]  ;;  %vm1162_vm2 = vcmask 64512   ;;  %s3597_s9 = smov 104  }
 0x10b   : > { %2789 = vmatprep.subr.mxu1 %v3593_v0  ;;  %2791 = vmatprep.mubr.msk.f32.mxu1 %vm3594_vm0, %v3593_v0  ;;  %v986_v9 = vld [vmem:[%s4298_s6] sm:$0xff]  ;;  %v899_v10 = vld [vmem:[%s768_s5] sm:$0xff]  ;;  %v1071_v13 = vld [vmem:[%s4300_s8 + $0x8] sm:$0xff]  ;;  %s4390_s27 = sld [smem:[#allocation54_spill]]  ;;  %s2362_s5 = scalar_lea.sflag [#allocation4], %s3942_s7 }
 0x10c   : > { %v1073_v11 = vld [vmem:[%s4300_s8 + $0x18] sm:$0xff]  ;;  %v1072_v12 = vld [vmem:[%s4300_s8 + $0x10] sm:$0xff]  ;;  %v1070_v14 = vld [vmem:[%s4300_s8] sm:$0xff]  ;;  %s4391_s29 = sld [smem:[#allocation55_spill]]  ;;  %s3598_s30 = smov [#allocation25]  }
 0x10d   : > { %v4053_v15 = vld [vmem:[%s777_s15] sm:$0xff]  ;;  %s3595_s15 = smov 120   ;;  %v1159_v31 = vld [vmem:[%s786_s13] sm:$0xff]  ;;  %s3596_s13 = smov 112  }
 0x10e   : > { %v2656_v16 = vld [vmem:[#allocation10] ss:$0 sm:$0xff]  ;;  %v2658_v20 = vld [vmem:[#allocation11] ss:$0 sm:$0xff]  ;;  %v2660_v24 = vld [vmem:[#allocation13] ss:$0 sm:$0xff] }
 0x10f   : > { %v904_v1 = vld [vmem:[%s4389_s28 + $0x18] sm:$0xff]  ;;  %v903_v2 = vld [vmem:[%s4389_s28 + $0x10] sm:$0xff]  ;;  %v902_v3 = vld [vmem:[%s4389_s28 + $0x8] sm:$0xff]  ;;  %vm1160_vm3 = vcmp.eq.f32.partialorder %v1159_v31, 0.0  ;;  %s4392_s18 = sld [smem:[#allocation37_spill]]  ;;  %s3469_s20 = sshll.u32 %s3598_s30, 4  ;;  %s3470_s20 = int_to_ptr.vmem [resolvable:$false] %s3469_s20 }
 0x110   : > { %2752 = vmatpush3.msra.mxu0 %v904_v1  ;;  %v901_v4 = vld [vmem:[%s4389_s28] sm:$0xff]  ;;  %v4088_v32 = vsel %vm1160_vm3, -1e+20, %v3593_v0  ;;  %v1156_v54 = vld [vmem:[%s4302_s10 + $0x8] sm:$0xff]  ;;  %s4393_s21 = sld [smem:[#allocation40_spill]] }
 0x111   : > { %2753 = vmatprep.subr.mxu0 %v3593_v0  ;;  %v1155_v59 = vld [vmem:[%s4302_s10] sm:$0xff]  ;;  %s4394_s2 = sld [smem:[#allocation56_spill]] }
 0x112   : > { %2754 = vmatpush3.msra.mxu0 %v903_v2 }
 0x113   : > { %2755 = vmatprep.subr.mxu0 %v3593_v0 }
 0x114   : > { %2756 = vmatpush3.msra.mxu0 %v902_v3 }
 0x115   : > { %2757 = vmatprep.subr.mxu0 %v3593_v0  ;;  %s2687_s26 = sshll.u32 %s4392_s18, 7 }
 0x116   : > { %2758 = vmatpush3.msra.mxu0 %v901_v4  ;;  %p4396_p11 = scmp.ne.s32.totalorder %s4393_s21, 0 }
 0x117   : > { %2760 = vmatmul.mubr.msk.f32.vlgmr.msra.gmra.mxu0 %vm912_vm1, %v898_v5  ;;  %2762 = vmatprep.subr.mxu0 %v3593_v0  ;;  %s4395_s3 = smov %s4394_s2  ;;  %s2374_s1 = scalar_lea.hbm %s4394_s2, %s2687_s26 }
 0x118   : > { %2763 = vmatpush3.msra.mxu0 %v989_v6  ;;  %2770 = vmatprep.mubr.msk.f32.mxu0 %vm3594_vm0, %v3593_v0 }
 0x119   : > { %2764 = vmatprep.subr.mxu0 %v3593_v0 }
 0x11a   : > { %2765 = vmatpush3.msra.mxu0 %v988_v7 }
 0x11b   : > { %2766 = vmatprep.subr.mxu0 %v3593_v0 }
 0x11c   : > { %2767 = vmatpush3.msra.mxu0 %v987_v8 }
 0x11d   : > { %2768 = vmatprep.subr.mxu0 %v3593_v0 }
 0x11e   : > { %2769 = vmatpush3.msra.mxu0 %v986_v9 }
 0x11f   : > { %2771 = vmatmul.mubr.msk.f32.vlgmr.msra.gmra.mxu0 %vm912_vm1, %v899_v10  ;;  %2773 = vmatprep.subr.mxu0 %v3593_v0 }
 0x120   : > { %2774 = vmatpush3.msra.mxu0 %v1073_v11  ;;  %2781 = vmatprep.mubr.msk.f32.mxu0 %vm3594_vm0, %v3593_v0 }
 0x121   : > { %2775 = vmatprep.subr.mxu0 %v3593_v0 }
 0x122   : > { %2776 = vmatpush3.msra.mxu0 %v1072_v12 }
 0x123   : > { %2777 = vmatprep.subr.mxu0 %v3593_v0 }
 0x124   : > { %2778 = vmatpush3.msra.mxu0 %v1071_v13 }
 0x125   : > { %2779 = vmatprep.subr.mxu0 %v3593_v0 }
 0x126   : > { %2780 = vmatpush3.msra.mxu0 %v1070_v14 }
 0x127   : > { %2782 = vmatmul.mubr.msk.f32.vlgmr.msra.gmra.mxu0 %vm912_vm1, %v4053_v15  ;;  %2784 = vmatprep.subr.mxu0 %v3593_v0 }
 0x128   : > { %2786 = vmatprep.mubr.msk.f32.mxu0 %vm3594_vm0, %v3593_v0 }
 0x1d7   : > { %v982_v17 = vpop.f32.mrf.mxu0 }
 0x1d8   : > { %v4061_v18 = vadd.f32 %v2656_v16, %v982_v17 }
 0x1d9   : > { %v2761_v19 = vpop.f32.mrf.mxu0 }
 0x1da   : > { %2790 = vmatpush3.msra.mxu1 %v4061_v18 }
 0x1db   : > { %2799 = vmatprep.subr.mxu1 %v3593_v0 }
 0x1df   : > { %v1066_v21 = vpop.f32.mrf.mxu0 }
 0x1e0   : > { %v4065_v22 = vadd.f32 %v2658_v20, %v1066_v21 }
 0x1e1   : > { %v2772_v23 = vpop.f32.mrf.mxu0 }
 0x1e2   : > { %1325 = vrot.lane.b32.xlu0 %v4065_v22, %s3595_s15  ;;  %2785 = vmatpush3.xpose.msk.msra.mxu0 %vm1162_vm2, %v4065_v22 }
 0x1e3   : > { %2794 = vmatprep.subr.mxu0 %v3593_v0 }
 0x1e7   : > { %v1150_v25 = vpop.f32.mrf.mxu0 }
 0x1e8   : > { %v1151_v26 = vadd.f32 %v2660_v24, %v1150_v25 }
 0x1e9   : > { %v2783_v27 = vpop.f32.mrf.mxu0 }
 0x1ea   : > { %v4072_v28 = vmul.f32 0.17677669, %v1151_v26 }
 0x1ec   : > { %1323 = vrot.lane.b32.xlu0 %v4072_v28, %s3595_s15  ;;  %2787 = vmatmul.mubr.msk.f32.vlgmr.msra.gmra.mxu0 %vm1162_vm2, %v4072_v28 }
 0x1ed   : > { %2796 = vmatprep.mubr.msk.f32.mxu0 %vm3594_vm0, %v3593_v0 }
 0x254   : > { %v1326_v29 = vpop.permute.xlu0 %1325 }
 0x255   : > { %2795 = vmatpush3.xpose.msk.msra.mxu0 %vm1162_vm2, %v1326_v29 }
 0x256   : > { %2804 = vmatprep.subr.mxu0 %v3593_v0 }
 0x25e   : > { %v1324_v30 = vpop.permute.xlu0 %1323 }
 0x25f   : > { %2797 = vmatmul.mubr.msk.f32.vlgmr.msra.gmra.mxu0 %vm1162_vm2, %v1324_v30 }
 0x260   : > { %2806 = vmatprep.mubr.msk.f32.mxu0 %vm3594_vm0, %v3593_v0  ;;  %2805 = vmatpush3.msra.mxu0 %v1156_v54 }
 0x261   : > { %2814 = vmatprep.subr.mxu0 %v3593_v0 }
 0x2ac   : > { %v1235_v33 = vpop.f32.mrf.mxu0 }
 0x2ad   : > { %v1236_v34 = vadd.f32 %v1235_v33, %v4088_v32 }
 0x2ae   : > { %v2788_v35 = vpop.f32.mrf.mxu0 }
 0x2af   : > { %v1239_v36 = vsel %vm1162_vm2, %v1236_v34, -inf }
 0x2b0   : > { %1240 = vmax.xlane.f32.xlu1 %v1239_v36 }
 0x31f   : > { %v1397_v37 = vpop.f32.mrf.mxu0 }
 0x320   : > { %v1398_v38 = vadd.f32 %v1397_v37, %v4088_v32  ;;  %v1158_v37 = vld [vmem:[%s4302_s10 + $0x18] sm:$0xff] }
 0x321   : > { %v2798_v39 = vpop.f32.mrf.mxu0 }
 0x322   : > { %v1401_v40 = vsel %vm1162_vm2, %v1398_v38, -inf }
 0x323   : > { %1402 = vmax.xlane.f32.xlu1 %v1401_v40 }
 0x339   : > { %v1241_v41 = vpop.xlane.xlu1 %1240 }
 0x33a   : > { %v1242_v42 = vsub.f32 %v1236_v34, %v1241_v41 }
 0x33c   : > { %v1243_v43 = vmul.f32 1.442695, %v1242_v42 }
 0x33e   : > { %3073 = vpow2.f32 %v1243_v43 }
 0x34b   : > { %v3074_v44 = vpop.eup %3073 }
 0x34c   : > { %v1245_v45 = vsel %vm1162_vm2, %v3074_v44, 0.0 }
 0x34d   : > { %1246 = vadd.xlane.f32.xlu0 %v1245_v45 }
 0x363   : > { %1724 = vrot.lane.b32.xlu0 %v4061_v18, %s3596_s13 }
 0x3ac   : > { %v1403_v46 = vpop.xlane.xlu1 %1402 }
 0x3ad   : > { %v1404_v47 = vsub.f32 %v1398_v38, %v1403_v46 }
 0x3af   : > { %v1405_v48 = vmul.f32 1.442695, %v1404_v47  ;;  %v2678_v47 = vld [vmem:[#allocation14] ss:$0 sm:$0xff] }
 0x3b1   : > { %3075 = vpow2.f32 %v1405_v48 }
 0x3be   : > { %v3076_v49 = vpop.eup %3075 }
 0x3bf   : > { %v1407_v50 = vsel %vm1162_vm2, %v3076_v49, 0.0 }
 0x3c0   : > { %1408 = vadd.xlane.f32.xlu1 %v1407_v50 }
 0x3d1   : > { %1413 = vrot.lane.b32.xlu1 %v4061_v18, %s3595_s15 }
 0x3d5   : > { %1637 = vrot.lane.b32.xlu1 %v4065_v22, %s3596_s13 }
 0x3d6   : > { %v1247_v51 = vpop.xlane.xlu0 %1246 }
 0x3d7   : > { %3077 = vrcp.f32 %v1247_v51 }
 0x3d9   : > { %1635 = vrot.lane.b32.xlu1 %v4072_v28, %s3596_s13 }
 0x3da   : > { %v1725_v61 = vpop.permute.xlu0 %1724 }
 0x3e4   : > { %v3078_v52 = vpop.eup %3077 }
 0x3e5   : > { %v1249_v53 = vmul.f32 %v3078_v52, %v3074_v44 }
 0x3e7   : > { %2792 = vmatmul.mubr.msk.f32.vlgmr.msra.gmra.mxu1 %vm1162_vm2, %v1249_v53 }
 0x3e8   : > { %2801 = vmatprep.mubr.msk.f32.mxu1 %vm3594_vm0, %v3593_v0 }
 0x449   : > { %v1409_v55 = vpop.xlane.xlu1 %1408 }
 0x44a   : > { %3079 = vrcp.f32 %v1409_v55 }
 0x44d   : > { %v1414_v56 = vpop.permute.xlu1 %1413 }
 0x44e   : > { %2800 = vmatpush3.msra.mxu1 %v1414_v56 }
 0x44f   : > { %2809 = vmatprep.subr.mxu1 %v3593_v0 }
 0x451   : > { %v1638_v63 = vpop.permute.xlu1 %1637 }
 0x455   : > { %v1636_v3 = vpop.permute.xlu1 %1635 }
 0x457   : > { %v3080_v57 = vpop.eup %3079 }
 0x458   : > { %v1411_v58 = vmul.f32 %v3080_v57, %v3076_v49 }
 0x45a   : > { %2802 = vmatmul.mubr.msk.f32.vlgmr.msra.gmra.mxu1 %vm1162_vm2, %v1411_v58  ;;  %v2155_v58 = vld [vmem:[%s4390_s27 + $0x18] sm:$0xff] }
 0x45b   : > { %2810 = vmatpush3.msra.mxu1 %v1155_v59  ;;  %2811 = vmatprep.mubr.msk.f32.mxu1 %vm3594_vm0, %v3593_v0  ;;  %v2154_v59 = vld [vmem:[%s4390_s27 + $0x10] sm:$0xff] }
 0x45c   : > { %2819 = vmatprep.subr.mxu1 %v3593_v0 }
 0x4a7   : > { %v1319_v60 = vpop.f32.mrf.mxu1 }
 0x4a8   : > { %2812 = vmatmul.mubr.msk.f32.vlgmr.msra.gmra.mxu1 %vm1162_vm2, %v1319_v60  ;;  %v2152_v60 = vld [vmem:[%s4390_s27] sm:$0xff] }
 0x4a9   : > { %2820 = vmatpush3.msra.mxu1 %v1725_v61  ;;  %v2793_v62 = vpop.f32.mrf.mxu1  ;;  %2821 = vmatprep.mubr.msk.f32.mxu1 %vm3594_vm0, %v3593_v0  ;;  %v2252_v61 = vld [vmem:[%s4391_s29 + $0x78] sm:$0xff] }
 0x4aa   : > { %2829 = vmatprep.subr.mxu1 %v3593_v0  ;;  %v2251_v62 = vld [vmem:[%s4391_s29 + $0x70] sm:$0xff] }
 0x51a   : > { %v1485_v1 = vpop.f32.mrf.mxu1 }
 0x51b   : > { %2807 = vmatmul.mubr.msk.f32.vlgmr.msra.gmra.mxu0 %vm1162_vm2, %v1485_v1  ;;  %v2249_v1 = vld [vmem:[%s4391_s29 + $0x60] sm:$0xff] }
 0x51c   : > { %2815 = vmatpush3.xpose.msk.msra.mxu0 %vm1162_vm2, %v1638_v63  ;;  %v2803_v2 = vpop.f32.mrf.mxu1  ;;  %2816 = vmatprep.mubr.msk.f32.mxu0 %vm3594_vm0, %v3593_v0  ;;  %v2250_v63 = vld [vmem:[%s4391_s29 + $0x68] sm:$0xff] }
 0x51d   : > { %2824 = vmatprep.subr.mxu0 %v3593_v0  ;;  %v2248_v2 = vld [vmem:[%s4391_s29 + $0x58] sm:$0xff] }
 0x51f   : > { %2817 = vmatmul.mubr.msk.f32.vlgmr.msra.gmra.mxu0 %vm1162_vm2, %v1636_v3  ;;  %v2247_v3 = vld [vmem:[%s4391_s29 + $0x50] sm:$0xff] }
 0x520   : > { %2826 = vmatprep.mubr.msk.f32.mxu0 %vm3594_vm0, %v3593_v0 }
 0x568   : > { %v1631_v4 = vpop.f32.mrf.mxu1 }
 0x56a   : > { %v2813_v5 = vpop.f32.mrf.mxu1 }
 0x56b   : > { %v2245_v5 = vld [vmem:[%s4391_s29 + $0x40] sm:$0xff] }
 0x5db   : > { %v1558_v6 = vpop.f32.mrf.mxu0 }
 0x5dd   : > { %v2808_v7 = vpop.f32.mrf.mxu0 }
 0x5de   : > { %v2243_v7 = vld [vmem:[%s4391_s29 + $0x30] sm:$0xff] }
 0x5df   : > { %v1709_v8 = vpop.f32.mrf.mxu0 }
 0x5e0   : > { %v1710_v9 = vadd.f32 %v1709_v8, %v4088_v32  ;;  %v2242_v8 = vld [vmem:[%s4391_s29 + $0x28] sm:$0xff] }
 0x5e1   : > { %v2818_v10 = vpop.f32.mrf.mxu0 }
 0x5e2   : > { %v1713_v11 = vsel %vm1162_vm2, %v1710_v9, -inf  ;;  %v2240_v10 = vld [vmem:[%s4391_s29 + $0x18] sm:$0xff] }
 0x5e3   : > { %1714 = vmax.xlane.f32.xlu1 %v1713_v11 }
 0x66c   : > { %v1715_v12 = vpop.xlane.xlu1 %1714 }
 0x66d   : > { %v1716_v13 = vsub.f32 %v1710_v9, %v1715_v12  ;;  %v2241_v9 = vld [vmem:[%s4391_s29 + $0x20] sm:$0xff] }
 0x66f   : > { %v1717_v14 = vmul.f32 1.442695, %v1716_v13 }
 0x671   : > { %3081 = vpow2.f32 %v1717_v14 }
 0x67e   : > { %v3082_v16 = vpop.eup %3081 }
 0x67f   : > { %v1719_v17 = vsel %vm1162_vm2, %v3082_v16, 0.0 }
 0x680   : > { %1720 = vadd.xlane.f32.xlu0 %v1719_v17 }
 0x696   : > { %1876 = vrot.lane.b32.xlu0 %v4065_v22, %s3597_s9  ;;  %v1157_v22 = vld [vmem:[%s4302_s10 + $0x10] sm:$0xff] }
 0x697   : > { %2825 = vmatpush3.msra.mxu0 %v1157_v22  ;;  %v2237_v22 = vld [vmem:[%s4391_s29] sm:$0xff] }
 0x698   : > { %2834 = vmatprep.subr.mxu0 %v3593_v0 }
 0x69a   : > { %1874 = vrot.lane.b32.xlu0 %v4072_v28, %s3597_s9 }
 0x709   : > { %v1721_v19 = vpop.xlane.xlu0 %1720 }
 0x70a   : > { %3083 = vrcp.f32 %v1721_v19  ;;  %v2680_v19 = vld [vmem:[#allocation17] ss:$0 sm:$0xff] }
 0x70d   : > { %v1877_v21 = vpop.permute.xlu0 %1876 }
 0x711   : > { %v1875_v24 = vpop.permute.xlu0 %1874 }
 0x717   : > { %v3084_v20 = vpop.eup %3083 }
 0x718   : > { %v1723_v23 = vmul.f32 %v3084_v20, %v3082_v16  ;;  %v2679_v16 = vld [vmem:[#allocation16] ss:$0 sm:$0xff] }
 0x71a   : > { %2822 = vmatmul.mubr.msk.f32.vlgmr.msra.gmra.mxu1 %vm1162_vm2, %v1723_v23  ;;  %v2239_v23 = vld [vmem:[%s4391_s29 + $0x10] sm:$0xff] }
 0x71b   : > { %2830 = vmatpush3.xpose.msk.msra.mxu1 %vm1162_vm2, %v1877_v21  ;;  %2831 = vmatprep.mubr.msk.f32.mxu1 %vm3594_vm0, %v3593_v0 }
 0x71c   : > { %2839 = vmatprep.subr.mxu1 %v3593_v0 }
 0x71e   : > { %2832 = vmatmul.mubr.msk.f32.vlgmr.msra.gmra.mxu1 %vm1162_vm2, %v1875_v24  ;;  %v2238_v24 = vld [vmem:[%s4391_s29 + $0x8] sm:$0xff] }
 0x71f   : > { %2841 = vmatprep.mubr.msk.f32.mxu1 %vm3594_vm0, %v3593_v0  ;;  %2840 = vmatpush3.msra.mxu1 %v1158_v37 }
 0x720   : > { %2855 = vmatprep.subr.mxu1 %v3593_v0 }
 0x7da   : > { %v1796_v25 = vpop.f32.mrf.mxu1 }
 0x7db   : > { %2827 = vmatmul.mubr.msk.f32.vlgmr.msra.gmra.mxu0 %vm1162_vm2, %v1796_v25  ;;  %v2681_v25 = vld [vmem:[#allocation22] ss:$0 sm:$0xff] }
 0x7dc   : > { %v2823_v26 = vpop.f32.mrf.mxu1  ;;  %2836 = vmatprep.mubr.msk.f32.mxu0 %vm3594_vm0, %v3593_v0 }
 0x7de   : > { %v1948_v27 = vpop.f32.mrf.mxu1 }
 0x7df   : > { %v1949_v28 = vadd.f32 %v1948_v27, %v4088_v32  ;;  %v1632_v32 = vadd.f32 %v1631_v4, %v1558_v6  ;;  %v2246_v4 = vld [vmem:[%s4391_s29 + $0x48] sm:$0xff]  ;;  %v2244_v6 = vld [vmem:[%s4391_s29 + $0x38] sm:$0xff] }
 0x7e0   : > { %v2833_v29 = vpop.f32.mrf.mxu1 }
 0x7e1   : > { %v1952_v30 = vsel %vm1162_vm2, %v1949_v28, -inf }
 0x7e2   : > { %1953 = vmax.xlane.f32.xlu0 %v1952_v30  ;;  %v2683_v30 = vld [vmem:[#allocation23] ss:$0 sm:$0xff] }
 0x86b   : > { %v1954_v31 = vpop.xlane.xlu0 %1953 }
 0x86c   : > { %v1955_v33 = vsub.f32 %v1949_v28, %v1954_v31 }
 0x86e   : > { %v1956_v34 = vmul.f32 1.442695, %v1955_v33 }
 0x870   : > { %3085 = vpow2.f32 %v1956_v34 }
 0x87d   : > { %v3086_v35 = vpop.eup %3085 }
 0x87e   : > { %v1958_v36 = vsel %vm1162_vm2, %v3086_v35, 0.0 }
 0x87f   : > { %1959 = vadd.xlane.f32.xlu1 %v1958_v36 }
 0x890   : > { %1963 = vrot.lane.b32.xlu1 %v4061_v18, %s3597_s9  ;;  %s897_s9 = scalar_lea.vmem [#allocation25], %s3945_s11  ;;  %s3471_s11 = scalar_lea.vmem %s3470_s20, 256 }
 0x891   : > { %s2376_s0 = sshll.u32 %s897_s9, 4  ;;  %s2377_s0 = int_to_ptr.vmem [resolvable:$true] %s2376_s0 }
 0x892   : > { %s3465_s16 = scalar_lea.vmem %s2377_s0, 128  ;;  %p3472_p5 = scmp.lt.s32.totalorder %s2377_s0, %s3470_s20 }
 0x893   : > { %p3466_p10 = scmp.ne.s32.totalorder %s2377_s0, %s3465_s16  ;;  %p3473_p9 = scmp.lt.s32.totalorder %s3471_s11, %s3465_s16 }
 0x895   : > { %p3467_p8 = pnand %p3466_p10, %p4396_p11  ;;  %p3474_p3 = por %p3473_p9, %p3472_p5 }
 0x897   : > { %p3468_p7 = pneg %p3467_p8 }
 0x899   : > { %p3475_p6 = pnand %p3474_p3, %p3468_p7 }
 0x89b   : > { %v1869_v38 = vpop.f32.mrf.mxu0 }
 0x89c   : > { %v1873_v39 = vadd.f32 %v1869_v38, %v1632_v32 }
 0x89d   : > { %v2828_v40 = vpop.f32.mrf.mxu0 }
 0x908   : > { %v1960_v41 = vpop.xlane.xlu1 %1959 }
 0x909   : > { %3087 = vrcp.f32 %v1960_v41 }
 0x90c   : > { %v1964_v42 = vpop.permute.xlu1 %1963 }
 0x90d   : > { %2835 = vmatpush3.msra.mxu0 %v1964_v42 }
 0x90e   : > { %2844 = vmatprep.subr.mxu0 %v3593_v0 }
 0x916   : > { %v3088_v43 = vpop.eup %3087 }
 0x917   : > { %v1962_v44 = vmul.f32 %v3088_v43, %v3086_v35 }
 0x919   : > { %2837 = vmatmul.mubr.msk.f32.vlgmr.msra.gmra.mxu0 %vm1162_vm2, %v1962_v44  ;;  %v2684_v44 = vld [vmem:[#allocation19] ss:$0 sm:$0xff] }
 0x91a   : > { %2852 = vmatprep.mubr.msk.f32.mxu0 %vm3594_vm0, %v3593_v0  ;;  %2845 = vmatpush3.msra.mxu0 %v2155_v58 }
 0x91b   : > { %2846 = vmatprep.subr.mxu0 %v3593_v0 }
 0x91c   : > { %2847 = vmatpush3.msra.mxu0 %v2154_v59 }
 0x91d   : > { %2848 = vmatprep.subr.mxu0 %v3593_v0 }
 0x9d9   : > { %v2035_v18 = vpop.f32.mrf.mxu0 }
 0x9da   : > { %2842 = vmatmul.mubr.msk.f32.vlgmr.msra.gmra.mxu1 %vm1162_vm2, %v2035_v18 }
 0x9db   : > { %v2838_v45 = vpop.f32.mrf.mxu0  ;;  %2887 = vmatprep.mubr.msk.f32.mxu1 %vm3594_vm0, %v3593_v0  ;;  %2856 = vmatpush3.msra.mxu1 %v2252_v61 }
 0x9dc   : > { %2857 = vmatprep.subr.mxu1 %v3593_v0  ;;  %v2685_v45 = vld [vmem:[#allocation20] ss:$0 sm:$0xff] }
 0x9dd   : > { %2858 = vmatpush3.msra.mxu1 %v2251_v62 }
 0x9de   : > { %2859 = vmatprep.subr.mxu1 %v3593_v0 }
 0x9df   : > { %2860 = vmatpush3.msra.mxu1 %v2250_v63 }
 0x9e0   : > { %2861 = vmatprep.subr.mxu1 %v3593_v0 }
 0x9e1   : > { %2862 = vmatpush3.msra.mxu1 %v2249_v1 }
 0x9e2   : > { %2863 = vmatprep.subr.mxu1 %v3593_v0 }
 0x9e3   : > { %2864 = vmatpush3.msra.mxu1 %v2248_v2 }
 0x9e4   : > { %2865 = vmatprep.subr.mxu1 %v3593_v0 }
 0x9e5   : > { %2866 = vmatpush3.msra.mxu1 %v2247_v3 }
 0x9e6   : > { %2867 = vmatprep.subr.mxu1 %v3593_v0 }
 0x9e7   : > { %2868 = vmatpush3.msra.mxu1 %v2246_v4 }
 0x9e8   : > { %2869 = vmatprep.subr.mxu1 %v3593_v0 }
 0x9e9   : > { %2870 = vmatpush3.msra.mxu1 %v2245_v5 }
 0x9ea   : > { %2871 = vmatprep.subr.mxu1 %v3593_v0 }
 0x9eb   : > { %2872 = vmatpush3.msra.mxu1 %v2244_v6 }
 0x9ec   : > { %2873 = vmatprep.subr.mxu1 %v3593_v0 }
 0x9ed   : > { %2874 = vmatpush3.msra.mxu1 %v2243_v7 }
 0x9ee   : > { %2875 = vmatprep.subr.mxu1 %v3593_v0 }
 0x9ef   : > { %2876 = vmatpush3.msra.mxu1 %v2242_v8 }
 0x9f0   : > { %2877 = vmatprep.subr.mxu1 %v3593_v0 }
 0x9f1   : > { %2878 = vmatpush3.msra.mxu1 %v2241_v9 }
 0x9f2   : > { %2879 = vmatprep.subr.mxu1 %v3593_v0 }
 0x9f3   : > { %2880 = vmatpush3.msra.mxu1 %v2240_v10 }
 0x9f4   : > { %2881 = vmatprep.subr.mxu1 %v3593_v0 }
 0x9f5   : > { %2882 = vmatpush3.msra.mxu1 %v2239_v23 }
 0x9f6   : > { %2883 = vmatprep.subr.mxu1 %v3593_v0 }
 0x9f7   : > { %2884 = vmatpush3.msra.mxu1 %v2238_v24 }
 0x9f8   : > { %2885 = vmatprep.subr.mxu1 %v3593_v0 }
 0x9f9   : > { %2886 = vmatpush3.msra.mxu1 %v2237_v22 }
 0xa9a   : > { %v2108_v46 = vpop.f32.mrf.mxu1 }
 0xa9b   : > { %v2112_v48 = vadd.f32 %v2108_v46, %v1873_v39 }
 0xa9c   : > { %v2843_v49 = vpop.f32.mrf.mxu1 }
 0xa9d   : > { %v2120_v50 = vadd.f32 %v2678_v47, %v2112_v48 }
 0xa9f   : > { %v2121_v51 = vadd.f32 %v2120_v50, %v4053_v15  ;;  %v2153_v15 = vld [vmem:[%s4390_s27 + $0x8] sm:$0xff] }
 0xaa0   : > { %2849 = vmatpush3.msra.mxu0 %v2153_v15 }
 0xaa1   : > { %v2124_v52 = vsel %vm912_vm1, %v2121_v51, 0.0  ;;  %2850 = vmatprep.subr.mxu0 %v3593_v0 }
 0xaa2   : > { %2125 = vadd.xlane.f32.xlu1 %v2124_v52  ;;  %2851 = vmatpush3.msra.mxu0 %v2152_v60 }
 0xb2b   : > { %v2126_v53 = vpop.xlane.xlu1 %2125 }
 0xb2c   : > { %v2128_v54 = vmul.f32 0.03125, %v2126_v53 }
 0xb2e   : > { %v2129_v55 = vsub.f32 %v2121_v51, %v2128_v54 }
 0xb30   : > { %v2130_v56 = vmul.f32 %v2129_v55, %v2129_v55 }
 0xb32   : > { %v2131_v57 = vsel %vm912_vm1, %v2130_v56, 0.0 }
 0xb33   : > { %2132 = vadd.xlane.f32.xlu0 %v2131_v57 }
 0xbbc   : > { %v2133_v11 = vpop.xlane.xlu0 %2132 }
 0xbbd   : > { %v2134_v12 = vmul.f32 0.03125, %v2133_v11 }
 0xbbf   : > { %v2135_v13 = vadd.f32 1e-05, %v2134_v12 }
 0xbc1   : > { %3089 = vrsqrt.f32 %v2135_v13 }
 0xbce   : > { %v3090_v14 = vpop.eup %3089 }
 0xbcf   : > { %v2137_v17 = vmul.f32 %v3090_v14, %v2129_v55 }
 0xbd1   : > { %v2144_v20 = vmul.f32 %v2679_v16, %v2137_v17 }
 0xbd3   : > { %v2151_v21 = vadd.f32 %v2680_v19, %v2144_v20 }
 0xbd5   : > { %2853 = vmatmul.mubr.msk.f32.vlgmr.msra.gmra.mxu0 %vm912_vm1, %v2151_v21 }
 0xc95   : > { %v2232_v26 = vpop.f32.mrf.mxu0 }
 0xc96   : > { %v2233_v27 = vadd.f32 %v2681_v25, %v2232_v26 }
 0xc97   : > { %v2854_v28 = vpop.f32.mrf.mxu0 }
 0xc98   : > { %v2236_v29 = vmax.f32 %v2233_v27, 0.0 }
 0xc9a   : > { %2888 = vmatmul.mubr.f32.vlgmr.msra.gmra.mxu1 %v2236_v29 }
 0xd5a   : > { %v2326_v31 = vpop.f32.mrf.mxu1 }
 0xd5b   : > { %v2327_v33 = vadd.f32 %v2683_v30, %v2326_v31 }
 0xd5c   : > { %v2889_v34 = vpop.f32.mrf.mxu1 }
 0xd5d   : > { %v2330_v35 = vadd.f32 %v2327_v33, %v2151_v21 }
 0xd5f   : > { %v2333_v36 = vsel %vm912_vm1, %v2330_v35, 0.0 }
 0xd60   : > { %2334 = vadd.xlane.f32.xlu0 %v2333_v36 }
 0xde9   : > { %v2335_v37 = vpop.xlane.xlu0 %2334 }
 0xdea   : > { %v2336_v32 = vmul.f32 0.03125, %v2335_v37 }
 0xdec   : > { %v2337_v0 = vsub.f32 %v2330_v35, %v2336_v32 }
 0xdee   : > { %v2338_v38 = vmul.f32 %v2337_v0, %v2337_v0 }
 0xdf0   : > { %v2339_v39 = vsel %vm912_vm1, %v2338_v38, 0.0 }
 0xdf1   : > { %2340 = vadd.xlane.f32.xlu0 %v2339_v39 }
 0xe7a   : > { %v2341_v40 = vpop.xlane.xlu0 %2340 }
 0xe7b   : > { %v2342_v41 = vmul.f32 0.03125, %v2341_v40 }
 0xe7d   : > { %v2343_v42 = vadd.f32 1e-05, %v2342_v41 }
 0xe7f   : > { %3091 = vrsqrt.f32 %v2343_v42 }
 0xe8c   : > { %v3092_v43 = vpop.eup %3091 }
 0xe8d   : > { %v2345_v18 = vmul.f32 %v3092_v43, %v2337_v0 }
 0xe8f   : > { %v2352_v46 = vmul.f32 %v2684_v44, %v2345_v18 }
 0xe91   : > { %v2359_v47 = vadd.f32 %v2685_v45, %v2352_v46 }
 0xe93   : > { %2360 = vst.msk [vmem:[%s897_s9] sm:$0xff] %vm912_vm1, %v2359_v47 }
 0xe94   : > { %3478 = shalt.err (!%p3475_p6)
}
 0xe95   : > { %s3479_s15 = scalar_lea.hbm %s2374_s1, 128  ;;  %s3483_s18 = scalar_lea.hbm %s4395_s3, 256 }
 0xe96   : > { %p3480_p1 = scmp.ne.s32.totalorder %s2374_s1, %s3479_s15  ;;  %p3484_p4 = scmp.lt.s32.totalorder %s2374_s1, %s4395_s3 }
 0xe97   : > { %p3485_p13 = scmp.lt.s32.totalorder %s3483_s18, %s3479_s15 }
 0xe98   : > { %p3481_p12 = pnand %p3480_p1, %p4396_p11 }
 0xe99   : > { %p3486_p2 = por %p3485_p13, %p3484_p4 }
 0xe9a   : > { %p3482_p0 = pneg %p3481_p12 }
 0xe9c   : > { %p3487_p10 = pnand %p3486_p2, %p3482_p0 }
 0xe9e   : > { %3490 = shalt.err (!%p3487_p10)
}
 0xe9f   : > { %2938 = dma.vmem_to_hbm [thread:$0]  (%p4396_p11), %s2377_s0, 128, %s2374_s1, %s2362_s5  }
 0xea0 PF: > { %s4397_s24 = sld [smem:[#allocation36_spill]]  ;;  %p4400_p7 = scmp.ge.s32.totalorder %s3577_s25, 2 }
 0xea1   : > { %s4398_s4 = sld [smem:[#allocation42_spill]] }
 0xea6   : > { %s2388_s2 = sand.u32 1, %s4397_s24  }
 0xea7   : > { %p4399_p8 = scmp.ne.s32.totalorder %s4398_s4, 0  ;;  %s2389_s16 = scalar_lea.sflag [#allocation4], %s2388_s2 }
 0xea9   : > { %p2985_p5 = pnand %p4400_p7, %p4399_p8 }
 0xeab   : > { %p2986_p9 = pneg %p2985_p5 }
 0xead   : > { %3552 = dma.done.wait (%p2986_p9), %s2389_s16, 128  }
 0xeae   : > { %3554 = vsyncadd (%p2986_p9), %s2389_s16, 4294967168  ;;  %s47_s25 = sadd.s32 1, %s3577_s25   ;;  %s4401_s30 = sld [smem:[#allocation41_spill]] }
 0xeaf   : > { %p44_p3 = scmp.ge.s32.totalorder %s47_s25, 4   ;;  %s4402_s24 = sld [smem:[#allocation38_spill]] }
 0xeb0   : > { %s4403_s2 = sld [smem:[#allocation39_spill]]  ;;  %s4404_s1 = smov %s3561_s22 }
 0xeb1   : > { %s4405_s22 = smov %s3565_s23  ;;  %46 = sbr.rel (!%p44_p3) target bundleno = 30 (0x1e), region = 222 }
 0xeb4   : > { %s4406_s23 = smov %s4401_s30 }
 0xeb6   :  { %2394 = vsyncpa [#allocation3], 1 }
 0xeb7   :  { %2396 = vsyncpa [#allocation3 + $0x1], 1 }
 0xeb8   :  { %2397 = vsyncpa [#allocation6], 1 }
 0xeb9   :  { %2399 = vsyncpa [#allocation6 + $0x1], 1 }
 0xeba   :  { %2400 = vsyncpa [#allocation9], 1 }
 0xebb   :  { %2402 = vsyncpa [#allocation9 + $0x1], 1 }
 0xebc   :  { %2403 = vsyncpa [#allocation12], 1 }
 0xebd   :  { %2404 = vsyncpa [#allocation15], 1 }
 0xebe   :  { %2405 = vsyncpa [#allocation18], 1 }
 0xebf   :  { %2406 = vsyncpa [#allocation21], 1 }
 0xec0   :  { %2407 = vsyncpa [#allocation24], 1 }
 0xec1   :  { %2408 = vsyncpa [#allocation4], 1 }
 0xec2   :  { %2410 = vsyncpa [#allocation4 + $0x1], 1 }

// kernel: tpu_custom_call.1
= control target key start
LH: loop header
LB: loop body
LE: loop exit
PB: predicated region body
PF: predicated region fallthrough
CT: control target
= control target key end

     0   :  { %s4292_s0 = inlined_call_operand.hbm [shape: f32[2,8,32], index: 0, kind: input, shape index: {}]   ;;  %s4293_s1 = inlined_call_operand.hbm [shape: f32[2,8,32], index: 1, kind: input, shape index: {}]   ;;  %s4294_s2 = inlined_call_operand.hbm [shape: f32[2,8,32], index: 2, kind: input, shape index: {}]   ;;  %s4295_s3 = inlined_call_operand.hbm [shape: f32[2,8,8], index: 3, kind: input, shape index: {}]   ;;  %s4296_s4 = inlined_call_operand.vmem [shape: f32[32,32], index: 4, kind: input, shape index: {}]   ;;  %s4297_s5 = inlined_call_operand.hbm [shape: f32[1,32], index: 5, kind: input, shape index: {}]   ;;  %s4298_s6 = inlined_call_operand.vmem [shape: f32[32,32], index: 6, kind: input, shape index: {}]   ;;  %s4299_s7 = inlined_call_operand.hbm [shape: f32[1,32], index: 7, kind: input, shape index: {}]   ;;  %s4300_s8 = inlined_call_operand.vmem [shape: f32[32,32], index: 8, kind: input, shape index: {}]   ;;  %s4301_s9 = inlined_call_operand.hbm [shape: f32[1,32], index: 9, kind: input, shape index: {}]   ;;  %s4302_s10 = inlined_call_operand.vmem [shape: f32[32,32], index: 10, kind: input, shape index: {}]   ;;  %s4303_s11 = inlined_call_operand.hbm [shape: f32[1,32], index: 11, kind: input, shape index: {}]   ;;  %s4304_s12 = inlined_call_operand.hbm [shape: f32[1,32], index: 12, kind: input, shape index: {}]   ;;  %s4305_s13 = inlined_call_operand.hbm [shape: f32[1,32], index: 13, kind: input, shape index: {}]   ;;  %s4306_s14 = inlined_call_operand.hbm [shape: f32[1,32], index: 14, kind: input, shape index: {}]   ;;  %s4307_s15 = inlined_call_operand.hbm [shape: f32[1,32], index: 15, kind: input, shape index: {}]   ;;  %s4308_s16 = inlined_call_operand.vmem [shape: f32[32,128], index: 16, kind: input, shape index: {}]   ;;  %s4309_s17 = inlined_call_operand.hbm [shape: f32[1,128], index: 17, kind: input, shape index: {}]   ;;  %s4310_s18 = inlined_call_operand.vmem [shape: f32[128,32], index: 18, kind: input, shape index: {}]   ;;  %s4311_s19 = inlined_call_operand.hbm [shape: f32[1,32], index: 19, kind: input, shape index: {}]   ;;  %s4312_s20 = inlined_call_operand.hbm [shape: f32[2,8,32], index: 20, kind: output, shape index: {}]  }
   0x1   :  { %4330 = sst [smem:[#allocation43_spill]] %s4292_s0 }
   0x2   :  { %4331 = sst [smem:[#allocation44_spill]] %s4293_s1 }
   0x3   :  { %4332 = sst [smem:[#allocation45_spill]] %s4294_s2 }
   0x4   :  { %4333 = sst [smem:[#allocation46_spill]] %s4295_s3 }
   0x5   :  { %4334 = sst [smem:[#allocation47_spill]] %s4296_s4 }
   0x6   :  { %4335 = sst [smem:[#allocation48_spill]] %s4297_s5 }
   0x7   :  { %4336 = sst [smem:[#allocation49_spill]] %s4299_s7 }
   0x8   :  { %4337 = sst [smem:[#allocation50_spill]] %s4301_s9 }
   0x9   :  { %4338 = sst [smem:[#allocation51_spill]] %s4303_s11 }
   0xa   :  { %4339 = sst [smem:[#allocation52_spill]] %s4305_s13 }
   0xb   :  { %4340 = sst [smem:[#allocation53_spill]] %s4307_s15 }
   0xc   :  { %4341 = sst [smem:[#allocation54_spill]] %s4308_s16 }
   0xd   :  { %4342 = sst [smem:[#allocation55_spill]] %s4310_s18 }
   0xe   :  { %4343 = sst [smem:[#allocation56_spill]] %s4312_s20 }
   0xf   :  { %25 = vsyncpa [#allocation3], 0 }
  0x10   :  { %27 = vsyncpa [#allocation3 + $0x1], 0 }
  0x11   :  { %28 = vsyncpa [#allocation6], 0 }
  0x12   :  { %30 = vsyncpa [#allocation6 + $0x1], 0 }
  0x13   :  { %31 = vsyncpa [#allocation9], 0 }
  0x14   :  { %33 = vsyncpa [#allocation9 + $0x1], 0 }
  0x15   :  { %34 = vsyncpa [#allocation12], 0 }
  0x16   :  { %35 = vsyncpa [#allocation15], 0 }
  0x17   :  { %36 = vsyncpa [#allocation18], 0 }
  0x18   :  { %37 = vsyncpa [#allocation21], 0 }
  0x19   :  { %38 = vsyncpa [#allocation24], 0 }
  0x1a   :  { %39 = vsyncpa [#allocation4], 0 }
  0x1b   :  { %41 = vsyncpa [#allocation4 + $0x1], 0  ;;  %s3704_s1 = smov 0   ;;  %s3706_s22 = smov 0  }
  0x1c   :  { %s3708_s23 = smov 0   ;;  %s3710_s24 = smov 0  }
  0x1d   :  { %s3712_s2 = smov 0   ;;  %s3714_s25 = smov 0  }
  0x1e LB: > { %4344 = sst [smem:[#allocation36_spill]] %s3557_s1  ;;  %s3735_s3 = sadd.s32 4294967295, %s3577_s25   ;;  %s3577_s25 = sphi %s3714_s25, %s47_s25   ;;  %s3573_s2 = sphi %s3712_s2, %s4403_s2   ;;  %s3569_s24 = sphi %s3710_s24, %s4402_s24   ;;  %s3565_s23 = sphi %s3708_s23, %s4406_s23   ;;  %s3561_s22 = sphi %s3706_s22, %s4405_s22   ;;  %s3557_s1 = sphi %s3704_s1, %s4404_s1  }
  0x1f   : > { %4345 = sst [smem:[#allocation37_spill]] %s3569_s24  ;;  %p2620_p0 = scmp.ge.s32.totalorder %s3577_s25, 1 }
  0x20   : > { %4346 = sst [smem:[#allocation38_spill]] %s3573_s2  ;;  %p4317_p1 = scmp.eq.s32.totalorder %s3735_s3, 0 }
  0x21   : > { %p536_p2 = scmp.lt.s32.totalorder %s3577_s25, 3  ;;  %s3579_s27 = smov [#allocation10]  }
  0x22   : > { %s552_s28 = sshll.u32 %s3579_s27, 4  ;;  %s3580_s4 = smov [#allocation11]   ;;  %s553_s28 = int_to_ptr.vmem [resolvable:$true] %s552_s28 }
  0x23   : > { %p3740_p3 = pnand %p2620_p0, %p536_p2  ;;  %s566_s29 = sshll.u32 %s3580_s4, 4  ;;  %s567_s29 = int_to_ptr.vmem [resolvable:$true] %s566_s29 }
  0x24   : > { %s3581_s0 = smov [#allocation14]   ;;  %s3104_s20 = scalar_lea.vmem %s553_s28, 16 }
  0x25   : > { %s4347_s26 = scalar_select %p3740_p3, 1, 0 }
  0x26   : > { %p2940_p5 = pneg %p3740_p3  ;;  %s594_s21 = sshll.u32 %s3581_s0, 4  ;;  %s3753_s21 = int_to_ptr.vmem [resolvable:$true] %s594_s21 }
  0x27   : > { %p3105_p8 = scmp.ne.s32.totalorder %s553_s28, %s3104_s20  ;;  %s3111_s4 = scalar_lea.vmem %s553_s28, 32 }
  0x28   : > { %p3749_p6 = pnand %p2940_p5, %p4317_p1  ;;  %p3112_p11 = scmp.lt.s32.totalorder %s553_s28, %s553_s28 }
  0x29   : > { %p3113_p12 = scmp.lt.s32.totalorder %s3111_s4, %s3104_s20 }
  0x2a   : > { %p3757_p7 = pneg %p3749_p6 }
  0x2b   : > { %p3114_p13 = por %p3113_p12, %p3112_p11 }
  0x2c   : > { %p3107_p9 = pnand %p3105_p8, %p3757_p7 }
  0x2e   : > { %p3108_p10 = pneg %p3107_p9 }
  0x30   : > { %p3115_p0 = pnand %p3114_p13, %p3108_p10 }
  0x32   : > { %3118 = shalt.err (!%p3115_p0)
}
  0x33   : > { %s4350_s5 = sld [smem:[#allocation48_spill]]  ;;  %s3130_s18 = scalar_lea.vmem %s567_s29, 16 }
  0x34   : > { %p3131_p2 = scmp.ne.s32.totalorder %s567_s29, %s3130_s18  ;;  %s3137_s16 = scalar_lea.vmem %s567_s29, 32 }
  0x35   : > { %p3138_p8 = scmp.lt.s32.totalorder %s567_s29, %s567_s29  ;;  %p3139_p9 = scmp.lt.s32.totalorder %s3137_s16, %s3130_s18 }
  0x36   : > { %p3133_p5 = pnand %p3131_p2, %p3757_p7 }
  0x37   : > { %p3140_p1 = por %p3139_p9, %p3138_p8 }
  0x38   : > { %p3134_p4 = pneg %p3133_p5 }
  0x39   : > { %2943 = dma.hbm_to_vmem [thread:$0]  (!%p3749_p6), %s4350_s5, 16, %s553_s28, [#allocation9]  }
  0x3a   : > { %p3141_p3 = pnand %p3140_p1, %p3134_p4 }
  0x3c   : > { %3144 = shalt.err (!%p3141_p3)
}
  0x3d   : > { %s4351_s7 = sld [smem:[#allocation49_spill]]  ;;  %s3156_s24 = scalar_lea.vmem %s3753_s21, 16 }
  0x3e   : > { %p3157_p10 = scmp.ne.s32.totalorder %s3753_s21, %s3156_s24  ;;  %s3163_s16 = scalar_lea.vmem %s3753_s21, 32 }
  0x3f   : > { %p3164_p1 = scmp.lt.s32.totalorder %s3753_s21, %s3753_s21  ;;  %p3165_p3 = scmp.lt.s32.totalorder %s3163_s16, %s3156_s24 }
  0x40   : > { %p3159_p11 = pnand %p3157_p10, %p3757_p7 }
  0x41   : > { %p3166_p4 = por %p3165_p3, %p3164_p1 }
  0x42   : > { %p3160_p12 = pneg %p3159_p11 }
  0x43   : > { %2946 = dma.hbm_to_vmem [thread:$0]  (!%p3749_p6), %s4351_s7, 16, %s567_s29, [#allocation12]  }
  0x44   : > { %p3167_p13 = pnand %p3166_p4, %p3160_p12 }
  0x46   : > { %3170 = shalt.err (!%p3167_p13)
}
  0x47   : > { %s4352_s11 = sld [smem:[#allocation51_spill]]  ;;  %s3582_s29 = smov [#allocation17]  }
  0x48   : > { %s616_s0 = sshll.u32 %s3582_s29, 4  ;;  %s3583_s20 = smov [#allocation20]   ;;  %s617_s0 = int_to_ptr.vmem [resolvable:$true] %s616_s0 }
  0x49   : > { %s638_s4 = sshll.u32 %s3583_s20, 4  ;;  %s3182_s5 = scalar_lea.vmem %s617_s0, 16  ;;  %s639_s4 = int_to_ptr.vmem [resolvable:$true] %s638_s4 }
  0x4a   : > { %p3183_p0 = scmp.ne.s32.totalorder %s617_s0, %s3182_s5  ;;  %s3189_s24 = scalar_lea.vmem %s617_s0, 32 }
  0x4b   : > { %p3190_p8 = scmp.lt.s32.totalorder %s617_s0, %s617_s0  ;;  %p3191_p9 = scmp.lt.s32.totalorder %s3189_s24, %s3182_s5 }
  0x4c   : > { %p3185_p2 = pnand %p3183_p0, %p3757_p7 }
  0x4d   : > { %2952 = dma.hbm_to_vmem [thread:$0]  (!%p3749_p6), %s4352_s11, 16, %s3753_s21, [#allocation15]  }
  0x4e   : > { %p3186_p5 = pneg %p3185_p2  ;;  %p3192_p10 = por %p3191_p9, %p3190_p8 }
  0x50   : > { %p3193_p11 = pnand %p3192_p10, %p3186_p5 }
  0x52   : > { %3196 = shalt.err (!%p3193_p11)
}
  0x53   : > { %s4353_s13 = sld [smem:[#allocation52_spill]]  ;;  %s3208_s18 = scalar_lea.vmem %s639_s4, 16 }
  0x54   : > { %p3209_p12 = scmp.ne.s32.totalorder %s639_s4, %s3208_s18  ;;  %s3215_s28 = scalar_lea.vmem %s639_s4, 32 }
  0x55   : > { %p3216_p4 = scmp.lt.s32.totalorder %s639_s4, %s639_s4  ;;  %p3217_p13 = scmp.lt.s32.totalorder %s3215_s28, %s3208_s18 }
  0x56   : > { %p3211_p1 = pnand %p3209_p12, %p3757_p7 }
  0x57   : > { %p3218_p0 = por %p3217_p13, %p3216_p4 }
  0x58   : > { %p3212_p3 = pneg %p3211_p1 }
  0x59   : > { %2958 = dma.hbm_to_vmem [thread:$0]  (!%p3749_p6), %s4353_s13, 16, %s617_s0, [#allocation18]  }
  0x5a   : > { %p3219_p2 = pnand %p3218_p0, %p3212_p3 }
  0x5c   : > { %3222 = shalt.err (!%p3219_p2)
}
  0x5d   : > { %s4354_s15 = sld [smem:[#allocation53_spill]]  ;;  %s2619_s0 = sadd.s32 4294967294, %s3577_s25  }
  0x5e   : > { %s59_s20 = sadd.s32 1, %s3573_s2  ;;  %s66_s24 = sadd.s32 1, %s3565_s23 }
  0x5f   : > { %p61_p5 = scmp.ge.s32.totalorder %s59_s20, 2  ;;  %p73_p8 = scmp.ne.s32.totalorder %s3565_s23, %s3561_s22 }
  0x60   : > { %p74_p9 = scmp.eq.s32.totalorder %s3577_s25, 0  ;;  %p79_p10 = scmp.ne.s32.totalorder %s3561_s22, %s3557_s1 }
  0x61   : > { %s4408_s20 = smov (%p61_p5, %s59_s20), 0  ;;  %p4357_p12 = scmp.eq.s32.totalorder %s3735_s3, 0 }
  0x62   : > { %4355 = sst [smem:[#allocation39_spill]] %s4408_s20  ;;  %p3812_p11 = por %p74_p9, %p73_p8 }
  0x63   : > { %2964 = dma.hbm_to_vmem [thread:$0]  (!%p3749_p6), %s4354_s15, 16, %s639_s4, [#allocation21]  }
  0x64   : > { %p3818_p1 = por %p4357_p12, %p79_p10  ;;  %s63_s21 = ssub.s32 %s3573_s2, %s4408_s20 }
  0x65   : > { %p523_p3 = scmp.eq.s32.totalorder %s3735_s3, 1  ;;  %p64_p4 = scmp.eq.s32.totalorder %s63_s21, 0 }
  0x66   : > { %s4358_s4 = scalar_select %p3818_p1, 1, 0 }
  0x67   : > { %p529_p13 = scmp.eq.s32.totalorder %s2619_s0, 1  ;;  %p3825_p0 = por %p523_p3, %p73_p8 }
  0x68   : > { %p2998_p2 = scmp.lt.s32.totalorder %s3577_s25, 2  ;;  %s4321_s29 = sand.u32 1, %s3565_s23  }
  0x69   : > { %s4359_s18 = scalar_select %p3825_p0, 1, 0 }
  0x6a   : > { %s3831_s28 = scalar_select %p64_p4, %s3565_s23, %s66_s24  }
  0x6b   : > { %4360 = sst [smem:[#allocation40_spill]] %s4359_s18  ;;  %p3833_p5 = por %p529_p13, %p79_p10 }
  0x6c   : > { %4361 = sst [smem:[#allocation41_spill]] %s3831_s28  ;;  %s3840_s7 = sshll.u32 %s4321_s29, 3 }
  0x6d   : > { %s4362_s5 = scalar_select %p3833_p5, 1, 0 }
  0x6e   : > { %s3843_s11 = sshll.u32 %s3573_s2, 7  ;;  %p3847_p8 = pnand %p2998_p2, %p3812_p11 }
  0x6f   : > { %4363 = sst [smem:[#allocation42_spill]] %s4362_s5  ;;  %s4326_s24 = sand.u32 1, %s3577_s25  }
  0x70   : > { %s4365_s15 = sld [smem:[#allocation44_spill]]  ;;  %s699_s28 = scalar_lea.vmem [#allocation5], %s3840_s7 }
  0x71   : > { %s706_s5 = sshll.u32 %s699_s28, 4  ;;  %s3859_s29 = scalar_lea.sflag [#allocation6], %s4326_s24  ;;  %s707_s5 = int_to_ptr.vmem [resolvable:$true] %s706_s5 }
  0x72   : > { %p4327_p9 = pneg %p3847_p8  ;;  %s3236_s16 = scalar_lea.vmem %s707_s5, 128 }
  0x73   : > { %p3237_p10 = scmp.ne.s32.totalorder %s707_s5, %s3236_s16  ;;  %s3584_s2 = smov [#allocation5]  }
  0x74   : > { %s3241_s1 = sshll.u32 %s3584_s2, 4  ;;  %s3242_s1 = int_to_ptr.vmem [resolvable:$false] %s3241_s1 }
  0x75   : > { %p3239_p11 = pnand %p3237_p10, %p4327_p9  ;;  %s3243_s18 = scalar_lea.vmem %s3242_s1, 256 }
  0x76   : > { %s704_s20 = scalar_lea.hbm %s4365_s15, %s3843_s11  ;;  %p3244_p3 = scmp.lt.s32.totalorder %s707_s5, %s3242_s1 }
  0x77   : > { %p3240_p12 = pneg %p3239_p11  ;;  %p3245_p4 = scmp.lt.s32.totalorder %s3243_s18, %s3236_s16 }
  0x79   : > { %p3246_p13 = por %p3245_p4, %p3244_p3 }
  0x7b   : > { %p3247_p2 = pnand %p3246_p13, %p3240_p12 }
  0x7d   : > { %3250 = shalt.err (!%p3247_p2)
}
  0x7e   : > { %2977 = dma.hbm_to_vmem [thread:$0]  (!%p3847_p8), %s704_s20, 128, %s707_s5, %s3859_s29  }
  0x7f   : > { %s3585_s13 = smov [#allocation13]   ;;  %s3586_s28 = smov [#allocation16]  }
  0x80   : > { %s580_s15 = sshll.u32 %s3585_s13, 4  ;;  %s605_s21 = sshll.u32 %s3586_s28, 4  ;;  %s581_s15 = int_to_ptr.vmem [resolvable:$true] %s580_s15  ;;  %s606_s21 = int_to_ptr.vmem [resolvable:$true] %s605_s21 }
  0x81   : > { %s3262_s24 = scalar_lea.vmem %s581_s15, 16  ;;  %s3269_s1 = scalar_lea.vmem %s581_s15, 32 }
  0x82   : > { %p3263_p10 = scmp.ne.s32.totalorder %s581_s15, %s3262_s24  ;;  %p3270_p5 = scmp.lt.s32.totalorder %s581_s15, %s581_s15 }
  0x83   : > { %p3271_p3 = scmp.lt.s32.totalorder %s3269_s1, %s3262_s24 }
  0x84   : > { %p3265_p11 = pnand %p3263_p10, %p3757_p7 }
  0x85   : > { %p3272_p12 = por %p3271_p3, %p3270_p5 }
  0x86   : > { %p3266_p9 = pneg %p3265_p11 }
  0x88   : > { %p3273_p4 = pnand %p3272_p12, %p3266_p9 }
  0x8a   : > { %3276 = shalt.err (!%p3273_p4)
}
  0x8b   : > { %s4366_s9 = sld [smem:[#allocation50_spill]]  ;;  %s3288_s18 = scalar_lea.vmem %s606_s21, 16 }
  0x8c   : > { %p3289_p13 = scmp.ne.s32.totalorder %s606_s21, %s3288_s18  ;;  %s3295_s5 = scalar_lea.vmem %s606_s21, 32 }
  0x8d   : > { %p3296_p11 = scmp.lt.s32.totalorder %s606_s21, %s606_s21  ;;  %p3297_p0 = scmp.lt.s32.totalorder %s3295_s5, %s3288_s18 }
  0x8e   : > { %p3291_p2 = pnand %p3289_p13, %p3757_p7 }
  0x8f   : > { %p3298_p1 = por %p3297_p0, %p3296_p11 }
  0x90   : > { %p3292_p10 = pneg %p3291_p2 }
  0x91   : > { %2949 = dma.hbm_to_vmem [thread:$0]  (!%p3749_p6), %s4366_s9, 16, %s581_s15, [#allocation12]  }
  0x92   : > { %p3299_p5 = pnand %p3298_p1, %p3292_p10 }
  0x94   : > { %3302 = shalt.err (!%p3299_p5)
}
  0x95   : > { %2955 = dma.hbm_to_vmem [thread:$0]  (!%p3749_p6), %s4304_s12, 16, %s606_s21, [#allocation15]  }
  0x96   : > { %s3587_s13 = smov [#allocation19]   ;;  %s3588_s28 = smov [#allocation22]  }
  0x97   : > { %s627_s15 = sshll.u32 %s3587_s13, 4  ;;  %s652_s1 = sshll.u32 %s3588_s28, 4  ;;  %s628_s15 = int_to_ptr.vmem [resolvable:$true] %s627_s15  ;;  %s653_s1 = int_to_ptr.vmem [resolvable:$true] %s652_s1 }
  0x98   : > { %s3314_s2 = scalar_lea.vmem %s628_s15, 16  ;;  %s3321_s20 = scalar_lea.vmem %s628_s15, 32 }
  0x99   : > { %p3315_p9 = scmp.ne.s32.totalorder %s628_s15, %s3314_s2  ;;  %p3322_p1 = scmp.lt.s32.totalorder %s628_s15, %s628_s15 }
  0x9a   : > { %p3323_p0 = scmp.lt.s32.totalorder %s3321_s20, %s3314_s2 }
  0x9b   : > { %p3317_p3 = pnand %p3315_p9, %p3757_p7 }
  0x9c   : > { %p3324_p4 = por %p3323_p0, %p3322_p1 }
  0x9d   : > { %p3318_p12 = pneg %p3317_p3 }
  0x9f   : > { %p3325_p13 = pnand %p3324_p4, %p3318_p12 }
  0xa1   : > { %3328 = shalt.err (!%p3325_p13)
}
  0xa2   : > { %2961 = dma.hbm_to_vmem [thread:$0]  (!%p3749_p6), %s4306_s14, 16, %s628_s15, [#allocation18]  }
  0xa3   : > { %s3340_s5 = scalar_lea.vmem %s653_s1, 16  ;;  %s3347_s24 = scalar_lea.vmem %s653_s1, 32 }
  0xa4   : > { %p3341_p2 = scmp.ne.s32.totalorder %s653_s1, %s3340_s5  ;;  %p3348_p5 = scmp.lt.s32.totalorder %s653_s1, %s653_s1 }
  0xa5   : > { %p3349_p9 = scmp.lt.s32.totalorder %s3347_s24, %s3340_s5 }
  0xa6   : > { %p3343_p10 = pnand %p3341_p2, %p3757_p7 }
  0xa7   : > { %p3350_p3 = por %p3349_p9, %p3348_p5 }
  0xa8   : > { %p3344_p11 = pneg %p3343_p10 }
  0xaa   : > { %p3351_p1 = pnand %p3350_p3, %p3344_p11 }
  0xac   : > { %3354 = shalt.err (!%p3351_p1)
}
  0xad   : > { %2967 = dma.hbm_to_vmem [thread:$0]  (!%p3749_p6), %s4309_s17, 16, %s653_s1, [#allocation21]  }
  0xae   : > { %s3589_s15 = smov [#allocation23]  }
  0xaf   : > { %s666_s28 = sshll.u32 %s3589_s15, 4  ;;  %s667_s28 = int_to_ptr.vmem [resolvable:$true] %s666_s28 }
  0xb0   : > { %s3366_s2 = scalar_lea.vmem %s667_s28, 16  ;;  %s3373_s20 = scalar_lea.vmem %s667_s28, 32 }
  0xb1   : > { %p3367_p12 = scmp.ne.s32.totalorder %s667_s28, %s3366_s2  ;;  %p3374_p13 = scmp.lt.s32.totalorder %s667_s28, %s667_s28 }
  0xb2   : > { %p3375_p2 = scmp.lt.s32.totalorder %s3373_s20, %s3366_s2 }
  0xb3   : > { %p3369_p0 = pnand %p3367_p12, %p3757_p7 }
  0xb4   : > { %p3376_p10 = por %p3375_p2, %p3374_p13 }
  0xb5   : > { %p3370_p4 = pneg %p3369_p0 }
  0xb7   : > { %p3377_p11 = pnand %p3376_p10, %p3370_p4 }
  0xb9   : > { %3380 = shalt.err (!%p3377_p11)
}
  0xba   : > { %2970 = dma.hbm_to_vmem [thread:$0]  (!%p3749_p6), %s4311_s19, 16, %s667_s28, [#allocation24]  }
  0xbb   : > { %s4367_s5 = sld [smem:[#allocation43_spill]]  ;;  %s681_s16 = scalar_lea.vmem [#allocation2], %s3840_s7 }
  0xbc   : > { %s688_s13 = sshll.u32 %s681_s16, 4  ;;  %s4368_s15 = sand.u32 1, %s3565_s23   ;;  %s689_s13 = int_to_ptr.vmem [resolvable:$true] %s688_s13 }
  0xbd   : > { %s678_s2 = scalar_lea.sflag [#allocation3], %s4368_s15  ;;  %s3394_s20 = scalar_lea.vmem %s689_s13, 128 }
  0xbe   : > { %p3395_p7 = scmp.ne.s32.totalorder %s689_s13, %s3394_s20  ;;  %p4369_p5 = pneg %p3847_p8 }
  0xbf   : > { %s3590_s30 = smov [#allocation2]  }
  0xc0   : > { %p3397_p9 = pnand %p3395_p7, %p4369_p5  ;;  %s3399_s18 = sshll.u32 %s3590_s30, 4  ;;  %s3400_s18 = int_to_ptr.vmem [resolvable:$false] %s3399_s18 }
  0xc1   : > { %s686_s24 = scalar_lea.hbm %s4367_s5, %s3843_s11  ;;  %s3401_s21 = scalar_lea.vmem %s3400_s18, 256 }
  0xc2   : > { %p3398_p3 = pneg %p3397_p9  ;;  %p3402_p6 = scmp.lt.s32.totalorder %s689_s13, %s3400_s18 }
  0xc3   : > { %p3403_p1 = scmp.lt.s32.totalorder %s3401_s21, %s3394_s20 }
  0xc5   : > { %p3404_p12 = por %p3403_p1, %p3402_p6 }
  0xc7   : > { %p3405_p0 = pnand %p3404_p12, %p3398_p3 }
  0xc9   : > { %3408 = shalt.err (!%p3405_p0)
}
  0xca   : > { %2974 = dma.hbm_to_vmem [thread:$0]  (!%p3847_p8), %s686_s24, 128, %s689_s13, %s678_s2  }
  0xcb   : > { %s4370_s27 = sld [smem:[#allocation45_spill]]  ;;  %s717_s16 = scalar_lea.vmem [#allocation7], %s3840_s7 }
  0xcc   : > { %s725_s15 = sshll.u32 %s717_s16, 4  ;;  %p4371_p13 = pmov %p4369_p5  ;;  %s726_s15 = int_to_ptr.vmem [resolvable:$true] %s725_s15 }
  0xcd   : > { %s3422_s30 = scalar_lea.vmem %s726_s15, 128  ;;  %s3591_s20 = smov [#allocation7]  }
  0xce   : > { %p3423_p4 = scmp.ne.s32.totalorder %s726_s15, %s3422_s30  ;;  %s3427_s18 = sshll.u32 %s3591_s20, 4  ;;  %s3428_s18 = int_to_ptr.vmem [resolvable:$false] %s3427_s18 }
  0xcf   : > { %s3429_s21 = scalar_lea.vmem %s3428_s18, 256  ;;  %p3430_p11 = scmp.lt.s32.totalorder %s726_s15, %s3428_s18 }
  0xd0   : > { %p3425_p2 = pnand %p3423_p4, %p4371_p13  ;;  %p3431_p7 = scmp.lt.s32.totalorder %s3429_s21, %s3422_s30 }
  0xd1   : > { %s723_s5 = scalar_lea.hbm %s4370_s27, %s3843_s11 }
  0xd2   : > { %p3426_p10 = pneg %p3425_p2  ;;  %p3432_p5 = por %p3431_p7, %p3430_p11 }
  0xd4   : > { %p3433_p9 = pnand %p3432_p5, %p3426_p10 }
  0xd6   : > { %3436 = shalt.err (!%p3433_p9)
}
  0xd7   : > { %2980 = dma.hbm_to_vmem [thread:$0]  (!%p3847_p8), %s723_s5, 128, %s726_s15, %s3859_s29  }
  0xd8   : > { %s4372_s2 = sld [smem:[#allocation46_spill]]  ;;  %s736_s1 = scalar_lea.vmem [#allocation8], %s3840_s7 }
  0xd9   : > { %s744_s27 = sshll.u32 %s736_s1, 4  ;;  %s4373_s16 = sand.u32 1, %s3577_s25   ;;  %s745_s27 = int_to_ptr.vmem [resolvable:$true] %s744_s27 }
  0xda   : > { %s733_s30 = scalar_lea.sflag [#allocation9], %s4373_s16  ;;  %s3450_s20 = scalar_lea.vmem %s745_s27, 128 }
  0xdb   : > { %p3451_p3 = scmp.ne.s32.totalorder %s745_s27, %s3450_s20  ;;  %p4374_p6 = pmov %p4371_p13 }
  0xdc   : > { %s3592_s18 = smov [#allocation8]  }
  0xdd   : > { %p3453_p1 = pnand %p3451_p3, %p4374_p6  ;;  %s3455_s21 = sshll.u32 %s3592_s18, 4  ;;  %s3456_s21 = int_to_ptr.vmem [resolvable:$false] %s3455_s21 }
  0xde   : > { %s742_s28 = scalar_lea.hbm %s4372_s2, %s3843_s11  ;;  %s3457_s9 = scalar_lea.vmem %s3456_s21, 256 }
  0xdf   : > { %p3454_p12 = pneg %p3453_p1  ;;  %p3458_p0 = scmp.lt.s32.totalorder %s745_s27, %s3456_s21 }
  0xe0   : > { %p3459_p4 = scmp.lt.s32.totalorder %s3457_s9, %s3450_s20 }
  0xe2   : > { %p3460_p13 = por %p3459_p4, %p3458_p0 }
  0xe4   : > { %p3461_p2 = pnand %p3460_p13, %p3454_p12 }
  0xe6   : > { %3464 = shalt.err (!%p3461_p2)
}
  0xe7   : > { %2983 = dma.hbm_to_vmem [thread:$0]  (!%p3847_p8), %s742_s28, 128, %s745_s27, %s733_s30  }
  0xe8   : > { %p4375_p10 = scmp.ne.s32.totalorder %s4347_s26, 0 }
  0xe9   : > { %s3942_s7 = sand.u32 (!%p4375_p10), 1, %s3561_s22   ;;  %p4376_p11 = scmp.ne.s32.totalorder (!%p4375_p10), %s4358_s4, 0 }
  0xea   : > { %753 = sbr.rel (%p4375_p10) target bundleno = 3744 (0xea0), region = 100  ;;  %s3945_s11 = sshll.u32 (!%p4375_p10), %s3942_s7, 3 }
  0xeb   : > { %s756_s29 = scalar_lea.sflag (!%p4375_p10), [#allocation3], %s3942_s7  ;;  %s759_s9 = scalar_lea.vmem (!%p4375_p10), [#allocation2], %s3945_s11 }
  0xef   : > { %3516 = dma.done.wait (%p4376_p11), %s756_s29, 128  }
  0xf0   : > { %3518 = vsyncadd (%p4376_p11), %s756_s29, 4294967168  ;;  %s764_s26 = sand.u32 1, %s3735_s3   ;;  %s768_s5 = scalar_lea.vmem [#allocation5], %s3945_s11 }
  0xf1   : > { %s765_s0 = scalar_lea.sflag [#allocation6], %s764_s26 }
  0xf2   : > { %3520 = dma.done.wait (%p4376_p11), %s765_s0, 256  }
  0xf3   : > { %3522 = vsyncadd (%p4376_p11), %s765_s0, 4294967040  ;;  %s777_s15 = scalar_lea.vmem [#allocation7], %s3945_s11  ;;  %s783_s24 = scalar_lea.sflag [#allocation9], %s764_s26 }
  0xf4   : > { %s786_s13 = scalar_lea.vmem [#allocation8], %s3945_s11 }
  0xf5   : > { %3524 = dma.done.wait (%p4376_p11), %s783_s24, 128  }
  0xf6   : > { %3526 = vsyncadd (%p4376_p11), %s783_s24, 4294967168  ;;  %p4377_p8 = scmp.eq.s32.totalorder %s3735_s3, 0 }
  0xf8   : > { %3528 = dma.done.wait (%p4377_p8), [#allocation9], 16   ;;  %p4378_p7 = pmov %p4377_p8 }
  0xfa   : > { %3530 = vsyncadd (%p4378_p7), [#allocation9], 4294967280  ;;  %p4379_p5 = pmov %p4378_p7 }
  0xfc   : > { %3532 = dma.done.wait (%p4379_p5), [#allocation12], 32   ;;  %p4380_p9 = pmov %p4379_p5 }
  0xfd   : > { %p4381_p3 = pmov %p4379_p5 }
  0xfe   : > { %3534 = vsyncadd (%p4380_p9), [#allocation12], 4294967264 }
  0xff   : > { %3536 = dma.done.wait (%p4381_p3), [#allocation15], 32   ;;  %p4382_p6 = pmov %p4381_p3 }
 0x100   : > { %p4383_p1 = pmov %p4381_p3 }
 0x101   : > { %3538 = vsyncadd (%p4382_p6), [#allocation15], 4294967264 }
 0x102   : > { %3540 = dma.done.wait (%p4383_p1), [#allocation18], 32   ;;  %p4384_p12 = pmov %p4383_p1 }
 0x103   : > { %p4385_p0 = pmov %p4383_p1 }
 0x104   : > { %3542 = vsyncadd (%p4384_p12), [#allocation18], 4294967264 }
 0x105   : > { %3544 = dma.done.wait (%p4385_p0), [#allocation21], 32   ;;  %p4386_p4 = pmov %p4385_p0 }
 0x106   : > { %p4387_p13 = pmov %p4385_p0 }
 0x107   : > { %3546 = vsyncadd (%p4386_p4), [#allocation21], 4294967264 }
 0x108   : > { %3548 = dma.done.wait (%p4387_p13), [#allocation24], 16   ;;  %p4388_p2 = pmov %p4385_p0 }
 0x109   : > { %v3593_v0 = vmov 0.0   ;;  %vm3594_vm0 = vmmov 0   ;;  %s4389_s28 = sld [smem:[#allocation47_spill]]  ;;  %v898_v5 = vld [vmem:[%s759_s9] sm:$0xff]  ;;  %vm912_vm1 = vcmask 261120   ;;  %v989_v6 = vld [vmem:[%s4298_s6 + $0x18] sm:$0xff] }
 0x10a   : > { %3550 = vsyncadd (%p4388_p2), [#allocation24], 4294967280  ;;  %2751 = vmatprep.subr.mxu0 %v3593_v0  ;;  %2759 = vmatprep.mubr.msk.f32.mxu0 %vm3594_vm0, %v3593_v0  ;;  %v988_v7 = vld [vmem:[%s4298_s6 + $0x10] sm:$0xff]  ;;  %v987_v8 = vld [vmem:[%s4298_s6 + $0x8] sm:$0xff]  ;;  %vm1162_vm2 = vcmask 64512   ;;  %s3597_s9 = smov 104  }
 0x10b   : > { %2789 = vmatprep.subr.mxu1 %v3593_v0  ;;  %2791 = vmatprep.mubr.msk.f32.mxu1 %vm3594_vm0, %v3593_v0  ;;  %v986_v9 = vld [vmem:[%s4298_s6] sm:$0xff]  ;;  %v899_v10 = vld [vmem:[%s768_s5] sm:$0xff]  ;;  %v1071_v13 = vld [vmem:[%s4300_s8 + $0x8] sm:$0xff]  ;;  %s4390_s27 = sld [smem:[#allocation54_spill]]  ;;  %s2362_s5 = scalar_lea.sflag [#allocation4], %s3942_s7 }
 0x10c   : > { %v1073_v11 = vld [vmem:[%s4300_s8 + $0x18] sm:$0xff]  ;;  %v1072_v12 = vld [vmem:[%s4300_s8 + $0x10] sm:$0xff]  ;;  %v1070_v14 = vld [vmem:[%s4300_s8] sm:$0xff]  ;;  %s4391_s29 = sld [smem:[#allocation55_spill]]  ;;  %s3598_s30 = smov [#allocation25]  }
 0x10d   : > { %v4053_v15 = vld [vmem:[%s777_s15] sm:$0xff]  ;;  %s3595_s15 = smov 120   ;;  %v1159_v31 = vld [vmem:[%s786_s13] sm:$0xff]  ;;  %s3596_s13 = smov 112  }
 0x10e   : > { %v2656_v16 = vld [vmem:[#allocation10] ss:$0 sm:$0xff]  ;;  %v2658_v20 = vld [vmem:[#allocation11] ss:$0 sm:$0xff]  ;;  %v2660_v24 = vld [vmem:[#allocation13] ss:$0 sm:$0xff] }
 0x10f   : > { %v904_v1 = vld [vmem:[%s4389_s28 + $0x18] sm:$0xff]  ;;  %v903_v2 = vld [vmem:[%s4389_s28 + $0x10] sm:$0xff]  ;;  %v902_v3 = vld [vmem:[%s4389_s28 + $0x8] sm:$0xff]  ;;  %vm1160_vm3 = vcmp.eq.f32.partialorder %v1159_v31, 0.0  ;;  %s4392_s18 = sld [smem:[#allocation37_spill]]  ;;  %s3469_s20 = sshll.u32 %s3598_s30, 4  ;;  %s3470_s20 = int_to_ptr.vmem [resolvable:$false] %s3469_s20 }
 0x110   : > { %2752 = vmatpush3.msra.mxu0 %v904_v1  ;;  %v901_v4 = vld [vmem:[%s4389_s28] sm:$0xff]  ;;  %v4088_v32 = vsel %vm1160_vm3, -1e+20, %v3593_v0  ;;  %v1156_v54 = vld [vmem:[%s4302_s10 + $0x8] sm:$0xff]  ;;  %s4393_s21 = sld [smem:[#allocation40_spill]] }
 0x111   : > { %2753 = vmatprep.subr.mxu0 %v3593_v0  ;;  %v1155_v59 = vld [vmem:[%s4302_s10] sm:$0xff]  ;;  %s4394_s2 = sld [smem:[#allocation56_spill]] }
 0x112   : > { %2754 = vmatpush3.msra.mxu0 %v903_v2 }
 0x113   : > { %2755 = vmatprep.subr.mxu0 %v3593_v0 }
 0x114   : > { %2756 = vmatpush3.msra.mxu0 %v902_v3 }
 0x115   : > { %2757 = vmatprep.subr.mxu0 %v3593_v0  ;;  %s2687_s26 = sshll.u32 %s4392_s18, 7 }
 0x116   : > { %2758 = vmatpush3.msra.mxu0 %v901_v4  ;;  %p4396_p11 = scmp.ne.s32.totalorder %s4393_s21, 0 }
 0x117   : > { %2760 = vmatmul.mubr.msk.f32.vlgmr.msra.gmra.mxu0 %vm912_vm1, %v898_v5  ;;  %2762 = vmatprep.subr.mxu0 %v3593_v0  ;;  %s4395_s3 = smov %s4394_s2  ;;  %s2374_s1 = scalar_lea.hbm %s4394_s2, %s2687_s26 }
 0x118   : > { %2763 = vmatpush3.msra.mxu0 %v989_v6  ;;  %2770 = vmatprep.mubr.msk.f32.mxu0 %vm3594_vm0, %v3593_v0 }
 0x119   : > { %2764 = vmatprep.subr.mxu0 %v3593_v0 }
 0x11a   : > { %2765 = vmatpush3.msra.mxu0 %v988_v7 }
 0x11b   : > { %2766 = vmatprep.subr.mxu0 %v3593_v0 }
 0x11c   : > { %2767 = vmatpush3.msra.mxu0 %v987_v8 }
 0x11d   : > { %2768 = vmatprep.subr.mxu0 %v3593_v0 }
 0x11e   : > { %2769 = vmatpush3.msra.mxu0 %v986_v9 }
 0x11f   : > { %2771 = vmatmul.mubr.msk.f32.vlgmr.msra.gmra.mxu0 %vm912_vm1, %v899_v10  ;;  %2773 = vmatprep.subr.mxu0 %v3593_v0 }
 0x120   : > { %2774 = vmatpush3.msra.mxu0 %v1073_v11  ;;  %2781 = vmatprep.mubr.msk.f32.mxu0 %vm3594_vm0, %v3593_v0 }
 0x121   : > { %2775 = vmatprep.subr.mxu0 %v3593_v0 }
 0x122   : > { %2776 = vmatpush3.msra.mxu0 %v1072_v12 }
 0x123   : > { %2777 = vmatprep.subr.mxu0 %v3593_v0 }
 0x124   : > { %2778 = vmatpush3.msra.mxu0 %v1071_v13 }
 0x125   : > { %2779 = vmatprep.subr.mxu0 %v3593_v0 }
 0x126   : > { %2780 = vmatpush3.msra.mxu0 %v1070_v14 }
 0x127   : > { %2782 = vmatmul.mubr.msk.f32.vlgmr.msra.gmra.mxu0 %vm912_vm1, %v4053_v15  ;;  %2784 = vmatprep.subr.mxu0 %v3593_v0 }
 0x128   : > { %2786 = vmatprep.mubr.msk.f32.mxu0 %vm3594_vm0, %v3593_v0 }
 0x1d7   : > { %v982_v17 = vpop.f32.mrf.mxu0 }
 0x1d8   : > { %v4061_v18 = vadd.f32 %v2656_v16, %v982_v17 }
 0x1d9   : > { %v2761_v19 = vpop.f32.mrf.mxu0 }
 0x1da   : > { %2790 = vmatpush3.msra.mxu1 %v4061_v18 }
 0x1db   : > { %2799 = vmatprep.subr.mxu1 %v3593_v0 }
 0x1df   : > { %v1066_v21 = vpop.f32.mrf.mxu0 }
 0x1e0   : > { %v4065_v22 = vadd.f32 %v2658_v20, %v1066_v21 }
 0x1e1   : > { %v2772_v23 = vpop.f32.mrf.mxu0 }
 0x1e2   : > { %1325 = vrot.lane.b32.xlu0 %v4065_v22, %s3595_s15  ;;  %2785 = vmatpush3.xpose.msk.msra.mxu0 %vm1162_vm2, %v4065_v22 }
 0x1e3   : > { %2794 = vmatprep.subr.mxu0 %v3593_v0 }
 0x1e7   : > { %v1150_v25 = vpop.f32.mrf.mxu0 }
 0x1e8   : > { %v1151_v26 = vadd.f32 %v2660_v24, %v1150_v25 }
 0x1e9   : > { %v2783_v27 = vpop.f32.mrf.mxu0 }
 0x1ea   : > { %v4072_v28 = vmul.f32 0.17677669, %v1151_v26 }
 0x1ec   : > { %1323 = vrot.lane.b32.xlu0 %v4072_v28, %s3595_s15  ;;  %2787 = vmatmul.mubr.msk.f32.vlgmr.msra.gmra.mxu0 %vm1162_vm2, %v4072_v28 }
 0x1ed   : > { %2796 = vmatprep.mubr.msk.f32.mxu0 %vm3594_vm0, %v3593_v0 }
 0x254   : > { %v1326_v29 = vpop.permute.xlu0 %1325 }
 0x255   : > { %2795 = vmatpush3.xpose.msk.msra.mxu0 %vm1162_vm2, %v1326_v29 }
 0x256   : > { %2804 = vmatprep.subr.mxu0 %v3593_v0 }
 0x25e   : > { %v1324_v30 = vpop.permute.xlu0 %1323 }
 0x25f   : > { %2797 = vmatmul.mubr.msk.f32.vlgmr.msra.gmra.mxu0 %vm1162_vm2, %v1324_v30 }
 0x260   : > { %2806 = vmatprep.mubr.msk.f32.mxu0 %vm3594_vm0, %v3593_v0  ;;  %2805 = vmatpush3.msra.mxu0 %v1156_v54 }
 0x261   : > { %2814 = vmatprep.subr.mxu0 %v3593_v0 }
 0x2ac   : > { %v1235_v33 = vpop.f32.mrf.mxu0 }
 0x2ad   : > { %v1236_v34 = vadd.f32 %v1235_v33, %v4088_v32 }
 0x2ae   : > { %v2788_v35 = vpop.f32.mrf.mxu0 }
 0x2af   : > { %v1239_v36 = vsel %vm1162_vm2, %v1236_v34, -inf }
 0x2b0   : > { %1240 = vmax.xlane.f32.xlu1 %v1239_v36 }
 0x31f   : > { %v1397_v37 = vpop.f32.mrf.mxu0 }
 0x320   : > { %v1398_v38 = vadd.f32 %v1397_v37, %v4088_v32  ;;  %v1158_v37 = vld [vmem:[%s4302_s10 + $0x18] sm:$0xff] }
 0x321   : > { %v2798_v39 = vpop.f32.mrf.mxu0 }
 0x322   : > { %v1401_v40 = vsel %vm1162_vm2, %v1398_v38, -inf }
 0x323   : > { %1402 = vmax.xlane.f32.xlu1 %v1401_v40 }
 0x339   : > { %v1241_v41 = vpop.xlane.xlu1 %1240 }
 0x33a   : > { %v1242_v42 = vsub.f32 %v1236_v34, %v1241_v41 }
 0x33c   : > { %v1243_v43 = vmul.f32 1.442695, %v1242_v42 }
 0x33e   : > { %3073 = vpow2.f32 %v1243_v43 }
 0x34b   : > { %v3074_v44 = vpop.eup %3073 }
 0x34c   : > { %v1245_v45 = vsel %vm1162_vm2, %v3074_v44, 0.0 }
 0x34d   : > { %1246 = vadd.xlane.f32.xlu0 %v1245_v45 }
 0x363   : > { %1724 = vrot.lane.b32.xlu0 %v4061_v18, %s3596_s13 }
 0x3ac   : > { %v1403_v46 = vpop.xlane.xlu1 %1402 }
 0x3ad   : > { %v1404_v47 = vsub.f32 %v1398_v38, %v1403_v46 }
 0x3af   : > { %v1405_v48 = vmul.f32 1.442695, %v1404_v47  ;;  %v2678_v47 = vld [vmem:[#allocation14] ss:$0 sm:$0xff] }
 0x3b1   : > { %3075 = vpow2.f32 %v1405_v48 }
 0x3be   : > { %v3076_v49 = vpop.eup %3075 }
 0x3bf   : > { %v1407_v50 = vsel %vm1162_vm2, %v3076_v49, 0.0 }
 0x3c0   : > { %1408 = vadd.xlane.f32.xlu1 %v1407_v50 }
 0x3d1   : > { %1413 = vrot.lane.b32.xlu1 %v4061_v18, %s3595_s15 }
 0x3d5   : > { %1637 = vrot.lane.b32.xlu1 %v4065_v22, %s3596_s13 }
 0x3d6   : > { %v1247_v51 = vpop.xlane.xlu0 %1246 }
 0x3d7   : > { %3077 = vrcp.f32 %v1247_v51 }
 0x3d9   : > { %1635 = vrot.lane.b32.xlu1 %v4072_v28, %s3596_s13 }
 0x3da   : > { %v1725_v61 = vpop.permute.xlu0 %1724 }
 0x3e4   : > { %v3078_v52 = vpop.eup %3077 }
 0x3e5   : > { %v1249_v53 = vmul.f32 %v3078_v52, %v3074_v44 }
 0x3e7   : > { %2792 = vmatmul.mubr.msk.f32.vlgmr.msra.gmra.mxu1 %vm1162_vm2, %v1249_v53 }
 0x3e8   : > { %2801 = vmatprep.mubr.msk.f32.mxu1 %vm3594_vm0, %v3593_v0 }
 0x449   : > { %v1409_v55 = vpop.xlane.xlu1 %1408 }
 0x44a   : > { %3079 = vrcp.f32 %v1409_v55 }
 0x44d   : > { %v1414_v56 = vpop.permute.xlu1 %1413 }
 0x44e   : > { %2800 = vmatpush3.msra.mxu1 %v1414_v56 }
 0x44f   : > { %2809 = vmatprep.subr.mxu1 %v3593_v0 }
 0x451   : > { %v1638_v63 = vpop.permute.xlu1 %1637 }
 0x455   : > { %v1636_v3 = vpop.permute.xlu1 %1635 }
 0x457   : > { %v3080_v57 = vpop.eup %3079 }
 0x458   : > { %v1411_v58 = vmul.f32 %v3080_v57, %v3076_v49 }
 0x45a   : > { %2802 = vmatmul.mubr.msk.f32.vlgmr.msra.gmra.mxu1 %vm1162_vm2, %v1411_v58  ;;  %v2155_v58 = vld [vmem:[%s4390_s27 + $0x18] sm:$0xff] }
 0x45b   : > { %2810 = vmatpush3.msra.mxu1 %v1155_v59  ;;  %2811 = vmatprep.mubr.msk.f32.mxu1 %vm3594_vm0, %v3593_v0  ;;  %v2154_v59 = vld [vmem:[%s4390_s27 + $0x10] sm:$0xff] }
 0x45c   : > { %2819 = vmatprep.subr.mxu1 %v3593_v0 }
 0x4a7   : > { %v1319_v60 = vpop.f32.mrf.mxu1 }
 0x4a8   : > { %2812 = vmatmul.mubr.msk.f32.vlgmr.msra.gmra.mxu1 %vm1162_vm2, %v1319_v60  ;;  %v2152_v60 = vld [vmem:[%s4390_s27] sm:$0xff] }
 0x4a9   : > { %2820 = vmatpush3.msra.mxu1 %v1725_v61  ;;  %v2793_v62 = vpop.f32.mrf.mxu1  ;;  %2821 = vmatprep.mubr.msk.f32.mxu1 %vm3594_vm0, %v3593_v0  ;;  %v2252_v61 = vld [vmem:[%s4391_s29 + $0x78] sm:$0xff] }
 0x4aa   : > { %2829 = vmatprep.subr.mxu1 %v3593_v0  ;;  %v2251_v62 = vld [vmem:[%s4391_s29 + $0x70] sm:$0xff] }
 0x51a   : > { %v1485_v1 = vpop.f32.mrf.mxu1 }
 0x51b   : > { %2807 = vmatmul.mubr.msk.f32.vlgmr.msra.gmra.mxu0 %vm1162_vm2, %v1485_v1  ;;  %v2249_v1 = vld [vmem:[%s4391_s29 + $0x60] sm:$0xff] }
 0x51c   : > { %2815 = vmatpush3.xpose.msk.msra.mxu0 %vm1162_vm2, %v1638_v63  ;;  %v2803_v2 = vpop.f32.mrf.mxu1  ;;  %2816 = vmatprep.mubr.msk.f32.mxu0 %vm3594_vm0, %v3593_v0  ;;  %v2250_v63 = vld [vmem:[%s4391_s29 + $0x68] sm:$0xff] }
 0x51d   : > { %2824 = vmatprep.subr.mxu0 %v3593_v0  ;;  %v2248_v2 = vld [vmem:[%s4391_s29 + $0x58] sm:$0xff] }
 0x51f   : > { %2817 = vmatmul.mubr.msk.f32.vlgmr.msra.gmra.mxu0 %vm1162_vm2, %v1636_v3  ;;  %v2247_v3 = vld [vmem:[%s4391_s29 + $0x50] sm:$0xff] }
 0x520   : > { %2826 = vmatprep.mubr.msk.f32.mxu0 %vm3594_vm0, %v3593_v0 }
 0x568   : > { %v1631_v4 = vpop.f32.mrf.mxu1 }
 0x56a   : > { %v2813_v5 = vpop.f32.mrf.mxu1 }
 0x56b   : > { %v2245_v5 = vld [vmem:[%s4391_s29 + $0x40] sm:$0xff] }
 0x5db   : > { %v1558_v6 = vpop.f32.mrf.mxu0 }
 0x5dd   : > { %v2808_v7 = vpop.f32.mrf.mxu0 }
 0x5de   : > { %v2243_v7 = vld [vmem:[%s4391_s29 + $0x30] sm:$0xff] }
 0x5df   : > { %v1709_v8 = vpop.f32.mrf.mxu0 }
 0x5e0   : > { %v1710_v9 = vadd.f32 %v1709_v8, %v4088_v32  ;;  %v2242_v8 = vld [vmem:[%s4391_s29 + $0x28] sm:$0xff] }
 0x5e1   : > { %v2818_v10 = vpop.f32.mrf.mxu0 }
 0x5e2   : > { %v1713_v11 = vsel %vm1162_vm2, %v1710_v9, -inf  ;;  %v2240_v10 = vld [vmem:[%s4391_s29 + $0x18] sm:$0xff] }
 0x5e3   : > { %1714 = vmax.xlane.f32.xlu1 %v1713_v11 }
 0x66c   : > { %v1715_v12 = vpop.xlane.xlu1 %1714 }
 0x66d   : > { %v1716_v13 = vsub.f32 %v1710_v9, %v1715_v12  ;;  %v2241_v9 = vld [vmem:[%s4391_s29 + $0x20] sm:$0xff] }
 0x66f   : > { %v1717_v14 = vmul.f32 1.442695, %v1716_v13 }
 0x671   : > { %3081 = vpow2.f32 %v1717_v14 }
 0x67e   : > { %v3082_v16 = vpop.eup %3081 }
 0x67f   : > { %v1719_v17 = vsel %vm1162_vm2, %v3082_v16, 0.0 }
 0x680   : > { %1720 = vadd.xlane.f32.xlu0 %v1719_v17 }
 0x696   : > { %1876 = vrot.lane.b32.xlu0 %v4065_v22, %s3597_s9  ;;  %v1157_v22 = vld [vmem:[%s4302_s10 + $0x10] sm:$0xff] }
 0x697   : > { %2825 = vmatpush3.msra.mxu0 %v1157_v22  ;;  %v2237_v22 = vld [vmem:[%s4391_s29] sm:$0xff] }
 0x698   : > { %2834 = vmatprep.subr.mxu0 %v3593_v0 }
 0x69a   : > { %1874 = vrot.lane.b32.xlu0 %v4072_v28, %s3597_s9 }
 0x709   : > { %v1721_v19 = vpop.xlane.xlu0 %1720 }
 0x70a   : > { %3083 = vrcp.f32 %v1721_v19  ;;  %v2680_v19 = vld [vmem:[#allocation17] ss:$0 sm:$0xff] }
 0x70d   : > { %v1877_v21 = vpop.permute.xlu0 %1876 }
 0x711   : > { %v1875_v24 = vpop.permute.xlu0 %1874 }
 0x717   : > { %v3084_v20 = vpop.eup %3083 }
 0x718   : > { %v1723_v23 = vmul.f32 %v3084_v20, %v3082_v16  ;;  %v2679_v16 = vld [vmem:[#allocation16] ss:$0 sm:$0xff] }
 0x71a   : > { %2822 = vmatmul.mubr.msk.f32.vlgmr.msra.gmra.mxu1 %vm1162_vm2, %v1723_v23  ;;  %v2239_v23 = vld [vmem:[%s4391_s29 + $0x10] sm:$0xff] }
 0x71b   : > { %2830 = vmatpush3.xpose.msk.msra.mxu1 %vm1162_vm2, %v1877_v21  ;;  %2831 = vmatprep.mubr.msk.f32.mxu1 %vm3594_vm0, %v3593_v0 }
 0x71c   : > { %2839 = vmatprep.subr.mxu1 %v3593_v0 }
 0x71e   : > { %2832 = vmatmul.mubr.msk.f32.vlgmr.msra.gmra.mxu1 %vm1162_vm2, %v1875_v24  ;;  %v2238_v24 = vld [vmem:[%s4391_s29 + $0x8] sm:$0xff] }
 0x71f   : > { %2841 = vmatprep.mubr.msk.f32.mxu1 %vm3594_vm0, %v3593_v0  ;;  %2840 = vmatpush3.msra.mxu1 %v1158_v37 }
 0x720   : > { %2855 = vmatprep.subr.mxu1 %v3593_v0 }
 0x7da   : > { %v1796_v25 = vpop.f32.mrf.mxu1 }
 0x7db   : > { %2827 = vmatmul.mubr.msk.f32.vlgmr.msra.gmra.mxu0 %vm1162_vm2, %v1796_v25  ;;  %v2681_v25 = vld [vmem:[#allocation22] ss:$0 sm:$0xff] }
 0x7dc   : > { %v2823_v26 = vpop.f32.mrf.mxu1  ;;  %2836 = vmatprep.mubr.msk.f32.mxu0 %vm3594_vm0, %v3593_v0 }
 0x7de   : > { %v1948_v27 = vpop.f32.mrf.mxu1 }
 0x7df   : > { %v1949_v28 = vadd.f32 %v1948_v27, %v4088_v32  ;;  %v1632_v32 = vadd.f32 %v1631_v4, %v1558_v6  ;;  %v2246_v4 = vld [vmem:[%s4391_s29 + $0x48] sm:$0xff]  ;;  %v2244_v6 = vld [vmem:[%s4391_s29 + $0x38] sm:$0xff] }
 0x7e0   : > { %v2833_v29 = vpop.f32.mrf.mxu1 }
 0x7e1   : > { %v1952_v30 = vsel %vm1162_vm2, %v1949_v28, -inf }
 0x7e2   : > { %1953 = vmax.xlane.f32.xlu0 %v1952_v30  ;;  %v2683_v30 = vld [vmem:[#allocation23] ss:$0 sm:$0xff] }
 0x86b   : > { %v1954_v31 = vpop.xlane.xlu0 %1953 }
 0x86c   : > { %v1955_v33 = vsub.f32 %v1949_v28, %v1954_v31 }
 0x86e   : > { %v1956_v34 = vmul.f32 1.442695, %v1955_v33 }
 0x870   : > { %3085 = vpow2.f32 %v1956_v34 }
 0x87d   : > { %v3086_v35 = vpop.eup %3085 }
 0x87e   : > { %v1958_v36 = vsel %vm1162_vm2, %v3086_v35, 0.0 }
 0x87f   : > { %1959 = vadd.xlane.f32.xlu1 %v1958_v36 }
 0x890   : > { %1963 = vrot.lane.b32.xlu1 %v4061_v18, %s3597_s9  ;;  %s897_s9 = scalar_lea.vmem [#allocation25], %s3945_s11  ;;  %s3471_s11 = scalar_lea.vmem %s3470_s20, 256 }
 0x891   : > { %s2376_s0 = sshll.u32 %s897_s9, 4  ;;  %s2377_s0 = int_to_ptr.vmem [resolvable:$true] %s2376_s0 }
 0x892   : > { %s3465_s16 = scalar_lea.vmem %s2377_s0, 128  ;;  %p3472_p5 = scmp.lt.s32.totalorder %s2377_s0, %s3470_s20 }
 0x893   : > { %p3466_p10 = scmp.ne.s32.totalorder %s2377_s0, %s3465_s16  ;;  %p3473_p9 = scmp.lt.s32.totalorder %s3471_s11, %s3465_s16 }
 0x895   : > { %p3467_p8 = pnand %p3466_p10, %p4396_p11  ;;  %p3474_p3 = por %p3473_p9, %p3472_p5 }
 0x897   : > { %p3468_p7 = pneg %p3467_p8 }
 0x899   : > { %p3475_p6 = pnand %p3474_p3, %p3468_p7 }
 0x89b   : > { %v1869_v38 = vpop.f32.mrf.mxu0 }
 0x89c   : > { %v1873_v39 = vadd.f32 %v1869_v38, %v1632_v32 }
 0x89d   : > { %v2828_v40 = vpop.f32.mrf.mxu0 }
 0x908   : > { %v1960_v41 = vpop.xlane.xlu1 %1959 }
 0x909   : > { %3087 = vrcp.f32 %v1960_v41 }
 0x90c   : > { %v1964_v42 = vpop.permute.xlu1 %1963 }
 0x90d   : > { %2835 = vmatpush3.msra.mxu0 %v1964_v42 }
 0x90e   : > { %2844 = vmatprep.subr.mxu0 %v3593_v0 }
 0x916   : > { %v3088_v43 = vpop.eup %3087 }
 0x917   : > { %v1962_v44 = vmul.f32 %v3088_v43, %v3086_v35 }
 0x919   : > { %2837 = vmatmul.mubr.msk.f32.vlgmr.msra.gmra.mxu0 %vm1162_vm2, %v1962_v44  ;;  %v2684_v44 = vld [vmem:[#allocation19] ss:$0 sm:$0xff] }
 0x91a   : > { %2852 = vmatprep.mubr.msk.f32.mxu0 %vm3594_vm0, %v3593_v0  ;;  %2845 = vmatpush3.msra.mxu0 %v2155_v58 }
 0x91b   : > { %2846 = vmatprep.subr.mxu0 %v3593_v0 }
 0x91c   : > { %2847 = vmatpush3.msra.mxu0 %v2154_v59 }
 0x91d   : > { %2848 = vmatprep.subr.mxu0 %v3593_v0 }
 0x9d9   : > { %v2035_v18 = vpop.f32.mrf.mxu0 }
 0x9da   : > { %2842 = vmatmul.mubr.msk.f32.vlgmr.msra.gmra.mxu1 %vm1162_vm2, %v2035_v18 }
 0x9db   : > { %v2838_v45 = vpop.f32.mrf.mxu0  ;;  %2887 = vmatprep.mubr.msk.f32.mxu1 %vm3594_vm0, %v3593_v0  ;;  %2856 = vmatpush3.msra.mxu1 %v2252_v61 }
 0x9dc   : > { %2857 = vmatprep.subr.mxu1 %v3593_v0  ;;  %v2685_v45 = vld [vmem:[#allocation20] ss:$0 sm:$0xff] }
 0x9dd   : > { %2858 = vmatpush3.msra.mxu1 %v2251_v62 }
 0x9de   : > { %2859 = vmatprep.subr.mxu1 %v3593_v0 }
 0x9df   : > { %2860 = vmatpush3.msra.mxu1 %v2250_v63 }
 0x9e0   : > { %2861 = vmatprep.subr.mxu1 %v3593_v0 }
 0x9e1   : > { %2862 = vmatpush3.msra.mxu1 %v2249_v1 }
 0x9e2   : > { %2863 = vmatprep.subr.mxu1 %v3593_v0 }
 0x9e3   : > { %2864 = vmatpush3.msra.mxu1 %v2248_v2 }
 0x9e4   : > { %2865 = vmatprep.subr.mxu1 %v3593_v0 }
 0x9e5   : > { %2866 = vmatpush3.msra.mxu1 %v2247_v3 }
 0x9e6   : > { %2867 = vmatprep.subr.mxu1 %v3593_v0 }
 0x9e7   : > { %2868 = vmatpush3.msra.mxu1 %v2246_v4 }
 0x9e8   : > { %2869 = vmatprep.subr.mxu1 %v3593_v0 }
 0x9e9   : > { %2870 = vmatpush3.msra.mxu1 %v2245_v5 }
 0x9ea   : > { %2871 = vmatprep.subr.mxu1 %v3593_v0 }
 0x9eb   : > { %2872 = vmatpush3.msra.mxu1 %v2244_v6 }
 0x9ec   : > { %2873 = vmatprep.subr.mxu1 %v3593_v0 }
 0x9ed   : > { %2874 = vmatpush3.msra.mxu1 %v2243_v7 }
 0x9ee   : > { %2875 = vmatprep.subr.mxu1 %v3593_v0 }
 0x9ef   : > { %2876 = vmatpush3.msra.mxu1 %v2242_v8 }
 0x9f0   : > { %2877 = vmatprep.subr.mxu1 %v3593_v0 }
 0x9f1   : > { %2878 = vmatpush3.msra.mxu1 %v2241_v9 }
 0x9f2   : > { %2879 = vmatprep.subr.mxu1 %v3593_v0 }
 0x9f3   : > { %2880 = vmatpush3.msra.mxu1 %v2240_v10 }
 0x9f4   : > { %2881 = vmatprep.subr.mxu1 %v3593_v0 }
 0x9f5   : > { %2882 = vmatpush3.msra.mxu1 %v2239_v23 }
 0x9f6   : > { %2883 = vmatprep.subr.mxu1 %v3593_v0 }
 0x9f7   : > { %2884 = vmatpush3.msra.mxu1 %v2238_v24 }
 0x9f8   : > { %2885 = vmatprep.subr.mxu1 %v3593_v0 }
 0x9f9   : > { %2886 = vmatpush3.msra.mxu1 %v2237_v22 }
 0xa9a   : > { %v2108_v46 = vpop.f32.mrf.mxu1 }
 0xa9b   : > { %v2112_v48 = vadd.f32 %v2108_v46, %v1873_v39 }
 0xa9c   : > { %v2843_v49 = vpop.f32.mrf.mxu1 }
 0xa9d   : > { %v2120_v50 = vadd.f32 %v2678_v47, %v2112_v48 }
 0xa9f   : > { %v2121_v51 = vadd.f32 %v2120_v50, %v4053_v15  ;;  %v2153_v15 = vld [vmem:[%s4390_s27 + $0x8] sm:$0xff] }
 0xaa0   : > { %2849 = vmatpush3.msra.mxu0 %v2153_v15 }
 0xaa1   : > { %v2124_v52 = vsel %vm912_vm1, %v2121_v51, 0.0  ;;  %2850 = vmatprep.subr.mxu0 %v3593_v0 }
 0xaa2   : > { %2125 = vadd.xlane.f32.xlu1 %v2124_v52  ;;  %2851 = vmatpush3.msra.mxu0 %v2152_v60 }
 0xb2b   : > { %v2126_v53 = vpop.xlane.xlu1 %2125 }
 0xb2c   : > { %v2128_v54 = vmul.f32 0.03125, %v2126_v53 }
 0xb2e   : > { %v2129_v55 = vsub.f32 %v2121_v51, %v2128_v54 }
 0xb30   : > { %v2130_v56 = vmul.f32 %v2129_v55, %v2129_v55 }
 0xb32   : > { %v2131_v57 = vsel %vm912_vm1, %v2130_v56, 0.0 }
 0xb33   : > { %2132 = vadd.xlane.f32.xlu0 %v2131_v57 }
 0xbbc   : > { %v2133_v11 = vpop.xlane.xlu0 %2132 }
 0xbbd   : > { %v2134_v12 = vmul.f32 0.03125, %v2133_v11 }
 0xbbf   : > { %v2135_v13 = vadd.f32 1e-05, %v2134_v12 }
 0xbc1   : > { %3089 = vrsqrt.f32 %v2135_v13 }
 0xbce   : > { %v3090_v14 = vpop.eup %3089 }
 0xbcf   : > { %v2137_v17 = vmul.f32 %v3090_v14, %v2129_v55 }
 0xbd1   : > { %v2144_v20 = vmul.f32 %v2679_v16, %v2137_v17 }
 0xbd3   : > { %v2151_v21 = vadd.f32 %v2680_v19, %v2144_v20 }
 0xbd5   : > { %2853 = vmatmul.mubr.msk.f32.vlgmr.msra.gmra.mxu0 %vm912_vm1, %v2151_v21 }
 0xc95   : > { %v2232_v26 = vpop.f32.mrf.mxu0 }
 0xc96   : > { %v2233_v27 = vadd.f32 %v2681_v25, %v2232_v26 }
 0xc97   : > { %v2854_v28 = vpop.f32.mrf.mxu0 }
 0xc98   : > { %v2236_v29 = vmax.f32 %v2233_v27, 0.0 }
 0xc9a   : > { %2888 = vmatmul.mubr.f32.vlgmr.msra.gmra.mxu1 %v2236_v29 }
 0xd5a   : > { %v2326_v31 = vpop.f32.mrf.mxu1 }
 0xd5b   : > { %v2327_v33 = vadd.f32 %v2683_v30, %v2326_v31 }
 0xd5c   : > { %v2889_v34 = vpop.f32.mrf.mxu1 }
 0xd5d   : > { %v2330_v35 = vadd.f32 %v2327_v33, %v2151_v21 }
 0xd5f   : > { %v2333_v36 = vsel %vm912_vm1, %v2330_v35, 0.0 }
 0xd60   : > { %2334 = vadd.xlane.f32.xlu0 %v2333_v36 }
 0xde9   : > { %v2335_v37 = vpop.xlane.xlu0 %2334 }
 0xdea   : > { %v2336_v32 = vmul.f32 0.03125, %v2335_v37 }
 0xdec   : > { %v2337_v0 = vsub.f32 %v2330_v35, %v2336_v32 }
 0xdee   : > { %v2338_v38 = vmul.f32 %v2337_v0, %v2337_v0 }
 0xdf0   : > { %v2339_v39 = vsel %vm912_vm1, %v2338_v38, 0.0 }
 0xdf1   : > { %2340 = vadd.xlane.f32.xlu0 %v2339_v39 }
 0xe7a   : > { %v2341_v40 = vpop.xlane.xlu0 %2340 }
 0xe7b   : > { %v2342_v41 = vmul.f32 0.03125, %v2341_v40 }
 0xe7d   : > { %v2343_v42 = vadd.f32 1e-05, %v2342_v41 }
 0xe7f   : > { %3091 = vrsqrt.f32 %v2343_v42 }
 0xe8c   : > { %v3092_v43 = vpop.eup %3091 }
 0xe8d   : > { %v2345_v18 = vmul.f32 %v3092_v43, %v2337_v0 }
 0xe8f   : > { %v2352_v46 = vmul.f32 %v2684_v44, %v2345_v18 }
 0xe91   : > { %v2359_v47 = vadd.f32 %v2685_v45, %v2352_v46 }
 0xe93   : > { %2360 = vst.msk [vmem:[%s897_s9] sm:$0xff] %vm912_vm1, %v2359_v47 }
 0xe94   : > { %3478 = shalt.err (!%p3475_p6)
}
 0xe95   : > { %s3479_s15 = scalar_lea.hbm %s2374_s1, 128  ;;  %s3483_s18 = scalar_lea.hbm %s4395_s3, 256 }
 0xe96   : > { %p3480_p1 = scmp.ne.s32.totalorder %s2374_s1, %s3479_s15  ;;  %p3484_p4 = scmp.lt.s32.totalorder %s2374_s1, %s4395_s3 }
 0xe97   : > { %p3485_p13 = scmp.lt.s32.totalorder %s3483_s18, %s3479_s15 }
 0xe98   : > { %p3481_p12 = pnand %p3480_p1, %p4396_p11 }
 0xe99   : > { %p3486_p2 = por %p3485_p13, %p3484_p4 }
 0xe9a   : > { %p3482_p0 = pneg %p3481_p12 }
 0xe9c   : > { %p3487_p10 = pnand %p3486_p2, %p3482_p0 }
 0xe9e   : > { %3490 = shalt.err (!%p3487_p10)
}
 0xe9f   : > { %2938 = dma.vmem_to_hbm [thread:$0]  (%p4396_p11), %s2377_s0, 128, %s2374_s1, %s2362_s5  }
 0xea0 PF: > { %s4397_s24 = sld [smem:[#allocation36_spill]]  ;;  %p4400_p7 = scmp.ge.s32.totalorder %s3577_s25, 2 }
 0xea1   : > { %s4398_s4 = sld [smem:[#allocation42_spill]] }
 0xea6   : > { %s2388_s2 = sand.u32 1, %s4397_s24  }
 0xea7   : > { %p4399_p8 = scmp.ne.s32.totalorder %s4398_s4, 0  ;;  %s2389_s16 = scalar_lea.sflag [#allocation4], %s2388_s2 }
 0xea9   : > { %p2985_p5 = pnand %p4400_p7, %p4399_p8 }
 0xeab   : > { %p2986_p9 = pneg %p2985_p5 }
 0xead   : > { %3552 = dma.done.wait (%p2986_p9), %s2389_s16, 128  }
 0xeae   : > { %3554 = vsyncadd (%p2986_p9), %s2389_s16, 4294967168  ;;  %s47_s25 = sadd.s32 1, %s3577_s25   ;;  %s4401_s30 = sld [smem:[#allocation41_spill]] }
 0xeaf   : > { %p44_p3 = scmp.ge.s32.totalorder %s47_s25, 4   ;;  %s4402_s24 = sld [smem:[#allocation38_spill]] }
 0xeb0   : > { %s4403_s2 = sld [smem:[#allocation39_spill]]  ;;  %s4404_s1 = smov %s3561_s22 }
 0xeb1   : > { %s4405_s22 = smov %s3565_s23  ;;  %46 = sbr.rel (!%p44_p3) target bundleno = 30 (0x1e), region = 222 }
 0xeb4   : > { %s4406_s23 = smov %s4401_s30 }
 0xeb6   :  { %2394 = vsyncpa [#allocation3], 1 }
 0xeb7   :  { %2396 = vsyncpa [#allocation3 + $0x1], 1 }
 0xeb8   :  { %2397 = vsyncpa [#allocation6], 1 }
 0xeb9   :  { %2399 = vsyncpa [#allocation6 + $0x1], 1 }
 0xeba   :  { %2400 = vsyncpa [#allocation9], 1 }
 0xebb   :  { %2402 = vsyncpa [#allocation9 + $0x1], 1 }
 0xebc   :  { %2403 = vsyncpa [#allocation12], 1 }
 0xebd   :  { %2404 = vsyncpa [#allocation15], 1 }
 0xebe   :  { %2405 = vsyncpa [#allocation18], 1 }
 0xebf   :  { %2406 = vsyncpa [#allocation21], 1 }
 0xec0   :  { %2407 = vsyncpa [#allocation24], 1 }
 0xec1   :  { %2408 = vsyncpa [#allocation4], 1 }
 0xec2   :  { %2410 = vsyncpa [#allocation4 + $0x1], 1 }

</bundles_post_ra>
